<compile_context>
chip_gen: v5e
topology: v5e:2x2
jax: 0.10.0
libtpu: 0.0.40
codegen_flags: <defaults>
</compile_context>

<pallas_src>
import jax
import jax.numpy as jnp
from jax import lax
from jax.experimental import pallas as pl
from jax.experimental.pallas import tpu as pltpu


# ----------------------------------------------------------------------------
# Fused kernel factory (shapes baked in via closure)
# ----------------------------------------------------------------------------
def _make_fused_block_kernel(H):
    def _roll_rows(x, shift):
        # jnp.roll semantics on the sublane (row) axis: out[r] = in[(r - shift) % H]
        s = shift % H
        if s == 0:
            return x
        return pltpu.roll(x, shift=s, axis=0)

    def _dot(a, b):
        return jnp.dot(a, b, preferred_element_type=jnp.float32,
                       precision=lax.Precision.HIGHEST)

    def kernel(x_ref,
               dw1_up_ref, dw1_mid_ref, dw1_dn_ref, db1_ref,
               pw1_ref, pb1_ref,
               dw2_up_ref, dw2_mid_ref, dw2_dn_ref, db2_ref,
               pw2_ref, pb2_ref,
               mask_up_ref, mask_dn_ref,
               o_ref):
        def dw_stage(h, up_ref, mid_ref, dn_ref, b_ref):
            # Vertical halo via sublane rolls; wrapped boundary row zeroed by a
            # precomputed mask.  Horizontal taps + BN scale live inside the
            # banded MXU matrices.
            r_up = _roll_rows(h, 1) * mask_up_ref[...]      # h[row-1], row 0 -> 0
            r_dn = _roll_rows(h, -1) * mask_dn_ref[...]     # h[row+1], row H-1 -> 0
            y = (_dot(r_up, up_ref[...])
                 + _dot(h, mid_ref[...])
                 + _dot(r_dn, dn_ref[...]))
            return jnp.maximum(y + b_ref[...], 0.0)

        def pw_stage(h, w_ref, b_ref, residual=None):
            # 1x1 conv + folded-BN as one block-diagonal MXU matmul.
            y = _dot(h, w_ref[...]) + b_ref[...]
            if residual is not None:
                y = y + residual
            return jnp.maximum(y, 0.0)

        h = dw_stage(x_ref[...], dw1_up_ref, dw1_mid_ref, dw1_dn_ref, db1_ref)
        h = pw_stage(h, pw1_ref, pb1_ref)
        h = dw_stage(h, dw2_up_ref, dw2_mid_ref, dw2_dn_ref, db2_ref)
        # Residual: re-read from VMEM here instead of carrying it live.
        o_ref[...] = pw_stage(h, pw2_ref, pb2_ref, residual=x_ref[...])

    return kernel


# ----------------------------------------------------------------------------
# Trace-time parameter preparation (BN folding + MXU weight construction)
# ----------------------------------------------------------------------------
def _fold_bn(gamma, beta, mean, var, eps=1e-5):
    scale = gamma / jnp.sqrt(var + eps)
    bias = beta - mean * scale
    return scale, bias


def _dw_band_matrices(dw_w, bn_scale, W):
    """Depthwise 3x3 (+ folded BN scale) as three banded (WC, WC) matrices,
    one per vertical tap dy:  M_dy[(w+dx-1)*C + c, w*C + c] = k[dy, dx, c].
    Horizontal zero-padding is baked in (out-of-range entries stay zero)."""
    C = dw_w.shape[-1]
    WC = W * C
    k = (dw_w * bn_scale[None, None, :]).astype(jnp.float32)       # (3, 3, C)
    w_out = jnp.arange(W)
    c_idx = jnp.arange(C)
    mats = []
    for dy in range(3):
        m = jnp.zeros((WC, WC), jnp.float32)
        for dx in range(3):
            w_in = w_out + (dx - 1)
            valid = ((w_in >= 0) & (w_in < W)).astype(jnp.float32)  # (W,)
            rows = (jnp.clip(w_in, 0, W - 1)[:, None] * C + c_idx[None, :]).reshape(-1)
            cols = (w_out[:, None] * C + c_idx[None, :]).reshape(-1)
            vals = (valid[:, None] * k[dy, dx][None, :]).reshape(-1)
            m = m.at[rows, cols].add(vals)
        mats.append(m)
    return mats


def _pw_block_diag(pw_w, bn_scale, W):
    """1x1 conv (+ folded BN scale) as a block-diagonal (WC, WC) matrix:
    big[w*C+ci, w*C+co] = pw_w[ci, co] * scale[co]."""
    w = (pw_w * bn_scale[None, :]).astype(jnp.float32)              # (Cin, Cout)
    C = w.shape[0]
    eye = jnp.eye(W, dtype=jnp.float32)
    return jnp.einsum("uv,ij->uivj", eye, w).reshape(W * C, W * C)


def _tile_bias(bias, W, H):
    WC = W * bias.shape[0]
    return jnp.broadcast_to(jnp.tile(bias.astype(jnp.float32), W), (H, WC))


def _edge_masks(H, WC):
    ones = jnp.ones((H, WC), jnp.float32)
    return ones.at[0, :].set(0.0), ones.at[H - 1, :].set(0.0)


def make_params(key, inplanes, planes):
    assert inplanes == planes, "stride=1 residual path requires inplanes == planes"
    ks = jax.random.split(key, 8)

    def bn_params(k, c):
        k1, k2, k3 = jax.random.split(k, 3)
        gamma = 1.0 + 0.1 * jax.random.normal(k1, (c,), jnp.float32)
        beta = 0.1 * jax.random.normal(k2, (c,), jnp.float32)
        mean = 0.05 * jax.random.normal(k3, (c,), jnp.float32)
        var = jnp.ones((c,), jnp.float32)
        return _fold_bn(gamma, beta, mean, var)

    p = {}
    p["dw1_w"] = 0.2 * jax.random.normal(ks[0], (3, 3, inplanes), jnp.float32)
    p["dw1_scale"], p["dw1_bias"] = bn_params(ks[1], inplanes)
    p["pw1_w"] = 0.2 * jax.random.normal(ks[2], (inplanes, planes), jnp.float32)
    p["bn1_scale"], p["bn1_bias"] = bn_params(ks[3], planes)
    p["dw2_w"] = 0.2 * jax.random.normal(ks[4], (3, 3, planes), jnp.float32)
    p["dw2_scale"], p["dw2_bias"] = bn_params(ks[5], planes)
    p["pw2_w"] = 0.2 * jax.random.normal(ks[6], (planes, planes), jnp.float32)
    p["bn2_scale"], p["bn2_bias"] = bn_params(ks[7], planes)
    return p


# ----------------------------------------------------------------------------
# Forward pass: one fused pallas_call, gridded over the batch
# ----------------------------------------------------------------------------
def basic_block_forward(x_nchw, params):
    N, C, H, W = x_nchw.shape
    WC = W * C
    assert WC % 128 == 0, "lane-dense layout requires W*C to be a multiple of 128"
    assert H % 8 == 0, "sublane extent should be a multiple of 8 for f32"

    # NCHW -> NHWC -> lane-dense (N, H, W*C).
    # TODO(synk): at real sizes keep activations in this lane-dense layout
    # across consecutive BasicBlocks so these HBM transposes disappear.
    x3 = jnp.transpose(x_nchw, (0, 2, 3, 1)).astype(jnp.float32).reshape(N, H, WC)

    dw1_up, dw1_mid, dw1_dn = _dw_band_matrices(params["dw1_w"], params["dw1_scale"], W)
    db1 = _tile_bias(params["dw1_bias"], W, H)
    pw1 = _pw_block_diag(params["pw1_w"], params["bn1_scale"], W)
    pb1 = _tile_bias(params["bn1_bias"], W, H)
    dw2_up, dw2_mid, dw2_dn = _dw_band_matrices(params["dw2_w"], params["dw2_scale"], W)
    db2 = _tile_bias(params["dw2_bias"], W, H)
    pw2 = _pw_block_diag(params["pw2_w"], params["bn2_scale"], W)
    pb2 = _tile_bias(params["bn2_bias"], W, H)
    mask_up, mask_dn = _edge_masks(H, WC)

    kernel = _make_fused_block_kernel(H)

    act_spec = pl.BlockSpec((None, H, WC), lambda n: (n, 0, 0))

    def const_spec(shape):
        r = len(shape)
        return pl.BlockSpec(shape, lambda n, _r=r: (0,) * _r)

    out = pl.pallas_call(
        kernel,
        out_shape=jax.ShapeDtypeStruct((N, H, WC), jnp.float32),
        grid=(N,),
        in_specs=[
            act_spec,
            const_spec((WC, WC)), const_spec((WC, WC)), const_spec((WC, WC)),
            const_spec((H, WC)),
            const_spec((WC, WC)), const_spec((H, WC)),
            const_spec((WC, WC)), const_spec((WC, WC)), const_spec((WC, WC)),
            const_spec((H, WC)),
            const_spec((WC, WC)), const_spec((H, WC)),
            const_spec((H, WC)), const_spec((H, WC)),
        ],
        out_specs=act_spec,
        compiler_params=pltpu.CompilerParams(
            dimension_semantics=("parallel",),
            vmem_limit_bytes=32 * 1024 * 1024),
    )(x3, dw1_up, dw1_mid, dw1_dn, db1, pw1, pb1,
      dw2_up, dw2_mid, dw2_dn, db2, pw2, pb2, mask_up, mask_dn)

    return jnp.transpose(out.reshape(N, H, W, C), (0, 3, 1, 2))


# ----------------------------------------------------------------------------
# Pure-JAX reference (for correctness check)
# ----------------------------------------------------------------------------
def basic_block_reference(x_nchw, params):
    x = jnp.transpose(x_nchw, (0, 2, 3, 1)).astype(jnp.float32)  # NHWC

    def dw_stage(h, w, scale, bias):
        n, hh, ww, c = h.shape
        hp = jnp.pad(h, ((0, 0), (1, 1), (1, 1), (0, 0)))
        acc = jnp.zeros_like(h)
        for dy in range(3):
            for dx in range(3):
                acc = acc + hp[:, dy:dy + hh, dx:dx + ww, :] * w[dy, dx]
        return jnp.maximum(acc * scale + bias, 0.0)

    def pw_stage(h, w, scale, bias, residual=None):
        y = jnp.einsum("nhwc,cd->nhwd", h, w, precision=lax.Precision.HIGHEST)
        y = y * scale + bias
        if residual is not None:
            y = y + residual
        return jnp.maximum(y, 0.0)

    h = dw_stage(x, params["dw1_w"], params["dw1_scale"], params["dw1_bias"])
    h = pw_stage(h, params["pw1_w"], params["bn1_scale"], params["bn1_bias"])
    h = dw_stage(h, params["dw2_w"], params["dw2_scale"], params["dw2_bias"])
    h = pw_stage(h, params["pw2_w"], params["bn2_scale"], params["bn2_bias"],
                 residual=x)
    return jnp.transpose(h, (0, 3, 1, 2))


if __name__ == "__main__":
    key = jax.random.PRNGKey(0)
    k_x, k_p = jax.random.split(key)

    # inplanes = planes = 8, stride = 1  ->  W*C = 128 (exactly lane-dense)
    N, C, H, W = 2, 8, 16, 16
    x = jax.random.normal(k_x, (N, C, H, W), jnp.float32)
    params = make_params(k_p, C, C)

    out = jax.jit(basic_block_forward)(x, params)
    out = jax.block_until_ready(out)

    assert out.shape == (N, C, H, W)
    assert bool(jnp.all(jnp.isfinite(out)))
    assert bool(jnp.all(out >= 0.0))          # final ReLU

    ref = basic_block_reference(x, params)
    max_err = float(jnp.max(jnp.abs(out - ref)))
    assert jnp.allclose(out, ref, rtol=2e-3, atol=2e-3), max_err

    print("KERNEL_OK")
</pallas_src>

<mosaic_0001>
module attributes {stable_mosaic.version = 11 : i64} {
  func.func @kernel(%arg0: i32, %arg1: memref<1x16x128xf32, #tpu.memory_space<vmem>>, %arg2: memref<128x128xf32, #tpu.memory_space<vmem>>, %arg3: memref<128x128xf32, #tpu.memory_space<vmem>>, %arg4: memref<128x128xf32, #tpu.memory_space<vmem>>, %arg5: memref<16x128xf32, #tpu.memory_space<vmem>>, %arg6: memref<128x128xf32, #tpu.memory_space<vmem>>, %arg7: memref<16x128xf32, #tpu.memory_space<vmem>>, %arg8: memref<128x128xf32, #tpu.memory_space<vmem>>, %arg9: memref<128x128xf32, #tpu.memory_space<vmem>>, %arg10: memref<128x128xf32, #tpu.memory_space<vmem>>, %arg11: memref<16x128xf32, #tpu.memory_space<vmem>>, %arg12: memref<128x128xf32, #tpu.memory_space<vmem>>, %arg13: memref<16x128xf32, #tpu.memory_space<vmem>>, %arg14: memref<16x128xf32, #tpu.memory_space<vmem>>, %arg15: memref<16x128xf32, #tpu.memory_space<vmem>>, %arg16: memref<1x16x128xf32, #tpu.memory_space<vmem>>) attributes {dimension_semantics = [#tpu.dimension_semantics<parallel>], iteration_bounds = array<i64: 2>, scalar_prefetch = 0 : i64, scratch_operands = 0 : i64, tpu.core_type = #tpu.core_type<tc>, window_params = [{transform_indices = @transform_0, window_bounds = array<i64: 1, 16, 128>}, {pipeline_mode = #tpu.pipeline_mode<synchronous>, transform_indices = @transform_1, window_bounds = array<i64: 128, 128>}, {pipeline_mode = #tpu.pipeline_mode<synchronous>, transform_indices = @transform_2, window_bounds = array<i64: 128, 128>}, {pipeline_mode = #tpu.pipeline_mode<synchronous>, transform_indices = @transform_3, window_bounds = array<i64: 128, 128>}, {pipeline_mode = #tpu.pipeline_mode<synchronous>, transform_indices = @transform_4, window_bounds = array<i64: 16, 128>}, {pipeline_mode = #tpu.pipeline_mode<synchronous>, transform_indices = @transform_5, window_bounds = array<i64: 128, 128>}, {pipeline_mode = #tpu.pipeline_mode<synchronous>, transform_indices = @transform_6, window_bounds = array<i64: 16, 128>}, {pipeline_mode = #tpu.pipeline_mode<synchronous>, transform_indices = @transform_7, window_bounds = array<i64: 128, 128>}, {pipeline_mode = #tpu.pipeline_mode<synchronous>, transform_indices = @transform_8, window_bounds = array<i64: 128, 128>}, {pipeline_mode = #tpu.pipeline_mode<synchronous>, transform_indices = @transform_9, window_bounds = array<i64: 128, 128>}, {pipeline_mode = #tpu.pipeline_mode<synchronous>, transform_indices = @transform_10, window_bounds = array<i64: 16, 128>}, {pipeline_mode = #tpu.pipeline_mode<synchronous>, transform_indices = @transform_11, window_bounds = array<i64: 128, 128>}, {pipeline_mode = #tpu.pipeline_mode<synchronous>, transform_indices = @transform_12, window_bounds = array<i64: 16, 128>}, {pipeline_mode = #tpu.pipeline_mode<synchronous>, transform_indices = @transform_13, window_bounds = array<i64: 16, 128>}, {pipeline_mode = #tpu.pipeline_mode<synchronous>, transform_indices = @transform_14, window_bounds = array<i64: 16, 128>}, {transform_indices = @transform_15, window_bounds = array<i64: 1, 16, 128>}]} {
    %c0 = arith.constant 0 : index
    %c0_0 = arith.constant 0 : index
    %c0_1 = arith.constant 0 : index
    %0 = vector.load %arg1[%c0, %c0_0, %c0_1] : memref<1x16x128xf32, #tpu.memory_space<vmem>>, vector<1x16x128xf32>
    %1 = vector.shape_cast %0 : vector<1x16x128xf32> to vector<16x128xf32>
    %c1_i32 = arith.constant 1 : i32
    %2 = tpu.dynamic_rotate %1 by %c1_i32 dim 0 : vector<16x128xf32>, i32 -> vector<16x128xf32>
    %c0_2 = arith.constant 0 : index
    %c0_3 = arith.constant 0 : index
    %3 = vector.load %arg14[%c0_2, %c0_3] : memref<16x128xf32, #tpu.memory_space<vmem>>, vector<16x128xf32>
    %4 = arith.mulf %2, %3 : vector<16x128xf32>
    %c15_i32 = arith.constant 15 : i32
    %5 = tpu.dynamic_rotate %1 by %c15_i32 dim 0 : vector<16x128xf32>, i32 -> vector<16x128xf32>
    %c0_4 = arith.constant 0 : index
    %c0_5 = arith.constant 0 : index
    %6 = vector.load %arg15[%c0_4, %c0_5] : memref<16x128xf32, #tpu.memory_space<vmem>>, vector<16x128xf32>
    %7 = arith.mulf %5, %6 : vector<16x128xf32>
    %c0_6 = arith.constant 0 : index
    %c0_7 = arith.constant 0 : index
    %8 = vector.load %arg2[%c0_6, %c0_7] : memref<128x128xf32, #tpu.memory_space<vmem>>, vector<128x128xf32>
    %cst = arith.constant dense<0.000000e+00> : vector<16x128xf32>
    %9 = tpu.matmul %4, %8, %cst {dimension_numbers = #tpu.dot_dimension_numbers<[1], [0], [0], [1], [0, 0, 1, 1], [], []>, precision = #tpu.contract_precision<fp32>} : vector<16x128xf32>, vector<128x128xf32>, vector<16x128xf32> -> vector<16x128xf32>
    %c0_8 = arith.constant 0 : index
    %c0_9 = arith.constant 0 : index
    %10 = vector.load %arg3[%c0_8, %c0_9] : memref<128x128xf32, #tpu.memory_space<vmem>>, vector<128x128xf32>
    %cst_10 = arith.constant dense<0.000000e+00> : vector<16x128xf32>
    %11 = tpu.matmul %1, %10, %cst_10 {dimension_numbers = #tpu.dot_dimension_numbers<[1], [0], [0], [1], [0, 0, 1, 1], [], []>, precision = #tpu.contract_precision<fp32>} : vector<16x128xf32>, vector<128x128xf32>, vector<16x128xf32> -> vector<16x128xf32>
    %12 = arith.addf %9, %11 : vector<16x128xf32>
    %c0_11 = arith.constant 0 : index
    %c0_12 = arith.constant 0 : index
    %13 = vector.load %arg4[%c0_11, %c0_12] : memref<128x128xf32, #tpu.memory_space<vmem>>, vector<128x128xf32>
    %cst_13 = arith.constant dense<0.000000e+00> : vector<16x128xf32>
    %14 = tpu.matmul %7, %13, %cst_13 {dimension_numbers = #tpu.dot_dimension_numbers<[1], [0], [0], [1], [0, 0, 1, 1], [], []>, precision = #tpu.contract_precision<fp32>} : vector<16x128xf32>, vector<128x128xf32>, vector<16x128xf32> -> vector<16x128xf32>
    %15 = arith.addf %12, %14 : vector<16x128xf32>
    %c0_14 = arith.constant 0 : index
    %c0_15 = arith.constant 0 : index
    %16 = vector.load %arg5[%c0_14, %c0_15] : memref<16x128xf32, #tpu.memory_space<vmem>>, vector<16x128xf32>
    %17 = arith.addf %15, %16 : vector<16x128xf32>
    %cst_16 = arith.constant 0.000000e+00 : f32
    %18 = vector.broadcast %cst_16 : f32 to vector<16x128xf32>
    %19 = arith.maximumf %17, %18 : vector<16x128xf32>
    %c0_17 = arith.constant 0 : index
    %c0_18 = arith.constant 0 : index
    %20 = vector.load %arg6[%c0_17, %c0_18] : memref<128x128xf32, #tpu.memory_space<vmem>>, vector<128x128xf32>
    %cst_19 = arith.constant dense<0.000000e+00> : vector<16x128xf32>
    %21 = tpu.matmul %19, %20, %cst_19 {dimension_numbers = #tpu.dot_dimension_numbers<[1], [0], [0], [1], [0, 0, 1, 1], [], []>, precision = #tpu.contract_precision<fp32>} : vector<16x128xf32>, vector<128x128xf32>, vector<16x128xf32> -> vector<16x128xf32>
    %c0_20 = arith.constant 0 : index
    %c0_21 = arith.constant 0 : index
    %22 = vector.load %arg7[%c0_20, %c0_21] : memref<16x128xf32, #tpu.memory_space<vmem>>, vector<16x128xf32>
    %23 = arith.addf %21, %22 : vector<16x128xf32>
    %cst_22 = arith.constant 0.000000e+00 : f32
    %24 = vector.broadcast %cst_22 : f32 to vector<16x128xf32>
    %25 = arith.maximumf %23, %24 : vector<16x128xf32>
    %c1_i32_23 = arith.constant 1 : i32
    %26 = tpu.dynamic_rotate %25 by %c1_i32_23 dim 0 : vector<16x128xf32>, i32 -> vector<16x128xf32>
    %c0_24 = arith.constant 0 : index
    %c0_25 = arith.constant 0 : index
    %27 = vector.load %arg14[%c0_24, %c0_25] : memref<16x128xf32, #tpu.memory_space<vmem>>, vector<16x128xf32>
    %28 = arith.mulf %26, %27 : vector<16x128xf32>
    %c15_i32_26 = arith.constant 15 : i32
    %29 = tpu.dynamic_rotate %25 by %c15_i32_26 dim 0 : vector<16x128xf32>, i32 -> vector<16x128xf32>
    %c0_27 = arith.constant 0 : index
    %c0_28 = arith.constant 0 : index
    %30 = vector.load %arg15[%c0_27, %c0_28] : memref<16x128xf32, #tpu.memory_space<vmem>>, vector<16x128xf32>
    %31 = arith.mulf %29, %30 : vector<16x128xf32>
    %c0_29 = arith.constant 0 : index
    %c0_30 = arith.constant 0 : index
    %32 = vector.load %arg8[%c0_29, %c0_30] : memref<128x128xf32, #tpu.memory_space<vmem>>, vector<128x128xf32>
    %cst_31 = arith.constant dense<0.000000e+00> : vector<16x128xf32>
    %33 = tpu.matmul %28, %32, %cst_31 {dimension_numbers = #tpu.dot_dimension_numbers<[1], [0], [0], [1], [0, 0, 1, 1], [], []>, precision = #tpu.contract_precision<fp32>} : vector<16x128xf32>, vector<128x128xf32>, vector<16x128xf32> -> vector<16x128xf32>
    %c0_32 = arith.constant 0 : index
    %c0_33 = arith.constant 0 : index
    %34 = vector.load %arg9[%c0_32, %c0_33] : memref<128x128xf32, #tpu.memory_space<vmem>>, vector<128x128xf32>
    %cst_34 = arith.constant dense<0.000000e+00> : vector<16x128xf32>
    %35 = tpu.matmul %25, %34, %cst_34 {dimension_numbers = #tpu.dot_dimension_numbers<[1], [0], [0], [1], [0, 0, 1, 1], [], []>, precision = #tpu.contract_precision<fp32>} : vector<16x128xf32>, vector<128x128xf32>, vector<16x128xf32> -> vector<16x128xf32>
    %36 = arith.addf %33, %35 : vector<16x128xf32>
    %c0_35 = arith.constant 0 : index
    %c0_36 = arith.constant 0 : index
    %37 = vector.load %arg10[%c0_35, %c0_36] : memref<128x128xf32, #tpu.memory_space<vmem>>, vector<128x128xf32>
    %cst_37 = arith.constant dense<0.000000e+00> : vector<16x128xf32>
    %38 = tpu.matmul %31, %37, %cst_37 {dimension_numbers = #tpu.dot_dimension_numbers<[1], [0], [0], [1], [0, 0, 1, 1], [], []>, precision = #tpu.contract_precision<fp32>} : vector<16x128xf32>, vector<128x128xf32>, vector<16x128xf32> -> vector<16x128xf32>
    %39 = arith.addf %36, %38 : vector<16x128xf32>
    %c0_38 = arith.constant 0 : index
    %c0_39 = arith.constant 0 : index
    %40 = vector.load %arg11[%c0_38, %c0_39] : memref<16x128xf32, #tpu.memory_space<vmem>>, vector<16x128xf32>
    %41 = arith.addf %39, %40 : vector<16x128xf32>
    %cst_40 = arith.constant 0.000000e+00 : f32
    %42 = vector.broadcast %cst_40 : f32 to vector<16x128xf32>
    %43 = arith.maximumf %41, %42 : vector<16x128xf32>
    %c0_41 = arith.constant 0 : index
    %c0_42 = arith.constant 0 : index
    %c0_43 = arith.constant 0 : index
    %44 = vector.load %arg1[%c0_41, %c0_42, %c0_43] : memref<1x16x128xf32, #tpu.memory_space<vmem>>, vector<1x16x128xf32>
    %45 = vector.shape_cast %44 : vector<1x16x128xf32> to vector<16x128xf32>
    %c0_44 = arith.constant 0 : index
    %c0_45 = arith.constant 0 : index
    %46 = vector.load %arg12[%c0_44, %c0_45] : memref<128x128xf32, #tpu.memory_space<vmem>>, vector<128x128xf32>
    %cst_46 = arith.constant dense<0.000000e+00> : vector<16x128xf32>
    %47 = tpu.matmul %43, %46, %cst_46 {dimension_numbers = #tpu.dot_dimension_numbers<[1], [0], [0], [1], [0, 0, 1, 1], [], []>, precision = #tpu.contract_precision<fp32>} : vector<16x128xf32>, vector<128x128xf32>, vector<16x128xf32> -> vector<16x128xf32>
    %c0_47 = arith.constant 0 : index
    %c0_48 = arith.constant 0 : index
    %48 = vector.load %arg13[%c0_47, %c0_48] : memref<16x128xf32, #tpu.memory_space<vmem>>, vector<16x128xf32>
    %49 = arith.addf %47, %48 : vector<16x128xf32>
    %50 = arith.addf %49, %45 : vector<16x128xf32>
    %cst_49 = arith.constant 0.000000e+00 : f32
    %51 = vector.broadcast %cst_49 : f32 to vector<16x128xf32>
    %52 = arith.maximumf %50, %51 : vector<16x128xf32>
    %c0_50 = arith.constant 0 : index
    %c0_51 = arith.constant 0 : index
    %c0_52 = arith.constant 0 : index
    %53 = vector.load %arg16[%c0_50, %c0_51, %c0_52] : memref<1x16x128xf32, #tpu.memory_space<vmem>>, vector<1x16x128xf32>
    %54 = vector.shape_cast %53 : vector<1x16x128xf32> to vector<16x128xf32>
    %55 = vector.shape_cast %52 : vector<16x128xf32> to vector<1x16x128xf32>
    tpu.vector_store %arg16[%c0_50, %c0_51, %c0_52], %55 {strides = array<i32>} : memref<1x16x128xf32, #tpu.memory_space<vmem>>, vector<1x16x128xf32>,
    return
  }
  func.func @transform_0(%arg0: i32) -> (i32, i32, i32) {
    %c0_i32 = arith.constant 0 : i32
    %c0_i32_0 = arith.constant 0 : i32
    %c0_i32_1 = arith.constant 0 : i32
    return %arg0, %c0_i32, %c0_i32_0 : i32, i32, i32
  }
  func.func @transform_1(%arg0: i32) -> (i32, i32) {
    %c0_i32 = arith.constant 0 : i32
    %c0_i32_0 = arith.constant 0 : i32
    %c0_i32_1 = arith.constant 0 : i32
    return %c0_i32, %c0_i32_0 : i32, i32
  }
  func.func @transform_2(%arg0: i32) -> (i32, i32) {
    %c0_i32 = arith.constant 0 : i32
    %c0_i32_0 = arith.constant 0 : i32
    %c0_i32_1 = arith.constant 0 : i32
    return %c0_i32, %c0_i32_0 : i32, i32
  }
  func.func @transform_3(%arg0: i32) -> (i32, i32) {
    %c0_i32 = arith.constant 0 : i32
    %c0_i32_0 = arith.constant 0 : i32
    %c0_i32_1 = arith.constant 0 : i32
    return %c0_i32, %c0_i32_0 : i32, i32
  }
  func.func @transform_4(%arg0: i32) -> (i32, i32) {
    %c0_i32 = arith.constant 0 : i32
    %c0_i32_0 = arith.constant 0 : i32
    %c0_i32_1 = arith.constant 0 : i32
    return %c0_i32, %c0_i32_0 : i32, i32
  }
  func.func @transform_5(%arg0: i32) -> (i32, i32) {
    %c0_i32 = arith.constant 0 : i32
    %c0_i32_0 = arith.constant 0 : i32
    %c0_i32_1 = arith.constant 0 : i32
    return %c0_i32, %c0_i32_0 : i32, i32
  }
  func.func @transform_6(%arg0: i32) -> (i32, i32) {
    %c0_i32 = arith.constant 0 : i32
    %c0_i32_0 = arith.constant 0 : i32
    %c0_i32_1 = arith.constant 0 : i32
    return %c0_i32, %c0_i32_0 : i32, i32
  }
  func.func @transform_7(%arg0: i32) -> (i32, i32) {
    %c0_i32 = arith.constant 0 : i32
    %c0_i32_0 = arith.constant 0 : i32
    %c0_i32_1 = arith.constant 0 : i32
    return %c0_i32, %c0_i32_0 : i32, i32
  }
  func.func @transform_8(%arg0: i32) -> (i32, i32) {
    %c0_i32 = arith.constant 0 : i32
    %c0_i32_0 = arith.constant 0 : i32
    %c0_i32_1 = arith.constant 0 : i32
    return %c0_i32, %c0_i32_0 : i32, i32
  }
  func.func @transform_9(%arg0: i32) -> (i32, i32) {
    %c0_i32 = arith.constant 0 : i32
    %c0_i32_0 = arith.constant 0 : i32
    %c0_i32_1 = arith.constant 0 : i32
    return %c0_i32, %c0_i32_0 : i32, i32
  }
  func.func @transform_10(%arg0: i32) -> (i32, i32) {
    %c0_i32 = arith.constant 0 : i32
    %c0_i32_0 = arith.constant 0 : i32
    %c0_i32_1 = arith.constant 0 : i32
    return %c0_i32, %c0_i32_0 : i32, i32
  }
  func.func @transform_11(%arg0: i32) -> (i32, i32) {
    %c0_i32 = arith.constant 0 : i32
    %c0_i32_0 = arith.constant 0 : i32
    %c0_i32_1 = arith.constant 0 : i32
    return %c0_i32, %c0_i32_0 : i32, i32
  }
  func.func @transform_12(%arg0: i32) -> (i32, i32) {
    %c0_i32 = arith.constant 0 : i32
    %c0_i32_0 = arith.constant 0 : i32
    %c0_i32_1 = arith.constant 0 : i32
    return %c0_i32, %c0_i32_0 : i32, i32
  }
  func.func @transform_13(%arg0: i32) -> (i32, i32) {
    %c0_i32 = arith.constant 0 : i32
    %c0_i32_0 = arith.constant 0 : i32
    %c0_i32_1 = arith.constant 0 : i32
    return %c0_i32, %c0_i32_0 : i32, i32
  }
  func.func @transform_14(%arg0: i32) -> (i32, i32) {
    %c0_i32 = arith.constant 0 : i32
    %c0_i32_0 = arith.constant 0 : i32
    %c0_i32_1 = arith.constant 0 : i32
    return %c0_i32, %c0_i32_0 : i32, i32
  }
  func.func @transform_15(%arg0: i32) -> (i32, i32, i32) {
    %c0_i32 = arith.constant 0 : i32
    %c0_i32_0 = arith.constant 0 : i32
    %c0_i32_1 = arith.constant 0 : i32
    return %arg0, %c0_i32, %c0_i32_0 : i32, i32, i32
  }
}

</mosaic_0001>

<bundles_post_ra>
// kernel: tile.23
= control target key start
LH: loop header
LB: loop body
LE: loop exit
PB: predicated region body
PF: predicated region fallthrough
CT: control target
= control target key end

     0   :  { %s28_s0 = inlined_call_operand.vmem [shape: f32[8], index: 0, kind: input, shape index: {}]   ;;  %s29_s1 = inlined_call_operand.vmem [shape: f32[16,8], index: 1, kind: output, shape index: {}]  }
   0x1   :  { %v4_v0 = vld [vmem:[%s28_s0] ss:$0 sm:$0xff] }
   0x2   :  { %5 = vst [vmem:[%s29_s1] sm:$0xff] %v4_v0 }
   0x3   :  { %8 = vst [vmem:[%s29_s1 + $0x8] sm:$0xff] %v4_v0 }

// kernel: basic_block_forward.1
= control target key start
LH: loop header
LB: loop body
LE: loop exit
PB: predicated region body
PF: predicated region fallthrough
CT: control target
= control target key end

     0   :  { %s3831_s18 = smov 0   ;;  %s6481_s0 = inlined_call_operand.vmem [shape: f32[2,16,128], index: 0, kind: input, shape index: {}]   ;;  %s6482_s1 = inlined_call_operand.vmem [shape: f32[128,128], index: 1, kind: input, shape index: {}]   ;;  %s6483_s2 = inlined_call_operand.vmem [shape: f32[128,128], index: 2, kind: input, shape index: {}]   ;;  %s6484_s3 = inlined_call_operand.vmem [shape: f32[128,128], index: 3, kind: input, shape index: {}]   ;;  %s6485_s4 = inlined_call_operand.vmem [shape: f32[16,128], index: 4, kind: input, shape index: {}]   ;;  %s6486_s5 = inlined_call_operand.vmem [shape: f32[128,128], index: 5, kind: input, shape index: {}]   ;;  %s6487_s6 = inlined_call_operand.vmem [shape: f32[16,128], index: 6, kind: input, shape index: {}]   ;;  %s6488_s7 = inlined_call_operand.vmem [shape: f32[128,128], index: 7, kind: input, shape index: {}]   ;;  %s6489_s8 = inlined_call_operand.vmem [shape: f32[128,128], index: 8, kind: input, shape index: {}]   ;;  %s6490_s9 = inlined_call_operand.vmem [shape: f32[128,128], index: 9, kind: input, shape index: {}]   ;;  %s6491_s10 = inlined_call_operand.vmem [shape: f32[16,128], index: 10, kind: input, shape index: {}]   ;;  %s6492_s11 = inlined_call_operand.vmem [shape: f32[128,128], index: 11, kind: input, shape index: {}]   ;;  %s6493_s12 = inlined_call_operand.vmem [shape: f32[16,128], index: 12, kind: input, shape index: {}]   ;;  %s6494_s13 = inlined_call_operand.vmem [shape: f32[16,128], index: 13, kind: input, shape index: {}]   ;;  %s6495_s14 = inlined_call_operand.vmem [shape: f32[16,128], index: 14, kind: input, shape index: {}]   ;;  %s6496_s15 = inlined_call_operand.vmem [shape: f32[2,16,128], index: 15, kind: output, shape index: {}]  }
   0x1 LB: > { %s3716_s19 = sadd.s32 4294967295, %s3749_s18   ;;  %p3720_p0 = scmp.ge.s32.totalorder %s3749_s18, 1  ;;  %s3749_s18 = sphi %s3831_s18, %s25_s18  }
   0x2   : > { %p437_p1 = scmp.lt.s32.totalorder %s3749_s18, 3 }
   0x4   : > { %p438_p2 = pnand %p3720_p0, %p437_p1 }
   0x6   : > { %441 = sbr.rel (%p438_p2) target bundleno = 916 (0x394), region = 80 }
   0xb   : > { %v548_v0 = vld [vmem:[%s6483_s2 + $0x78] sm:$0xff]  ;;  %v547_v1 = vld [vmem:[%s6483_s2 + $0x70] sm:$0xff]  ;;  %v546_v2 = vld [vmem:[%s6483_s2 + $0x68] sm:$0xff]  ;;  %p4071_p3 = scmp.lt.s32.totalorder %s3716_s19, 1 }
   0xc   : > { %v3848_v3 = vand.u32 4294901760, %v548_v0  ;;  %v3850_v4 = vand.u32 4294901760, %v547_v1  ;;  %v3852_v5 = vand.u32 4294901760, %v546_v2  ;;  %v545_v6 = vld [vmem:[%s6483_s2 + $0x60] sm:$0xff]  ;;  %v544_v7 = vld [vmem:[%s6483_s2 + $0x58] sm:$0xff]  ;;  %v543_v8 = vld [vmem:[%s6483_s2 + $0x50] sm:$0xff] }
   0xd   : > { %v3863_v9 = vand.u32 4294901760, %v545_v6  ;;  %v3865_v10 = vand.u32 4294901760, %v544_v7  ;;  %v3867_v11 = vand.u32 4294901760, %v543_v8  ;;  %v542_v12 = vld [vmem:[%s6483_s2 + $0x48] sm:$0xff]  ;;  %v541_v13 = vld [vmem:[%s6483_s2 + $0x40] sm:$0xff]  ;;  %v540_v18 = vld [vmem:[%s6483_s2 + $0x38] sm:$0xff] }
   0xe   : > { %550 = vmatpush.msra.mxu0 %v3848_v3  ;;  %v3877_v14 = vsub.f32 %v548_v0, %v3848_v3  ;;  %v3880_v15 = vsub.f32 %v547_v1, %v3850_v4  ;;  %763 = vmatpush.msra.mxu3 %v3848_v3  ;;  %v3884_v16 = vsub.f32 %v546_v2, %v3852_v5  ;;  %v3886_v17 = vand.u32 4294901760, %v542_v12  ;;  %v539_v26 = vld [vmem:[%s6483_s2 + $0x30] sm:$0xff]  ;;  %v538_v36 = vld [vmem:[%s6483_s2 + $0x28] sm:$0xff]  ;;  %v537_v42 = vld [vmem:[%s6483_s2 + $0x20] sm:$0xff]  ;;  %s6602_s19 = smov (!%p4071_p3, %s3716_s19), 1 }
   0xf   : > { %v3892_v19 = vsub.f32 %v545_v6, %v3863_v9  ;;  %v3895_v20 = vsub.f32 %v544_v7, %v3865_v10  ;;  %v3898_v21 = vsub.f32 %v543_v8, %v3867_v11  ;;  %v3905_v25 = vand.u32 4294901760, %v541_v13  ;;  %v536_v48 = vld [vmem:[%s6483_s2 + $0x18] sm:$0xff]  ;;  %v535_v54 = vld [vmem:[%s6483_s2 + $0x10] sm:$0xff]  ;;  %v534_v61 = vld [vmem:[%s6483_s2 + $0x8] sm:$0xff]  ;;  %s3727_s17 = sshll.u32 %s6602_s19, 4 }
  0x10   : > { %552 = vmatpush.msra.mxu0 %v3850_v4  ;;  %705 = vmatpush.msra.mxu2 %v3877_v14  ;;  %v600_v22 = vand.u32 4294901760, %v3877_v14  ;;  %v606_v23 = vand.u32 4294901760, %v3880_v15  ;;  %v6511_v24 = vand.u32 4294901760, %v3884_v16  ;;  %v3912_v28 = vand.u32 4294901760, %v540_v18  ;;  %v532_v59 = vld [vmem:[%s6482_s1 + $0x78] sm:$0xff]  ;;  %v531_v2 = vld [vmem:[%s6482_s1 + $0x70] sm:$0xff]  ;;  %s4181_s24 = scalar_lea.vmem %s6481_s0, %s3727_s17  ;;  %s494_s20 = scalar_lea.vmem %s6496_s15, %s3727_s17 }
  0x11   : > { %765 = vmatpush.msra.mxu3 %v3850_v4  ;;  %v6509_v27 = vand.u32 4294901760, %v3892_v19  ;;  %v3915_v29 = vsub.f32 %v542_v12, %v3886_v17  ;;  %v6506_v33 = vand.u32 4294901760, %v3895_v20  ;;  %v3930_v34 = vand.u32 4294901760, %v539_v26  ;;  %v533_v7 = vld [vmem:[%s6483_s2] sm:$0xff] }
  0x12   : > { %554 = vmatpush.msra.mxu0 %v3852_v5  ;;  %708 = vmatpush.msra.mxu2 %v3880_v15  ;;  %v601_v30 = vsub.f32 %v3877_v14, %v600_v22  ;;  %v607_v31 = vsub.f32 %v3880_v15, %v606_v23  ;;  %v613_v32 = vsub.f32 %v3884_v16, %v6511_v24  ;;  %v6505_v35 = vand.u32 4294901760, %v3898_v21 }
  0x13   : > { %767 = vmatpush.msra.mxu3 %v3852_v5  ;;  %v619_v39 = vsub.f32 %v3892_v19, %v6509_v27  ;;  %v3942_v40 = vsub.f32 %v541_v13, %v3905_v25  ;;  %v3946_v41 = vsub.f32 %v540_v18, %v3912_v28  ;;  %v625_v44 = vsub.f32 %v3895_v20, %v6506_v33 }
  0x14   : > { %556 = vmatpush.msra.mxu0 %v3863_v9  ;;  %v602_v37 = vand.u32 4294901760, %v601_v30  ;;  %711 = vmatpush.msra.mxu2 %v3884_v16  ;;  %v608_v38 = vand.u32 4294901760, %v607_v31  ;;  %v614_v43 = vand.u32 4294901760, %v613_v32  ;;  %v3955_v45 = vand.u32 4294901760, %v538_v36  ;;  %v530_v32 = vld [vmem:[%s6482_s1 + $0x68] sm:$0xff] }
  0x15   : > { %769 = vmatpush.msra.mxu3 %v3863_v9  ;;  %v6503_v46 = vand.u32 4294901760, %v3915_v29  ;;  %v3961_v47 = vsub.f32 %v539_v26, %v3930_v34  ;;  %v620_v49 = vand.u32 4294901760, %v619_v39  ;;  %v631_v50 = vsub.f32 %v3898_v21, %v6505_v35 }
  0x16   : > { %558 = vmatpush.msra.mxu0 %v3865_v10  ;;  %603 = vmatpush.msra.mxu1 %v602_v37  ;;  %v3970_v51 = vand.u32 4294901760, %v537_v42  ;;  %v6502_v52 = vand.u32 4294901760, %v3942_v40  ;;  %v6500_v53 = vand.u32 4294901760, %v3946_v41  ;;  %v626_v55 = vand.u32 4294901760, %v625_v44  ;;  %v529_v44 = vld [vmem:[%s6482_s1 + $0x60] sm:$0xff] }
  0x17   : > { %714 = vmatpush.msra.mxu2 %v3892_v19  ;;  %771 = vmatpush.msra.mxu3 %v3865_v10  ;;  %v637_v56 = vsub.f32 %v3915_v29, %v6503_v46  ;;  %v3983_v57 = vand.u32 4294901760, %v536_v48  ;;  %v3986_v58 = vsub.f32 %v538_v36, %v3955_v45  ;;  %v6499_v60 = vand.u32 4294901760, %v3961_v47 }
  0x18   : > { %560 = vmatpush.msra.mxu0 %v3867_v11  ;;  %609 = vmatpush.msra.mxu1 %v608_v38  ;;  %v632_v62 = vand.u32 4294901760, %v631_v50  ;;  %v643_v63 = vsub.f32 %v3942_v40, %v6502_v52  ;;  %v4001_v0 = vand.u32 4294901760, %v535_v54  ;;  %v4004_v1 = vsub.f32 %v537_v42, %v3970_v51 }
  0x19   : > { %717 = vmatpush.msra.mxu2 %v3895_v20  ;;  %773 = vmatpush.msra.mxu3 %v3867_v11  ;;  %v649_v6 = vsub.f32 %v3946_v41, %v6500_v53  ;;  %v4017_v8 = vand.u32 4294901760, %v532_v59  ;;  %v638_v12 = vand.u32 4294901760, %v637_v56  ;;  %v4020_v13 = vand.u32 4294901760, %v534_v61 }
  0x1a   : > { %562 = vmatpush.msra.mxu0 %v3886_v17  ;;  %615 = vmatpush.msra.mxu1 %v614_v43  ;;  %v6498_v18 = vand.u32 4294901760, %v3986_v58  ;;  %v4024_v26 = vsub.f32 %v536_v48, %v3983_v57  ;;  %v655_v30 = vsub.f32 %v3961_v47, %v6499_v60  ;;  %v4031_v31 = vand.u32 4294901760, %v531_v2 }
  0x1b   : > { %720 = vmatpush.msra.mxu2 %v3898_v21  ;;  %775 = vmatpush.msra.mxu3 %v3886_v17  ;;  %v644_v36 = vand.u32 4294901760, %v643_v63  ;;  %v4037_v37 = vand.u32 4294901760, %v533_v7  ;;  %v6497_v38 = vand.u32 4294901760, %v4004_v1  ;;  %v4041_v39 = vsub.f32 %v535_v54, %v4001_v0 }
  0x1c   : > { %564 = vmatpush.msra.mxu0 %v3905_v25  ;;  %621 = vmatpush.msra.mxu1 %v620_v49  ;;  %v650_v42 = vand.u32 4294901760, %v649_v6  ;;  %v4046_v43 = vsub.f32 %v532_v59, %v4017_v8  ;;  %v661_v48 = vsub.f32 %v3986_v58, %v6498_v18  ;;  %v6501_v49 = vand.u32 4294901760, %v4024_v26 }
  0x1d   : > { %723 = vmatpush.msra.mxu2 %v3915_v29  ;;  %777 = vmatpush.msra.mxu3 %v3905_v25  ;;  %6542 = vst [vmem:[#allocation2_spill] sm:$0xff] %v4037_v37  ;;  %v4057_v50 = vsub.f32 %v534_v61, %v4020_v13  ;;  %v4059_v54 = vand.u32 4294901760, %v530_v32  ;;  %v656_v56 = vand.u32 4294901760, %v655_v30  ;;  %v4067_v59 = vsub.f32 %v531_v2, %v4031_v31  ;;  %v527_v2 = vld [vmem:[%s6482_s1 + $0x50] sm:$0xff] }
  0x1e   : > { %566 = vmatpush.msra.mxu0 %v3912_v28  ;;  %627 = vmatpush.msra.mxu1 %v626_v55  ;;  %v528_v55 = vld [vmem:[%s6482_s1 + $0x58] sm:$0xff]  ;;  %v667_v61 = vsub.f32 %v4004_v1, %v6497_v38  ;;  %v4081_v63 = vsub.f32 %v533_v7, %v4037_v37  ;;  %v4083_v6 = vand.u32 4294901760, %v529_v44  ;;  %v662_v7 = vand.u32 4294901760, %v661_v48 }
  0x1f   : > { %726 = vmatpush.msra.mxu2 %v3942_v40  ;;  %779 = vmatpush.msra.mxu3 %v3912_v28  ;;  %v4091_v30 = vand.u32 4294901760, %v528_v55  ;;  %v6508_v38 = vand.u32 4294901760, %v4057_v50  ;;  %v4099_v18 = vsub.f32 %v530_v32, %v4059_v54  ;;  %v6510_v60 = vand.u32 4294901760, %v4067_v59 }
  0x20   : > { %568 = vmatpush.msra.mxu0 %v3930_v34  ;;  %633 = vmatpush.msra.mxu1 %v632_v62  ;;  %v6504_v62 = vand.u32 4294901760, %v4041_v39  ;;  %v4104_v53 = vand.u32 4294901760, %v527_v2  ;;  %v668_v32 = vand.u32 4294901760, %v667_v61  ;;  %v4121_v52 = vsub.f32 %v529_v44, %v4083_v6  ;;  %v525_v61 = vld [vmem:[%s6482_s1 + $0x40] sm:$0xff] }
  0x21   : > { %729 = vmatpush.msra.mxu2 %v3946_v41  ;;  %781 = vmatpush.msra.mxu3 %v3930_v34  ;;  %6544 = vst [vmem:[#allocation3_spill] sm:$0xff] %v4091_v30  ;;  %v6513_v35 = vand.u32 4294901760, %v4099_v18 }
  0x22   : > { %570 = vmatpush.msra.mxu0 %v3955_v45  ;;  %639 = vmatpush.msra.mxu1 %v638_v12  ;;  %v6507_v12 = vand.u32 4294901760, %v4046_v43  ;;  %v679_v48 = vsub.f32 %v4041_v39, %v6504_v62  ;;  %v685_v62 = vsub.f32 %v4057_v50, %v6508_v38  ;;  %v6514_v27 = vand.u32 4294901760, %v4121_v52 }
  0x23   : > { %732 = vmatpush.msra.mxu2 %v3961_v47  ;;  %783 = vmatpush.msra.mxu3 %v3955_v45 }
  0x24   : > { %572 = vmatpush.msra.mxu0 %v3970_v51  ;;  %645 = vmatpush.msra.mxu1 %v644_v36  ;;  %v673_v36 = vsub.f32 %v4024_v26, %v6501_v49  ;;  %v6512_v49 = vand.u32 4294901760, %v4081_v63  ;;  %v973_v46 = vsub.f32 %v4046_v43, %v6507_v12  ;;  %v4147_v12 = vsub.f32 %v527_v2, %v4104_v53 }
  0x25   : > { %735 = vmatpush.msra.mxu2 %v3986_v58  ;;  %785 = vmatpush.msra.mxu3 %v3970_v51 }
  0x26   : > { %574 = vmatpush.msra.mxu0 %v3983_v57  ;;  %651 = vmatpush.msra.mxu1 %v650_v42  ;;  %v526_v42 = vld [vmem:[%s6482_s1 + $0x48] sm:$0xff]  ;;  %v674_v44 = vand.u32 4294901760, %v673_v36  ;;  %v680_v36 = vand.u32 4294901760, %v679_v48  ;;  %v691_v38 = vsub.f32 %v4081_v63, %v6512_v49  ;;  %v974_v2 = vand.u32 4294901760, %v973_v46 }
  0x27   : > { %738 = vmatpush.msra.mxu2 %v4004_v1  ;;  %787 = vmatpush.msra.mxu3 %v3983_v57  ;;  %v4139_v33 = vand.u32 4294901760, %v526_v42  ;;  %v686_v48 = vand.u32 4294901760, %v685_v62  ;;  %v985_v49 = vsub.f32 %v4099_v18, %v6513_v35  ;;  %v991_v35 = vsub.f32 %v4121_v52, %v6514_v27  ;;  %v4205_v62 = vld [vmem:[%s4181_s24] sm:$0xff] }
  0x28   : > { %576 = vmatpush.msra.mxu0 %v4001_v0  ;;  %657 = vmatpush.msra.mxu1 %v656_v56  ;;  %v4129_v56 = vsub.f32 %v528_v55, %v4091_v30  ;;  %v979_v55 = vsub.f32 %v4067_v59, %v6510_v60  ;;  %v4158_v60 = vand.u32 4294901760, %v525_v61 }
  0x29   : > { %741 = vmatpush.msra.mxu2 %v4024_v26  ;;  %789 = vmatpush.msra.mxu3 %v4001_v0  ;;  %v4172_v14 = vsub.f32 %v526_v42, %v4139_v33  ;;  %v522_v42 = vld [vmem:[%s6482_s1 + $0x28] sm:$0xff] }
  0x2a   : > { %578 = vmatpush.msra.mxu0 %v4020_v13  ;;  %663 = vmatpush.msra.mxu1 %v662_v7  ;;  %v524_v7 = vld [vmem:[%s6482_s1 + $0x38] sm:$0xff]  ;;  %6545 = vst [vmem:[#allocation4_spill] sm:$0xff] %v4158_v60  ;;  %v6516_v24 = vand.u32 4294901760, %v4129_v56  ;;  %v980_v46 = vand.u32 4294901760, %v979_v55  ;;  %v4195_v15 = vsub.f32 %v525_v61, %v4158_v60  ;;  %v6546_v55 = vand.u32 4294901760, %v3884_v16 }
  0x2b   : > { %744 = vmatpush.msra.mxu2 %v4041_v39  ;;  %791 = vmatpush.msra.mxu3 %v4020_v13  ;;  %v6517_v27 = vand.u32 4294901760, %v4172_v14  ;;  %v6547_v16 = vand.u32 4294901760, %v3892_v19  ;;  %v521_v19 = vld [vmem:[%s6482_s1 + $0x20] sm:$0xff] }
  0x2c   : > { %580 = vmatpush.msra.mxu0 %v4037_v37  ;;  %669 = vmatpush.msra.mxu1 %v668_v32  ;;  %v523_v32 = vld [vmem:[%s6482_s1 + $0x30] sm:$0xff] }
  0x2d   : > { %747 = vmatpush.msra.mxu2 %v4057_v50  ;;  %793 = vmatpush.msra.mxu3 %v4037_v37  ;;  %v4212_v37 = vand.u32 4294901760, %v522_v42 }
  0x2e   : > { %810 = vmatpush.msrb.mxu0 %v600_v22  ;;  %675 = vmatpush.msra.mxu1 %v674_v44  ;;  %v4174_v22 = vand.u32 4294901760, %v524_v7  ;;  %v692_v44 = vand.u32 4294901760, %v691_v38  ;;  %v986_v38 = vand.u32 4294901760, %v985_v49  ;;  %v6518_v49 = vand.u32 4294901760, %v4195_v15 }
  0x2f   : > { %750 = vmatpush.msra.mxu2 %v4081_v63  ;;  %975 = vmatpush.msrb.mxu3 %v974_v2  ;;  %v6548_v2 = vand.u32 4294901760, %v4147_v12 }
  0x30   : > { %814 = vmatpush.msrb.mxu0 %v606_v23  ;;  %681 = vmatpush.msra.mxu1 %v680_v36  ;;  %v4197_v23 = vand.u32 4294901760, %v523_v32  ;;  %v997_v36 = vsub.f32 %v4129_v56, %v6516_v24  ;;  %v4210_v61 = vsub.f32 %v524_v7, %v4174_v22  ;;  %v4225_v7 = vand.u32 4294901760, %v4205_v62 }
  0x31   : > { %922 = vmatpush.msrb.mxu2 %v4017_v8  ;;  %981 = vmatpush.msrb.mxu3 %v980_v46  ;;  %v6549_v46 = vand.u32 4294901760, %v3895_v20  ;;  %v520_v20 = vld [vmem:[%s6482_s1 + $0x18] sm:$0xff] }
  0x32   : > { %818 = vmatpush.msrb.mxu0 %v6546_v55  ;;  %687 = vmatpush.msra.mxu1 %v686_v48  ;;  %v1003_v55 = vsub.f32 %v4147_v12, %v6548_v2  ;;  %v992_v48 = vand.u32 4294901760, %v991_v35  ;;  %v4222_v24 = vsub.f32 %v523_v32, %v4197_v23  ;;  %v1009_v35 = vsub.f32 %v4172_v14, %v6517_v27 }
  0x33   : > { %924 = vmatpush.msrb.mxu2 %v4031_v31  ;;  %987 = vmatpush.msrb.mxu3 %v986_v38  ;;  %v6521_v32 = vand.u32 4294901760, %v4210_v61  ;;  %v499_v2 = vlaneseq  ;;  %v4247_v38 = vand.u32 4294901760, %v521_v19  ;;  %v4256_v27 = vsub.f32 %v4205_v62, %v4225_v7 }
  0x34   : > { %822 = vmatpush.msrb.mxu0 %v6547_v16  ;;  %693 = vmatpush.msra.mxu1 %v692_v44  ;;  %v998_v44 = vand.u32 4294901760, %v997_v36  ;;  %v4239_v16 = vsub.f32 %v522_v42, %v4212_v37  ;;  %v1004_v36 = vand.u32 4294901760, %v1003_v55  ;;  %v1015_v42 = vsub.f32 %v4195_v15, %v6518_v49 }
  0x35   : > { %926 = vmatpush.msrb.mxu2 %v4059_v54  ;;  %993 = vmatpush.msrb.mxu3 %v992_v48  ;;  %v4264_v55 = vshrl.u32 %v499_v2, 7  ;;  %v6551_v48 = vand.u32 4294901760, %v3915_v29  ;;  %v1010_v49 = vand.u32 4294901760, %v1009_v35  ;;  %v6552_v2 = vand.u32 4294901760, %v3942_v40 }
  0x36   : > { %826 = vmatpush.msrb.mxu0 %v6549_v46  ;;  %881 = vmatpush.msrb.mxu1 %v3848_v3  ;;  %v6550_v3 = vand.u32 4294901760, %v3898_v21  ;;  %v4262_v21 = vld [vmem:[%s4181_s24 + $0x8] sm:$0xff]  ;;  %v1021_v46 = vsub.f32 %v4210_v61, %v6521_v32  ;;  %v4280_v29 = vsub.f32 %v521_v19, %v4247_v38  ;;  %v1016_v40 = vand.u32 4294901760, %v1015_v42 }
  0x37   : > { %928 = vmatpush.msrb.mxu2 %v4083_v6  ;;  %999 = vmatpush.msrb.mxu3 %v998_v44  ;;  %v518_v44 = vld [vmem:[%s6482_s1 + $0x8] sm:$0xff]  ;;  %v583_v19 = vand.u32 4294901760, %v4256_v27  ;;  %vm501_vm0 = vcmp.lt.s32.totalorder %v4264_v55, 1  ;;  %v6554_v32 = vand.u32 4294901760, %v3946_v41  ;;  %v6555_v41 = vand.u32 4294901760, %v3961_v47 }
  0x38   : > { %830 = vmatpush.msrb.mxu0 %v6550_v3  ;;  %883 = vmatpush.msrb.mxu1 %v3850_v4  ;;  %v519_v4 = vld [vmem:[%s6482_s1 + $0x10] sm:$0xff]  ;;  %v4269_v3 = vand.u32 4294901760, %v520_v20  ;;  %vm510_vm1 = vcmp.lt.s32.totalorder %v4264_v55, 7 }
  0x39   : > { %930 = vmatpush.msrb.mxu2 %v4091_v30  ;;  %v6522_v30 = vand.u32 4294901760, %v4239_v16  ;;  %1005 = vmatpush.msrb.mxu3 %v1004_v36  ;;  %v1022_v36 = vand.u32 4294901760, %v1021_v46  ;;  %v6557_v46 = vrot.slane %v4262_v21, 7  ;;  %v584_v47 = vsub.f32 %v4256_v27, %v583_v19 }
  0x3a   : > { %834 = vmatpush.msrb.mxu0 %v6551_v48  ;;  %885 = vmatpush.msrb.mxu1 %v3852_v5  ;;  %v4282_v5 = vand.u32 4294901760, %v519_v4  ;;  %v4299_v35 = vsub.f32 %v520_v20, %v4269_v3  ;;  %v4308_v48 = vand.u32 4294901760, %v4262_v21  ;;  %v6556_v20 = vrot.slane %v4205_v62, 7 }
  0x3b   : > { %932 = vmatpush.msrb.mxu2 %v4104_v53  ;;  %1011 = vmatpush.msrb.mxu3 %v1010_v49  ;;  %v1033_v42 = vsub.f32 %v4239_v16, %v6522_v30 }
  0x3c   : > { %838 = vmatpush.msrb.mxu0 %v6552_v2  ;;  %887 = vmatpush.msrb.mxu1 %v3863_v9  ;;  %v6553_v2 = vand.u32 4294901760, %v4222_v24  ;;  %v503_v30 = vsel %vm501_vm0, %v6557_v46, %v6556_v20  ;;  %v590_v46 = vsub.f32 %v4262_v21, %v4308_v48 }
  0x3d   : > { %934 = vmatpush.msrb.mxu2 %v4139_v33  ;;  %1017 = vmatpush.msrb.mxu3 %v1016_v40  ;;  %v1034_v20 = vand.u32 4294901760, %v1033_v42  ;;  %v6561_v42 = vand.u32 4294901760, %v4024_v26  ;;  %v6563_v26 = vand.u32 4294901760, %v4041_v39 }
  0x3e   : > { %v1027_v9 = vsub.f32 %v4222_v24, %v6553_v2  ;;  %842 = vmatpush.msrb.mxu0 %v6554_v32  ;;  %889 = vmatpush.msrb.mxu1 %v3865_v10  ;;  %v4305_v2 = vand.u32 4294901760, %v518_v44  ;;  %v517_v10 = vld [vmem:[%s6482_s1] sm:$0xff]  ;;  %v4318_v32 = vsub.f32 %v519_v4, %v4282_v5  ;;  %v6558_v4 = vand.u32 4294901760, %v3986_v58 }
  0x3f   : > { %936 = vmatpush.msrb.mxu2 %v4158_v60  ;;  %v504_v60 = vld [vmem:[%s6494_s13] sm:$0xff]  ;;  %v4335_v49 = vand.u32 4294901760, %v517_v10  ;;  %1023 = vmatpush.msrb.mxu3 %v1022_v36  ;;  %v6559_v58 = vand.u32 4294901760, %v4004_v1  ;;  %v585_v36 = vand.u32 4294901760, %v584_v47 }
  0x40   : > { %846 = vmatpush.msrb.mxu0 %v6555_v41  ;;  %891 = vmatpush.msrb.mxu1 %v3867_v11  ;;  %v1028_v11 = vand.u32 4294901760, %v1027_v9  ;;  %v4341_v40 = vsub.f32 %v518_v44, %v4305_v2  ;;  %v506_v9 = vmul.f32 %v504_v60, %v503_v30  ;;  %v1050_v41 = vand.u32 4294901760, %v4318_v32 }
  0x41   : > { %938 = vmatpush.msrb.mxu2 %v4174_v22  ;;  %v6562_v60 = vand.u32 4294901760, %v4299_v35  ;;  %v591_v44 = vand.u32 4294901760, %v590_v46  ;;  %586 = vmatmul.f32.vlgmr.msra.gmra.mxu0 %v585_v36 }
  0x42   : > { %850 = vmatpush.msrb.mxu0 %v6558_v4  ;;  %893 = vmatpush.msrb.mxu1 %v3886_v17  ;;  %v6560_v17 = vand.u32 4294901760, %v4280_v29  ;;  %v1056_v30 = vand.u32 4294901760, %v4341_v40  ;;  %v1051_v47 = vsub.f32 %v4318_v32, %v1050_v41 }
  0x43   : > { %940 = vmatpush.msrb.mxu2 %v4197_v23  ;;  %1029 = vmatpush.msrb.mxu3 %v1028_v11  ;;  %v1045_v1 = vsub.f32 %v4299_v35, %v6562_v60  ;;  %v4362_v11 = vand.u32 4294901760, %v506_v9  ;;  %v592_v39 = vsub.f32 %v590_v46, %v591_v44  ;;  %v6569_v60 = vand.u32 4294901760, %v4067_v59 }
  0x44   : > { %854 = vmatpush.msrb.mxu0 %v6559_v58  ;;  %895 = vmatpush.msrb.mxu1 %v3905_v25  ;;  %v1039_v4 = vsub.f32 %v4280_v29, %v6560_v17  ;;  %v4358_v25 = vsub.f32 %v517_v10, %v4335_v49 }
  0x45   : > { %942 = vmatpush.msrb.mxu2 %v4212_v37  ;;  %1035 = vmatpush.msrb.mxu3 %v1034_v20  ;;  %v1046_v10 = vand.u32 4294901760, %v1045_v1  ;;  %v4380_v58 = vsub.f32 %v506_v9, %v4362_v11  ;;  %v593_v17 = vand.u32 4294901760, %v592_v39 }
  0x46   : > { %858 = vmatpush.msrb.mxu0 %v6561_v42  ;;  %897 = vmatpush.msrb.mxu1 %v3912_v28  ;;  %v1040_v28 = vand.u32 4294901760, %v1039_v4  ;;  %v1062_v20 = vand.u32 4294901760, %v4358_v25  ;;  %v6568_v42 = vand.u32 4294901760, %v4046_v43 }
  0x47   : > { %753 = vmatmul.f32.vlgmr.msra.gmra.mxu2 %v4256_v27  ;;  %797 = vmatmul.f32.vlgmr.msra.gmra.mxu3 %v583_v19  ;;  %v6564_v27 = vand.u32 4294901760, %v4057_v50  ;;  %v1052_v50 = vand.u32 4294901760, %v1051_v47  ;;  %v6565_v19 = vand.u32 4294901760, %v4081_v63  ;;  %v955_v4 = vand.u32 4294901760, %v4380_v58 }
  0x48   : > { %862 = vmatpush.msrb.mxu0 %v6563_v26  ;;  %899 = vmatpush.msrb.mxu1 %v3930_v34  ;;  %v1057_v34 = vsub.f32 %v4341_v40, %v1056_v30  ;;  %v6566_v63 = vrot.slane %v4262_v21, 7  ;;  %v6570_v26 = vld [vmem:[#allocation2_spill] sm:$0xff]  ;;  %v6581_v47 = vand.u32 4294901760, %v4239_v16 }
  0x49   : > { %944 = vmatpush.msrb.mxu2 %v4247_v38  ;;  %1041 = vmatpush.msrb.mxu3 %v1040_v28 }
  0x4a   : > { %866 = vmatpush.msrb.mxu0 %v6564_v27  ;;  %901 = vmatpush.msrb.mxu1 %v3955_v45  ;;  %v1063_v45 = vsub.f32 %v4358_v25, %v1062_v20  ;;  %v1058_v9 = vand.u32 4294901760, %v1057_v34 }
  0x4b   : > { %946 = vmatpush.msrb.mxu2 %v4269_v3  ;;  %695 = vmatmul.f32.vlgmr.msra.gmra.mxu1 %v4225_v7 }
  0x4c   : > { %870 = vmatpush.msrb.mxu0 %v6565_v19  ;;  %903 = vmatpush.msrb.mxu1 %v3970_v51  ;;  %v1064_v51 = vand.u32 4294901760, %v1063_v45  ;;  %v1302_v45 = vld [vmem:[%s6484_s3 + $0x48] sm:$0xff] }
  0x4d   : > { %948 = vmatpush.msrb.mxu2 %v4282_v5  ;;  %1047 = vmatpush.msrb.mxu3 %v1046_v10 }
  0x4e   : > { %1077 = vmatpush.msra.mxu0 %v4046_v43  ;;  %905 = vmatpush.msrb.mxu1 %v3983_v57  ;;  %v956_v57 = vsub.f32 %v4380_v58, %v955_v4 }
  0x4f   : > { %950 = vmatpush.msrb.mxu2 %v4305_v2  ;;  %1053 = vmatpush.msrb.mxu3 %v1052_v50  ;;  %v1303_v50 = vld [vmem:[%s6484_s3 + $0x50] sm:$0xff] }
  0x50   : > { %758 = vmatmul.f32.gmra.mxu2 %v590_v46  ;;  %1080 = vmatpush.msra.mxu0 %v4067_v59  ;;  %v6567_v46 = vrot.slane %v4205_v62, 7  ;;  %v957_v1 = vand.u32 4294901760, %v956_v57  ;;  %v6572_v59 = vand.u32 4294901760, %v4121_v52 }
  0x51   : > { %907 = vmatpush.msrb.mxu1 %v4001_v0  ;;  %952 = vmatpush.msrb.mxu2 %v4335_v49  ;;  %v505_v0 = vld [vmem:[%s6494_s13 + $0x8] sm:$0xff] }
  0x52   : > { %1059 = vmatpush.msrb.mxu3 %v1058_v9  ;;  %594 = vmatmul.f32.gmra.mxu0 %v593_v17  ;;  %v502_v36 = vsel %vm501_vm0, %v6567_v46, %v6566_v63  ;;  %v4535_v17 = vand.u32 4294901760, %v1303_v50 }
  0x53   : > { %803 = vmatmul.f32.gmra.mxu3 %v591_v44  ;;  %1083 = vmatpush.msra.mxu0 %v4099_v18  ;;  %v507_v44 = vmul.f32 %v505_v0, %v502_v36 }
  0x54   : > { %1182 = vmatpush.msra.mxu2 %v6568_v42  ;;  %909 = vmatpush.msrb.mxu1 %v4020_v13  ;;  %v6571_v13 = vand.u32 4294901760, %v4099_v18 }
  0x55   : > { %1065 = vmatpush.msrb.mxu3 %v1064_v51  ;;  %699 = vmatmul.f32.gmra.mxu1 %v4308_v48  ;;  %v4425_v43 = vand.u32 4294901760, %v507_v44 }
  0x56   : > { %1086 = vmatpush.msra.mxu0 %v4121_v52  ;;  %1186 = vmatpush.msra.mxu2 %v6569_v60  ;;  %v6574_v52 = vand.u32 4294901760, %v4147_v12 }
  0x57   : > { %1253 = vmatpush.msra.mxu3 %v4017_v8  ;;  %911 = vmatpush.msrb.mxu1 %v6570_v26  ;;  %v4438_v18 = vsub.f32 %v507_v44, %v4425_v43  ;;  %v1298_v44 = vld [vmem:[%s6484_s3 + $0x28] sm:$0xff] }
  0x58   : > { %1089 = vmatpush.msra.mxu0 %v4129_v56  ;;  %1190 = vmatpush.msra.mxu2 %v6571_v13 }
  0x59   : > { %1135 = vmatpush.msra.mxu1 %v4017_v8  ;;  %1255 = vmatpush.msra.mxu3 %v4031_v31  ;;  %v6573_v8 = vand.u32 4294901760, %v4129_v56  ;;  %v6576_v56 = vand.u32 4294901760, %v4172_v14 }
  0x5a   : > { %958 = vmatmul.f32.vlgmr.msrb.gmra.mxu2 %v957_v1  ;;  %1092 = vmatpush.msra.mxu0 %v4147_v12 }
  0x5b   : > { %1137 = vmatpush.msra.mxu1 %v4031_v31  ;;  %1194 = vmatpush.msra.mxu2 %v6572_v59  ;;  %v6575_v31 = vld [vmem:[#allocation3_spill] sm:$0xff] }
  0x5c   : > { %1257 = vmatpush.msra.mxu3 %v4059_v54  ;;  %872 = vmatmul.f32.vlgmr.msrb.gmra.mxu0 %v4225_v7 }
  0x5d   : > { %1067 = vmatmul.f32.vlgmr.msrb.gmra.mxu3 %v4362_v11  ;;  %1095 = vmatpush.msra.mxu0 %v4172_v14  ;;  %v6578_v14 = vand.u32 4294901760, %v4210_v61 }
  0x5e   : > { %1139 = vmatpush.msra.mxu1 %v4059_v54  ;;  %1198 = vmatpush.msra.mxu2 %v6573_v8  ;;  %v963_v54 = vand.u32 4294901760, %v4438_v18 }
  0x5f   : > { %1259 = vmatpush.msra.mxu3 %v4083_v6  ;;  %913 = vmatmul.f32.vlgmr.msrb.gmra.mxu1 %v4225_v7  ;;  %v6579_v7 = vld [vmem:[#allocation4_spill] sm:$0xff] }
  0x60   : > { %1098 = vmatpush.msra.mxu0 %v4195_v15  ;;  %1141 = vmatpush.msra.mxu1 %v4083_v6  ;;  %v6577_v6 = vand.u32 4294901760, %v4195_v15  ;;  %v964_v12 = vsub.f32 %v4438_v18, %v963_v54  ;;  %v6580_v15 = vand.u32 4294901760, %v4222_v24 }
  0x61   : > { %1202 = vmatpush.msra.mxu2 %v6574_v52  ;;  %1261 = vmatpush.msra.mxu3 %v6575_v31 }
  0x62   : > { %1101 = vmatpush.msra.mxu0 %v4210_v61  ;;  %1143 = vmatpush.msra.mxu1 %v6575_v31  ;;  %v965_v61 = vand.u32 4294901760, %v964_v12  ;;  %v4620_v31 = vand.u32 4294901760, %v1298_v44 }
  0x63   : > { %1206 = vmatpush.msra.mxu2 %v6576_v56  ;;  %1263 = vmatpush.msra.mxu3 %v4104_v53 }
  0x64   : > { %1104 = vmatpush.msra.mxu0 %v4222_v24  ;;  %1145 = vmatpush.msra.mxu1 %v4104_v53  ;;  %v1308_v53 = vld [vmem:[%s6484_s3 + $0x78] sm:$0xff]  ;;  %v1306_v24 = vld [vmem:[%s6484_s3 + $0x68] sm:$0xff] }
  0x65   : > { %1210 = vmatpush.msra.mxu2 %v6577_v6  ;;  %1265 = vmatpush.msra.mxu3 %v4139_v33  ;;  %v4479_v28 = vand.u32 4294901760, %v1308_v53  ;;  %v4501_v34 = vand.u32 4294901760, %v1306_v24  ;;  %v1296_v6 = vld [vmem:[%s6484_s3 + $0x18] sm:$0xff] }
  0x66   : > { %1107 = vmatpush.msra.mxu0 %v4239_v16  ;;  %1147 = vmatpush.msra.mxu1 %v4139_v33  ;;  %v1307_v33 = vld [vmem:[%s6484_s3 + $0x70] sm:$0xff]  ;;  %v1305_v16 = vld [vmem:[%s6484_s3 + $0x60] sm:$0xff] }
  0x67   : > { %1214 = vmatpush.msra.mxu2 %v6578_v14  ;;  %1267 = vmatpush.msra.mxu3 %v6579_v7  ;;  %v4489_v27 = vand.u32 4294901760, %v1307_v33  ;;  %v4499_v10 = vsub.f32 %v1308_v53, %v4479_v28  ;;  %v4511_v39 = vand.u32 4294901760, %v1305_v16  ;;  %v4531_v9 = vsub.f32 %v1306_v24, %v4501_v34 }
  0x68   : > { %1110 = vmatpush.msra.mxu0 %v4280_v29  ;;  %1149 = vmatpush.msra.mxu1 %v6579_v7  ;;  %v509_v14 = vrot.slane %v4262_v21, 1  ;;  %v4652_v24 = vand.u32 4294901760, %v1296_v6 }
  0x69   : > { %1218 = vmatpush.msra.mxu2 %v6580_v15  ;;  %1269 = vmatpush.msra.mxu3 %v4174_v22  ;;  %v4517_v19 = vsub.f32 %v1307_v33, %v4489_v27  ;;  %v1372_v51 = vand.u32 4294901760, %v4531_v9 }
  0x6a   : > { %876 = vmatmul.f32.gmra.mxu0 %v4308_v48  ;;  %1151 = vmatpush.msra.mxu1 %v4174_v22  ;;  %v6582_v22 = vand.u32 4294901760, %v4280_v29  ;;  %v6583_v29 = vand.u32 4294901760, %v4299_v35 }
  0x6b   : > { %1113 = vmatpush.msra.mxu0 %v4299_v35  ;;  %1222 = vmatpush.msra.mxu2 %v6581_v47  ;;  %v1360_v35 = vand.u32 4294901760, %v4499_v10  ;;  %v1373_v0 = vsub.f32 %v4531_v9, %v1372_v51 }
  0x6c   : > { %1271 = vmatpush.msra.mxu3 %v4197_v23  ;;  %1153 = vmatpush.msra.mxu1 %v4197_v23  ;;  %v1304_v23 = vld [vmem:[%s6484_s3 + $0x58] sm:$0xff] }
  0x6d   : > { %1116 = vmatpush.msra.mxu0 %v4318_v32  ;;  %1226 = vmatpush.msra.mxu2 %v6582_v22  ;;  %v4541_v32 = vsub.f32 %v1305_v16, %v4511_v39  ;;  %v1374_v8 = vand.u32 4294901760, %v1373_v0  ;;  %v4656_v16 = vsub.f32 %v1298_v44, %v4620_v31 }
  0x6e   : > { %1273 = vmatpush.msra.mxu3 %v4212_v37  ;;  %966 = vmatmul.f32.gmra.mxu2 %v965_v61  ;;  %v1295_v61 = vld [vmem:[%s6484_s3 + $0x10] sm:$0xff] }
  0x6f   : > { %1119 = vmatpush.msra.mxu0 %v4341_v40  ;;  %1155 = vmatpush.msra.mxu1 %v4212_v37  ;;  %v4524_v37 = vand.u32 4294901760, %v1304_v23  ;;  %v1300_v40 = vld [vmem:[%s6484_s3 + $0x38] sm:$0xff]  ;;  %v1420_v44 = vand.u32 4294901760, %v4656_v16 }
  0x70   : > { %1230 = vmatpush.msra.mxu2 %v6583_v29  ;;  %1275 = vmatpush.msra.mxu3 %v4247_v38  ;;  %v4589_v42 = vand.u32 4294901760, %v1300_v40 }
  0x71   : > { %1071 = vmatmul.f32.gmra.mxu3 %v4425_v43  ;;  %1122 = vmatpush.msra.mxu0 %v4358_v25  ;;  %v4558_v57 = vsub.f32 %v1304_v23, %v4524_v37  ;;  %v1378_v25 = vand.u32 4294901760, %v4541_v32 }
  0x72   : > { %1157 = vmatpush.msra.mxu1 %v4247_v38  ;;  %1234 = vmatpush.msra.mxu2 %v1050_v41  ;;  %v1366_v38 = vand.u32 4294901760, %v4517_v19  ;;  %v4546_v41 = vand.u32 4294901760, %v1302_v45 }
  0x73   : > { %1277 = vmatpush.msra.mxu3 %v4269_v3  ;;  %917 = vmatmul.f32.gmra.mxu1 %v4308_v48  ;;  %v1301_v48 = vld [vmem:[%s6484_s3 + $0x40] sm:$0xff]  ;;  %v1384_v60 = vand.u32 4294901760, %v4558_v57  ;;  %v1379_v13 = vsub.f32 %v4541_v32, %v1378_v25 }
  0x74   : > { %1125 = vmatmul.f32.vlgmr.msra.gmra.mxu0 %v4380_v58  ;;  %1159 = vmatpush.msra.mxu1 %v4269_v3  ;;  %v1361_v3 = vsub.f32 %v4499_v10, %v1360_v35  ;;  %v4574_v63 = vand.u32 4294901760, %v1301_v48  ;;  %v4583_v46 = vsub.f32 %v1302_v45, %v4546_v41  ;;  %v4623_v58 = vsub.f32 %v1300_v40, %v4589_v42  ;;  %v513_v40 = vld [vmem:[%s6495_s14] sm:$0xff] }
  0x75   : > { %1310 = vmatpush.msrb.mxu0 %v4479_v28  ;;  %1238 = vmatpush.msra.mxu2 %v1056_v30  ;;  %v1367_v30 = vsub.f32 %v4517_v19, %v1366_v38  ;;  %v1385_v52 = vsub.f32 %v4558_v57, %v1384_v60  ;;  %v1380_v7 = vand.u32 4294901760, %v1379_v13 }
  0x76   : > { %1279 = vmatpush.msra.mxu3 %v4282_v5  ;;  %1161 = vmatpush.msra.mxu1 %v4282_v5  ;;  %v4567_v5 = vsub.f32 %v1303_v50, %v4535_v17  ;;  %v1362_v36 = vand.u32 4294901760, %v1361_v3  ;;  %v1396_v59 = vand.u32 4294901760, %v4583_v46  ;;  %v1408_v22 = vand.u32 4294901760, %v4623_v58  ;;  %v1294_v50 = vld [vmem:[%s6484_s3 + $0x8] sm:$0xff] }
  0x77   : > { %1312 = vmatpush.msrb.mxu0 %v4489_v27  ;;  %1242 = vmatpush.msra.mxu2 %v1062_v20  ;;  %v1299_v20 = vld [vmem:[%s6484_s3 + $0x30] sm:$0xff]  ;;  %v1368_v26 = vand.u32 4294901760, %v1367_v30  ;;  %v1386_v47 = vand.u32 4294901760, %v1385_v52  ;;  %v4692_v0 = vand.u32 4294901760, %v1294_v50 }
  0x78   : > { %1281 = vmatpush.msra.mxu3 %v4305_v2  ;;  %1244 = vmatmul.f32.vlgmr.msra.gmra.mxu2 %v4362_v11  ;;  %v1390_v1 = vand.u32 4294901760, %v4567_v5  ;;  %v1397_v33 = vsub.f32 %v4583_v46, %v1396_v59 }
  0x79   : > { %1314 = vmatpush.msrb.mxu0 %v4501_v34  ;;  %1163 = vmatpush.msra.mxu1 %v4305_v2  ;;  %v4595_v2 = vand.u32 4294901760, %v1299_v20 }
  0x7a   : > { %1283 = vmatpush.msra.mxu3 %v4335_v49  ;;  %1465 = vmatpush.msrb.mxu2 %v4499_v10  ;;  %v1391_v56 = vsub.f32 %v4567_v5, %v1390_v1  ;;  %v1398_v30 = vand.u32 4294901760, %v1397_v33  ;;  %v4718_v33 = vsub.f32 %v1294_v50, %v4692_v0 }
  0x7b   : > { %1285 = vmatmul.f32.vlgmr.msra.gmra.mxu3 %v4362_v11  ;;  %1316 = vmatpush.msrb.mxu0 %v4511_v39  ;;  %v4607_v11 = vsub.f32 %v1301_v48, %v4574_v63  ;;  %v4635_v12 = vsub.f32 %v1299_v20, %v4595_v2  ;;  %v4668_v48 = vand.u32 4294901760, %v1295_v61  ;;  %v1293_v20 = vld [vmem:[%s6484_s3] sm:$0xff] }
  0x7c   : > { %1165 = vmatpush.msra.mxu1 %v4335_v49  ;;  %1130 = vmatmul.f32.gmra.mxu0 %v4438_v18  ;;  %v1297_v49 = vld [vmem:[%s6484_s3 + $0x20] sm:$0xff]  ;;  %v1392_v23 = vand.u32 4294901760, %v1391_v56  ;;  %v4696_v18 = vsub.f32 %v1296_v6, %v4652_v24  ;;  %v1421_v6 = vsub.f32 %v4656_v16, %v1420_v44  ;;  %v1444_v21 = vand.u32 4294901760, %v4718_v33 }
  0x7d   : > { %1169 = vmatmul.f32.vlgmr.msra.gmra.mxu1 %v955_v4  ;;  %1318 = vmatpush.msrb.mxu0 %v4524_v37  ;;  %v508_v4 = vrot.slane %v4205_v62, 1  ;;  %v4639_v53 = vand.u32 4294901760, %v1297_v49  ;;  %v1402_v15 = vand.u32 4294901760, %v4607_v11  ;;  %v1414_v29 = vand.u32 4294901760, %v4635_v12 }
  0x7e   : > { %1363 = vmatpush.msrb.mxu1 %v1362_v36  ;;  %1468 = vmatpush.msrb.mxu2 %v4517_v19  ;;  %v1409_v36 = vsub.f32 %v4623_v58, %v1408_v22  ;;  %v4708_v52 = vsub.f32 %v1295_v61, %v4668_v48 }
  0x7f   : > { %1320 = vmatpush.msrb.mxu0 %v4535_v17  ;;  %1523 = vmatpush.msrb.mxu3 %v4479_v28  ;;  %v1403_v45 = vsub.f32 %v4607_v11, %v1402_v15  ;;  %v511_v3 = vsel %vm510_vm1, %v508_v4, %v509_v14  ;;  %v512_v50 = vsel %vm510_vm1, %v509_v14, %v508_v4 }
  0x80   : > { %1369 = vmatpush.msrb.mxu1 %v1368_v26  ;;  %1248 = vmatmul.f32.gmra.mxu2 %v4425_v43  ;;  %v515_v26 = vmul.f32 %v513_v40, %v511_v3  ;;  %v1410_v56 = vand.u32 4294901760, %v1409_v36  ;;  %v514_v40 = vld [vmem:[%s6495_s14 + $0x8] sm:$0xff] }
  0x81   : > { %1322 = vmatpush.msrb.mxu0 %v4546_v41  ;;  %1471 = vmatpush.msrb.mxu2 %v4531_v9  ;;  %v1404_v13 = vand.u32 4294901760, %v1403_v45  ;;  %v1438_v45 = vand.u32 4294901760, %v4708_v52  ;;  %v516_v14 = vmul.f32 %v514_v40, %v512_v50 }
  0x82   : > { %1375 = vmatpush.msrb.mxu1 %v1374_v8  ;;  %1525 = vmatpush.msrb.mxu3 %v4489_v27 }
  0x83   : > { %1289 = vmatmul.f32.gmra.mxu3 %v4425_v43  ;;  %1324 = vmatpush.msrb.mxu0 %v4574_v63  ;;  %v4671_v43 = vsub.f32 %v1297_v49, %v4639_v53  ;;  %v4704_v49 = vand.u32 4294901760, %v1293_v20  ;;  %v1439_v36 = vsub.f32 %v4708_v52, %v1438_v45 }
  0x84   : > { %1381 = vmatpush.msrb.mxu1 %v1380_v7  ;;  %1474 = vmatpush.msrb.mxu2 %v4541_v32  ;;  %v1432_v7 = vand.u32 4294901760, %v4696_v18 }
  0x85   : > { %1175 = vmatmul.f32.gmra.mxu1 %v963_v54  ;;  %1326 = vmatpush.msrb.mxu0 %v4589_v42  ;;  %v1415_v54 = vsub.f32 %v4635_v12, %v1414_v29  ;;  %v1426_v8 = vand.u32 4294901760, %v4671_v43  ;;  %v4730_v3 = vsub.f32 %v1293_v20, %v4704_v49 }
  0x86   : > { %1387 = vmatpush.msrb.mxu1 %v1386_v47  ;;  %1527 = vmatpush.msrb.mxu3 %v4501_v34  ;;  %v4722_v47 = vand.u32 4294901760, %v515_v26  ;;  %v1433_v62 = vsub.f32 %v4696_v18, %v1432_v7 }
  0x87   : > { %1328 = vmatpush.msrb.mxu0 %v4595_v2  ;;  %1477 = vmatpush.msrb.mxu2 %v4558_v57  ;;  %v1416_v61 = vand.u32 4294901760, %v1415_v54  ;;  %v1450_v54 = vand.u32 4294901760, %v4730_v3  ;;  %v1699_v57 = vld [vmem:[%s6486_s5 + $0x50] sm:$0xff] }
  0x88   : > { %1393 = vmatpush.msrb.mxu1 %v1392_v23  ;;  %1529 = vmatpush.msrb.mxu3 %v4511_v39  ;;  %v1427_v23 = vsub.f32 %v4671_v43, %v1426_v8  ;;  %v1342_v4 = vsub.f32 %v515_v26, %v4722_v47  ;;  %v1445_v26 = vsub.f32 %v4718_v33, %v1444_v21 }
  0x89   : > { %1330 = vmatpush.msrb.mxu0 %v4620_v31  ;;  %1480 = vmatpush.msrb.mxu2 %v4567_v5 }
  0x8a   : > { %1399 = vmatpush.msrb.mxu1 %v1398_v30  ;;  %1531 = vmatpush.msrb.mxu3 %v4524_v37  ;;  %v1422_v30 = vand.u32 4294901760, %v1421_v6  ;;  %v1428_v20 = vand.u32 4294901760, %v1427_v23  ;;  %v4764_v6 = vand.u32 4294901760, %v516_v14  ;;  %v1451_v23 = vsub.f32 %v4730_v3, %v1450_v54 }
  0x8b   : > { %1332 = vmatpush.msrb.mxu0 %v4639_v53  ;;  %1483 = vmatpush.msrb.mxu2 %v4583_v46  ;;  %v1446_v50 = vand.u32 4294901760, %v1445_v26  ;;  %v4866_v46 = vand.u32 4294901760, %v1699_v57 }
  0x8c   : > { %1405 = vmatpush.msrb.mxu1 %v1404_v13  ;;  %1533 = vmatpush.msrb.mxu3 %v4535_v17  ;;  %v1434_v13 = vand.u32 4294901760, %v1433_v62  ;;  %v1452_v40 = vand.u32 4294901760, %v1451_v23 }
  0x8d   : > { %1334 = vmatpush.msrb.mxu0 %v4652_v24  ;;  %1486 = vmatpush.msrb.mxu2 %v4607_v11 }
  0x8e   : > { %1411 = vmatpush.msrb.mxu1 %v1410_v56  ;;  %1535 = vmatpush.msrb.mxu3 %v4546_v41  ;;  %v1343_v56 = vand.u32 4294901760, %v1342_v4 }
  0x8f   : > { %1336 = vmatpush.msrb.mxu0 %v4668_v48  ;;  %1489 = vmatpush.msrb.mxu2 %v4623_v58 }
  0x90   : > { %1417 = vmatpush.msrb.mxu1 %v1416_v61  ;;  %1537 = vmatpush.msrb.mxu3 %v4574_v63  ;;  %v1440_v61 = vand.u32 4294901760, %v1439_v36  ;;  %v1344_v10 = vsub.f32 %v1342_v4, %v1343_v56  ;;  %v1696_v36 = vld [vmem:[%s6486_s5 + $0x38] sm:$0xff] }
  0x91   : > { %1338 = vmatpush.msrb.mxu0 %v4692_v0  ;;  %1492 = vmatpush.msrb.mxu2 %v4635_v12  ;;  %v4890_v12 = vsub.f32 %v1699_v57, %v4866_v46  ;;  %v4960_v26 = vand.u32 4294901760, %v1696_v36 }
  0x92   : > { %1423 = vmatpush.msrb.mxu1 %v1422_v30  ;;  %1539 = vmatpush.msrb.mxu3 %v4589_v42  ;;  %v1345_v19 = vand.u32 4294901760, %v1344_v10 }
  0x93   : > { %1340 = vmatpush.msrb.mxu0 %v4704_v49  ;;  %1495 = vmatpush.msrb.mxu2 %v4656_v16 }
  0x94   : > { %1429 = vmatpush.msrb.mxu1 %v1428_v20  ;;  %1541 = vmatpush.msrb.mxu3 %v4595_v2 }
  0x95   : > { %1570 = vmatpush.msra.mxu0 %v1360_v35  ;;  %1498 = vmatpush.msrb.mxu2 %v4671_v43  ;;  %v1350_v35 = vsub.f32 %v516_v14, %v4764_v6 }
  0x96   : > { %1435 = vmatpush.msrb.mxu1 %v1434_v13  ;;  %1543 = vmatpush.msrb.mxu3 %v4620_v31 }
  0x97   : > { %1574 = vmatpush.msra.mxu0 %v1366_v38  ;;  %1501 = vmatpush.msrb.mxu2 %v4696_v18  ;;  %v1351_v38 = vand.u32 4294901760, %v1350_v35 }
  0x98   : > { %1441 = vmatpush.msrb.mxu1 %v1440_v61  ;;  %1545 = vmatpush.msrb.mxu3 %v4639_v53 }
  0x99   : > { %1578 = vmatpush.msra.mxu0 %v1372_v51  ;;  %1504 = vmatpush.msrb.mxu2 %v4708_v52  ;;  %v1352_v9 = vsub.f32 %v1350_v35, %v1351_v38  ;;  %v1700_v51 = vld [vmem:[%s6486_s5 + $0x58] sm:$0xff] }
  0x9a   : > { %1447 = vmatpush.msrb.mxu1 %v1446_v50  ;;  %1547 = vmatpush.msrb.mxu3 %v4652_v24  ;;  %v4975_v50 = vsub.f32 %v1696_v36, %v4960_v26 }
  0x9b   : > { %1582 = vmatpush.msra.mxu0 %v1378_v25  ;;  %1507 = vmatpush.msrb.mxu2 %v4718_v33  ;;  %v4864_v25 = vand.u32 4294901760, %v1700_v51 }
  0x9c   : > { %1453 = vmatpush.msrb.mxu1 %v1452_v40  ;;  %1549 = vmatpush.msrb.mxu3 %v4668_v48  ;;  %v1694_v40 = vld [vmem:[%s6486_s5 + $0x28] sm:$0xff] }
  0x9d   : > { %1586 = vmatpush.msra.mxu0 %v1384_v60  ;;  %1510 = vmatpush.msrb.mxu2 %v4730_v3  ;;  %v4883_v11 = vsub.f32 %v1700_v51, %v4864_v25 }
  0x9e   : > { %1641 = vmatpush.msra.mxu1 %v4479_v28  ;;  %1346 = vmatmul.f32.vlgmr.msrb.gmra.mxu0 %v1345_v19  ;;  %v1353_v28 = vand.u32 4294901760, %v1352_v9  ;;  %v1806_v9 = vand.u32 4294901760, %v4975_v50 }
  0x9f   : > { %1590 = vmatpush.msra.mxu0 %v1390_v1  ;;  %1551 = vmatpush.msrb.mxu3 %v4692_v0  ;;  %v1782_v16 = vand.u32 4294901760, %v4883_v11 }
  0xa0   : > { %1643 = vmatpush.msra.mxu1 %v4489_v27  ;;  %1513 = vmatmul.f32.vlgmr.msrb.gmra.mxu2 %v1342_v4  ;;  %v1704_v27 = vld [vmem:[%s6486_s5 + $0x78] sm:$0xff]  ;;  %v1697_v4 = vld [vmem:[%s6486_s5 + $0x40] sm:$0xff]  ;;  %v1807_v51 = vsub.f32 %v4975_v50, %v1806_v9 }
  0xa1   : > { %1594 = vmatpush.msra.mxu0 %v1396_v59  ;;  %1553 = vmatpush.msrb.mxu3 %v4704_v49  ;;  %v4949_v20 = vand.u32 4294901760, %v1697_v4 }
  0xa2   : > { %1645 = vmatpush.msra.mxu1 %v4501_v34  ;;  %1557 = vmatmul.f32.vlgmr.msrb.gmra.mxu3 %v1343_v56  ;;  %v1703_v34 = vld [vmem:[%s6486_s5 + $0x70] sm:$0xff] }
  0xa3   : > { %1598 = vmatpush.msra.mxu0 %v1402_v15  ;;  %1455 = vmatmul.f32.vlgmr.msrb.gmra.mxu1 %v4722_v47  ;;  %v4958_v13 = vsub.f32 %v1697_v4, %v4949_v20 }
  0xa4   : > { %1647 = vmatpush.msra.mxu1 %v4511_v39  ;;  %v1702_v39 = vld [vmem:[%s6486_s5 + $0x68] sm:$0xff] }
  0xa5   : > { %1602 = vmatpush.msra.mxu0 %v1408_v22  ;;  %v4849_v32 = vand.u32 4294901760, %v1702_v39  ;;  %v1800_v23 = vand.u32 4294901760, %v4958_v13 }
  0xa6   : > { %1649 = vmatpush.msra.mxu1 %v4524_v37  ;;  %1354 = vmatmul.f32.gmra.mxu0 %v1353_v28  ;;  %v4845_v37 = vand.u32 4294901760, %v1704_v27 }
  0xa7   : > { %1606 = vmatpush.msra.mxu0 %v1414_v29 }
  0xa8   : > { %1651 = vmatpush.msra.mxu1 %v4535_v17  ;;  %1518 = vmatmul.f32.gmra.mxu2 %v1350_v35  ;;  %v4847_v17 = vand.u32 4294901760, %v1703_v34 }
  0xa9   : > { %1610 = vmatpush.msra.mxu0 %v1420_v44  ;;  %1708 = vmatpush.msra.mxu2 %v4845_v37  ;;  %v1788_v44 = vand.u32 4294901760, %v4890_v12 }
  0xaa   : > { %1653 = vmatpush.msra.mxu1 %v4546_v41  ;;  %1563 = vmatmul.f32.gmra.mxu3 %v1351_v38  ;;  %v1701_v41 = vld [vmem:[%s6486_s5 + $0x60] sm:$0xff]  ;;  %v4872_v60 = vsub.f32 %v1703_v34, %v4847_v17  ;;  %v1801_v38 = vsub.f32 %v4958_v13, %v1800_v23 }
  0xab   : > { %1614 = vmatpush.msra.mxu0 %v1426_v8  ;;  %1459 = vmatmul.f32.gmra.mxu1 %v4764_v6  ;;  %v1693_v34 = vld [vmem:[%s6486_s5 + $0x20] sm:$0xff] }
  0xac   : > { %1655 = vmatpush.msra.mxu1 %v4574_v63  ;;  %v4862_v63 = vand.u32 4294901760, %v1701_v41  ;;  %1710 = vmatpush.msra.mxu2 %v4847_v17 }
  0xad   : > { %1618 = vmatpush.msra.mxu0 %v1432_v7  ;;  %v1789_v7 = vsub.f32 %v4890_v12, %v1788_v44 }
  0xae   : > { %1657 = vmatpush.msra.mxu1 %v4589_v42  ;;  %v4869_v42 = vsub.f32 %v1704_v27, %v4845_v37  ;;  %v4880_v1 = vsub.f32 %v1701_v41, %v4862_v63  ;;  %1712 = vmatpush.msra.mxu2 %v4849_v32  ;;  %v4995_v27 = vand.u32 4294901760, %v1694_v40  ;;  %v1802_v41 = vand.u32 4294901760, %v1801_v38 }
  0xaf   : > { %1622 = vmatpush.msra.mxu0 %v1438_v45  ;;  %v1698_v45 = vld [vmem:[%s6486_s5 + $0x48] sm:$0xff]  ;;  %v1790_v30 = vand.u32 4294901760, %v1789_v7 }
  0xb0   : > { %1659 = vmatpush.msra.mxu1 %v4595_v2  ;;  %v4875_v2 = vsub.f32 %v1702_v39, %v4849_v32  ;;  %v1758_v59 = vand.u32 4294901760, %v4869_v42  ;;  %1714 = vmatpush.msra.mxu2 %v4862_v63  ;;  %v4939_v62 = vand.u32 4294901760, %v1698_v45 }
  0xb1   : > { %1626 = vmatpush.msra.mxu0 %v1444_v21 }
  0xb2   : > { %1661 = vmatpush.msra.mxu1 %v4620_v31  ;;  %v1764_v31 = vand.u32 4294901760, %v4872_v60  ;;  %v1770_v58 = vand.u32 4294901760, %v4875_v2  ;;  %v1759_v15 = vsub.f32 %v4869_v42, %v1758_v59  ;;  %1716 = vmatpush.msra.mxu2 %v4864_v25  ;;  %v4947_v14 = vsub.f32 %v1698_v45, %v4939_v62 }
  0xb3   : > { %1630 = vmatpush.msra.mxu0 %v1450_v54 }
  0xb4   : > { %1663 = vmatpush.msra.mxu1 %v4639_v53  ;;  %1632 = vmatmul.f32.vlgmr.msra.gmra.mxu0 %v4722_v47  ;;  %v1776_v53 = vand.u32 4294901760, %v4880_v1  ;;  %v1771_v22 = vsub.f32 %v4875_v2, %v1770_v58  ;;  %v1794_v54 = vand.u32 4294901760, %v4947_v14 }
  0xb5   : > { %1863 = vmatpush.msrb.mxu0 %v4869_v42  ;;  %1718 = vmatpush.msra.mxu2 %v4866_v46 }
  0xb6   : > { %1665 = vmatpush.msra.mxu1 %v4652_v24  ;;  %v1765_v24 = vsub.f32 %v4872_v60, %v1764_v31  ;;  %v1772_v18 = vand.u32 4294901760, %v1771_v22  ;;  %v1795_v61 = vsub.f32 %v4947_v14, %v1794_v54  ;;  %v5013_v22 = vsub.f32 %v1694_v40, %v4995_v27 }
  0xb7   : > { %1866 = vmatpush.msrb.mxu0 %v4872_v60  ;;  %1720 = vmatpush.msra.mxu2 %v4939_v62 }
  0xb8   : > { %1667 = vmatpush.msra.mxu1 %v4668_v48  ;;  %v1760_v48 = vand.u32 4294901760, %v1759_v15  ;;  %v1766_v43 = vand.u32 4294901760, %v1765_v24  ;;  %v1796_v19 = vand.u32 4294901760, %v1795_v61  ;;  %v5008_v15 = vand.u32 4294901760, %v1693_v34  ;;  %v1690_v61 = vld [vmem:[%s6486_s5 + $0x8] sm:$0xff] }
  0xb9   : > { %1869 = vmatpush.msrb.mxu0 %v4875_v2  ;;  %1722 = vmatpush.msra.mxu2 %v4949_v20  ;;  %v6526_v7 = vand.u32 4294901760, %v5013_v22 }
  0xba   : > { %1669 = vmatpush.msra.mxu1 %v4692_v0  ;;  %v1777_v0 = vsub.f32 %v4880_v1, %v1776_v53  ;;  %1761 = vmatpush.msra.mxu3 %v1760_v48  ;;  %v1692_v48 = vld [vmem:[%s6486_s5 + $0x18] sm:$0xff] }
  0xbb   : > { %1872 = vmatpush.msrb.mxu0 %v4880_v1  ;;  %1724 = vmatpush.msra.mxu2 %v4960_v26 }
  0xbc   : > { %1671 = vmatpush.msra.mxu1 %v4704_v49  ;;  %1636 = vmatmul.f32.gmra.mxu0 %v4764_v6  ;;  %v1783_v49 = vsub.f32 %v4883_v11, %v1782_v16  ;;  %v1778_v52 = vand.u32 4294901760, %v1777_v0 }
  0xbd   : > { %1673 = vmatmul.f32.vlgmr.msra.gmra.mxu1 %v4722_v47  ;;  %1767 = vmatpush.msra.mxu3 %v1766_v43  ;;  %v1808_v43 = vand.u32 4294901760, %v1807_v51 }
  0xbe   : > { %v4860_v5 = vpop.f32.mrf.mxu0  ;;  %1921 = vmatpush.msrb.mxu1 %v4845_v37  ;;  %1875 = vmatpush.msrb.mxu0 %v4883_v11  ;;  %v1784_v47 = vand.u32 4294901760, %v1783_v49  ;;  %v5026_v49 = vand.u32 4294901760, %v1692_v48 }
  0xbf   : > { %1773 = vmatpush.msra.mxu3 %v1772_v18  ;;  %v5024_v18 = vsub.f32 %v1693_v34, %v5008_v15  ;;  %v5059_v34 = vand.u32 4294901760, %v1690_v61 }
  0xc0   : > { %1923 = vmatpush.msrb.mxu1 %v4847_v17  ;;  %1878 = vmatpush.msrb.mxu0 %v4890_v12  ;;  %v5039_v4 = vsub.f32 %v1692_v48, %v5026_v49  ;;  %v1689_v48 = vld [vmem:[%s6486_s5] sm:$0xff] }
  0xc1   : > { %1779 = vmatpush.msra.mxu3 %v1778_v52 }
  0xc2   : > { %1925 = vmatpush.msrb.mxu1 %v4849_v32  ;;  %1881 = vmatpush.msrb.mxu0 %v4947_v14 }
  0xc3   : > { %1785 = vmatpush.msra.mxu3 %v1784_v47  ;;  %v1691_v47 = vld [vmem:[%s6486_s5 + $0x10] sm:$0xff] }
  0xc4   : > { %1927 = vmatpush.msrb.mxu1 %v4862_v63  ;;  %1884 = vmatpush.msrb.mxu0 %v4958_v13  ;;  %v5041_v36 = vand.u32 4294901760, %v1691_v47 }
  0xc5   : > { %1677 = vmatmul.f32.gmra.mxu1 %v4764_v6  ;;  %1791 = vmatpush.msra.mxu3 %v1790_v30  ;;  %v1695_v6 = vld [vmem:[%s6486_s5 + $0x30] sm:$0xff]  ;;  %v6525_v30 = vand.u32 4294901760, %v5024_v18 }
  0xc6   : > { %1929 = vmatpush.msrb.mxu1 %v4864_v25  ;;  %v4977_v10 = vand.u32 4294901760, %v1695_v6  ;;  %1887 = vmatpush.msrb.mxu0 %v4975_v50  ;;  %v5057_v38 = vsub.f32 %v1691_v47, %v5041_v36 }
  0xc7   : > { %1797 = vmatpush.msra.mxu3 %v1796_v19  ;;  %v1825_v40 = vsub.f32 %v5024_v18, %v6525_v30  ;;  %v6527_v19 = vand.u32 4294901760, %v5039_v4  ;;  %v5079_v30 = vand.u32 4294901760, %v1689_v48 }
  0xc8   : > { %v4907_v29 = vpop.f32.mrf.mxu1  ;;  %1931 = vmatpush.msrb.mxu1 %v4866_v46  ;;  %v4992_v28 = vsub.f32 %v1695_v6, %v4977_v10  ;;  %1726 = vmatpush.msra.mxu2 %v4977_v10  ;;  %v1819_v6 = vsub.f32 %v5013_v22, %v6526_v7  ;;  %v6529_v47 = vand.u32 4294901760, %v5057_v38 }
  0xc9   : > { %1803 = vmatpush.msra.mxu3 %v1802_v41  ;;  %v697_v60 = vadd.f32 %v4907_v29, %v4860_v5 }
  0xca   : > { %v4929_v33 = vpop.f32.mrf.mxu2  ;;  %v4937_v3 = vpop.f32.mrf.mxu3  ;;  %1933 = vmatpush.msrb.mxu1 %v4939_v62  ;;  %v6528_v57 = vand.u32 4294901760, %v4992_v28  ;;  %1728 = vmatpush.msra.mxu2 %v4995_v27  ;;  %v1820_v51 = vand.u32 4294901760, %v1819_v6  ;;  %v6584_v12 = vand.u32 4294901760, %v4992_v28 }
  0xcb   : > { %1890 = vmatpush.msrb.mxu0 %v4992_v28  ;;  %1809 = vmatpush.msra.mxu3 %v1808_v43  ;;  %v1826_v43 = vand.u32 4294901760, %v1825_v40  ;;  %v755_v2 = vadd.f32 %v4929_v33, %v697_v60 }
  0xcc   : > { %1935 = vmatpush.msrb.mxu1 %v4949_v20  ;;  %v1813_v0 = vsub.f32 %v4992_v28, %v6528_v57  ;;  %1730 = vmatpush.msra.mxu2 %v5008_v15 }
  0xcd   : > { %1893 = vmatpush.msrb.mxu0 %v5013_v22 }
  0xce   : > { %1937 = vmatpush.msrb.mxu1 %v4960_v26  ;;  %v1814_v45 = vand.u32 4294901760, %v1813_v0  ;;  %1732 = vmatpush.msra.mxu2 %v5026_v49  ;;  %v1831_v0 = vsub.f32 %v5039_v4, %v6527_v19  ;;  %v1837_v19 = vsub.f32 %v5057_v38, %v6529_v47 }
  0xcf   : > { %v4921_v8 = vpop.f32.mrf.mxu0  ;;  %1896 = vmatpush.msrb.mxu0 %v5024_v18 }
  0xd0   : > { %1939 = vmatpush.msrb.mxu1 %v4977_v10  ;;  %1815 = vmatpush.msra.mxu3 %v1814_v45  ;;  %v5074_v45 = vsub.f32 %v1690_v61, %v5059_v34  ;;  %v1832_v40 = vand.u32 4294901760, %v1831_v0  ;;  %v5091_v61 = vsub.f32 %v1689_v48, %v5079_v30 }
  0xd1   : > { %1734 = vmatpush.msra.mxu2 %v5041_v36  ;;  %1899 = vmatpush.msrb.mxu0 %v5039_v4 }
  0xd2   : > { %v4941_v21 = vpop.f32.mrf.mxu1  ;;  %1941 = vmatpush.msrb.mxu1 %v4995_v27  ;;  %1821 = vmatpush.msra.mxu3 %v1820_v51  ;;  %v6530_v57 = vand.u32 4294901760, %v5074_v45  ;;  %v1838_v51 = vand.u32 4294901760, %v1837_v19 }
  0xd3   : > { %v4980_v35 = vpop.f32.mrf.mxu2  ;;  %1736 = vmatpush.msra.mxu2 %v5059_v34  ;;  %1902 = vmatpush.msrb.mxu0 %v5057_v38 }
  0xd4   : > { %1943 = vmatpush.msrb.mxu1 %v5008_v15  ;;  %1827 = vmatpush.msra.mxu3 %v1826_v43  ;;  %v1843_v0 = vsub.f32 %v5074_v45, %v6530_v57  ;;  %v1848_v43 = vand.u32 4294901760, %v5091_v61 }
  0xd5   : > { %1738 = vmatpush.msra.mxu2 %v5079_v30  ;;  %1905 = vmatpush.msrb.mxu0 %v5074_v45 }
  0xd6   : > { %v5002_v39 = vpop.f32.mrf.mxu3  ;;  %1945 = vmatpush.msrb.mxu1 %v5026_v49  ;;  %1833 = vmatpush.msra.mxu3 %v1832_v40  ;;  %v1844_v48 = vand.u32 4294901760, %v1843_v0  ;;  %v1849_v42 = vsub.f32 %v5091_v61, %v1848_v43 }
  0xd7   : > { %1968 = vmatpush.msrb.mxu2 %v1758_v59  ;;  %1908 = vmatpush.msrb.mxu0 %v5091_v61 }
  0xd8   : > { %1947 = vmatpush.msrb.mxu1 %v5041_v36  ;;  %1839 = vmatpush.msra.mxu3 %v1838_v51  ;;  %v1850_v59 = vand.u32 4294901760, %v1849_v42 }
  0xd9   : > { %v4963_v56 = vpop.f32.mrf.mxu0  ;;  %1972 = vmatpush.msrb.mxu2 %v1764_v31 }
  0xda   : > { %1949 = vmatpush.msrb.mxu1 %v5059_v34  ;;  %1845 = vmatpush.msra.mxu3 %v1844_v48 }
  0xdb   : > { %1976 = vmatpush.msrb.mxu2 %v1770_v58 }
  0xdc   : > { %v5010_v24 = vpop.f32.mrf.mxu1  ;;  %1951 = vmatpush.msrb.mxu1 %v5079_v30  ;;  %1851 = vmatpush.msra.mxu3 %v1850_v59  ;;  %v1684_v59 = vld [vmem:[%s6485_s4 + $0x8] sm:$0xff] }
  0xdd   : > { %v5062_v41 = vpop.f32.mrf.mxu2  ;;  %1980 = vmatpush.msrb.mxu2 %v1776_v53  ;;  %v6585_v53 = vand.u32 4294901760, %v5013_v22 }
  0xde   : > { %2039 = vmatpush.msrb.mxu3 %v4845_v37  ;;  %v701_v37 = vadd.f32 %v4941_v21, %v4921_v8 }
  0xdf   : > { %1984 = vmatpush.msrb.mxu2 %v1782_v16  ;;  %v6586_v16 = vand.u32 4294901760, %v5024_v18 }
  0xe0   : > { %v5082_v7 = vpop.f32.mrf.mxu3  ;;  %2041 = vmatpush.msrb.mxu3 %v4847_v17  ;;  %v799_v17 = vadd.f32 %v4937_v3, %v755_v2  ;;  %v760_v58 = vadd.f32 %v4980_v35, %v701_v37  ;;  %v6588_v3 = vand.u32 4294901760, %v5057_v38  ;;  %v2123_v2 = vld [vmem:[%s6489_s8 + $0x70] sm:$0xff] }
  0xe1   : > { %1988 = vmatpush.msrb.mxu2 %v1788_v44  ;;  %v6587_v44 = vand.u32 4294901760, %v5039_v4 }
  0xe2   : > { %2043 = vmatpush.msrb.mxu3 %v4849_v32 }
  0xe3   : > { %1992 = vmatpush.msrb.mxu2 %v1794_v54 }
  0xe4   : > { %2045 = vmatpush.msrb.mxu3 %v4862_v63  ;;  %v874_v63 = vadd.f32 %v4963_v56, %v799_v17  ;;  %v5186_v17 = vand.u32 4294901760, %v2123_v2 }
  0xe5   : > { %1996 = vmatpush.msrb.mxu2 %v1800_v23 }
  0xe6   : > { %2047 = vmatpush.msrb.mxu3 %v4864_v25  ;;  %v805_v25 = vadd.f32 %v5002_v39, %v760_v58  ;;  %v2119_v58 = vld [vmem:[%s6489_s8 + $0x50] sm:$0xff] }
  0xe7   : > { %v5029_v52 = vpop.f32.mrf.mxu0  ;;  %2000 = vmatpush.msrb.mxu2 %v1806_v9 }
  0xe8   : > { %2049 = vmatpush.msrb.mxu3 %v4866_v46  ;;  %v915_v46 = vadd.f32 %v5010_v24, %v874_v63  ;;  %v878_v33 = vadd.f32 %v5029_v52, %v805_v25 }
  0xe9   : > { %2004 = vmatpush.msrb.mxu2 %v6584_v12 }
  0xea   : > { %2051 = vmatpush.msrb.mxu3 %v4939_v62  ;;  %v960_v14 = vadd.f32 %v5062_v41, %v915_v46 }
  0xeb   : > { %2008 = vmatpush.msrb.mxu2 %v6585_v53 }
  0xec   : > { %2053 = vmatpush.msrb.mxu3 %v4949_v20  ;;  %v6589_v20 = vand.u32 4294901760, %v5074_v45 }
  0xed   : > { %2012 = vmatpush.msrb.mxu2 %v6586_v16 }
  0xee   : > { %2055 = vmatpush.msrb.mxu3 %v4960_v26  ;;  %v1069_v26 = vadd.f32 %v5082_v7, %v960_v14 }
  0xef   : > { %2016 = vmatpush.msrb.mxu2 %v6587_v44  ;;  %v5214_v44 = vand.u32 4294901760, %v2119_v58 }
  0xf0   : > { %v5077_v6 = vpop.f32.mrf.mxu1  ;;  %2057 = vmatpush.msrb.mxu3 %v4977_v10 }
  0xf1   : > { %v5100_v47 = vpop.f32.mrf.mxu0  ;;  %v967_v19 = vpop.f32.mrf.mxu2  ;;  %2020 = vmatpush.msrb.mxu2 %v6588_v3  ;;  %v919_v54 = vadd.f32 %v5077_v6, %v878_v33 }
  0xf2   : > { %2059 = vmatpush.msrb.mxu3 %v4995_v27  ;;  %v1127_v23 = vadd.f32 %v5100_v47, %v1069_v26 }
  0xf3   : > { %2024 = vmatpush.msrb.mxu2 %v6589_v20  ;;  %v968_v50 = vadd.f32 %v967_v19, %v919_v54  ;;  %v5228_v54 = vsub.f32 %v2119_v58, %v5214_v44 }
  0xf4   : > { %v1072_v40 = vpop.f32.mrf.mxu3  ;;  %2061 = vmatpush.msrb.mxu3 %v5008_v15 }
  0xf5   : > { %2028 = vmatpush.msrb.mxu2 %v1848_v43  ;;  %v1073_v39 = vadd.f32 %v1072_v40, %v968_v50 }
  0xf6   : > { %2063 = vmatpush.msrb.mxu3 %v5026_v49 }
  0xf8   : > { %2065 = vmatpush.msrb.mxu3 %v5041_v36 }
  0xf9   : > { %v1131_v31 = vpop.f32.mrf.mxu0 }
  0xfa   : > { %v1170_v57 = vpop.f32.mrf.mxu1  ;;  %2067 = vmatpush.msrb.mxu3 %v5059_v34  ;;  %v1132_v49 = vadd.f32 %v1131_v31, %v1073_v39  ;;  %v2124_v31 = vld [vmem:[%s6489_s8 + $0x78] sm:$0xff] }
  0xfb   : > { %v1245_v1 = vpop.f32.mrf.mxu2  ;;  %v1171_v9 = vadd.f32 %v1170_v57, %v1127_v23  ;;  %v1683_v57 = vld [vmem:[%s6485_s4] sm:$0xff]  ;;  %v5184_v37 = vand.u32 4294901760, %v2124_v31 }
  0xfc   : > { %2069 = vmatpush.msrb.mxu3 %v5079_v30 }
  0xfd   : > { %v1246_v15 = vadd.f32 %v1245_v1, %v1171_v9  ;;  %v2122_v1 = vld [vmem:[%s6489_s8 + $0x68] sm:$0xff]  ;;  %v5204_v16 = vsub.f32 %v2124_v31, %v5184_v37  ;;  %2126 = vmatpush.msra.mxu0 %v5184_v37 }
  0xfe   : > { %v1286_v5 = vpop.f32.mrf.mxu3 }
  0xff   : > { %v1287_v4 = vadd.f32 %v1286_v5, %v1246_v15  ;;  %v5188_v5 = vand.u32 4294901760, %v2122_v1  ;;  %2128 = vmatpush.msra.mxu0 %v5186_v17 }
 0x101   : > { %v5210_v46 = vsub.f32 %v2122_v1, %v5188_v5  ;;  %2130 = vmatpush.msra.mxu0 %v5188_v5 }
 0x102   : > { %v1176_v32 = vpop.f32.mrf.mxu1 }
 0x103   : > { %v1249_v29 = vpop.f32.mrf.mxu2  ;;  %v1177_v38 = vadd.f32 %v1176_v32, %v1132_v49  ;;  %v2121_v32 = vld [vmem:[%s6489_s8 + $0x60] sm:$0xff]  ;;  %v2188_v20 = vand.u32 4294901760, %v5210_v46 }
 0x104   : > { %v5199_v53 = vand.u32 4294901760, %v2121_v32 }
 0x105   : > { %v1250_v6 = vadd.f32 %v1249_v29, %v1177_v38  ;;  %v5207_v29 = vsub.f32 %v2123_v2, %v5186_v17  ;;  %v2189_v9 = vsub.f32 %v5210_v46, %v2188_v20 }
 0x106   : > { %v1290_v62 = vpop.f32.mrf.mxu3  ;;  %v5217_v3 = vsub.f32 %v2121_v32, %v5199_v53  ;;  %2132 = vmatpush.msra.mxu0 %v5199_v53 }
 0x107   : > { %v1291_v48 = vadd.f32 %v1290_v62, %v1250_v6  ;;  %v2182_v14 = vand.u32 4294901760, %v5207_v29  ;;  %v2190_v38 = vand.u32 4294901760, %v2189_v9 }
 0x108   : > { %v2194_v23 = vand.u32 4294901760, %v5217_v3 }
 0x10a   : > { %v2195_v39 = vsub.f32 %v5217_v3, %v2194_v23 }
 0x11b   : > { %v1347_v11 = vpop.f32.mrf.mxu0 }
 0x120   : > { %v1456_v8 = vpop.f32.mrf.mxu1 }
 0x121   : > { %v1457_v56 = vadd.f32 %v1456_v8, %v1347_v11  ;;  %v2120_v11 = vld [vmem:[%s6489_s8 + $0x58] sm:$0xff] }
 0x122   : > { %v5201_v25 = vand.u32 4294901760, %v2120_v11 }
 0x123   : > { %v1355_v21 = vpop.f32.mrf.mxu0  ;;  %v1514_v13 = vpop.f32.mrf.mxu2 }
 0x124   : > { %v1515_v28 = vadd.f32 %v1514_v13, %v1457_v56  ;;  %v5220_v62 = vsub.f32 %v2120_v11, %v5201_v25  ;;  %v2118_v13 = vld [vmem:[%s6489_s8 + $0x48] sm:$0xff]  ;;  %2134 = vmatpush.msra.mxu0 %v5201_v25 }
 0x125   : > { %v1558_v10 = vpop.f32.mrf.mxu3  ;;  %v5254_v15 = vand.u32 4294901760, %v2118_v13 }
 0x126   : > { %v1559_v24 = vadd.f32 %v1558_v10, %v1515_v28  ;;  %v2200_v50 = vand.u32 4294901760, %v5220_v62  ;;  %v2206_v28 = vand.u32 4294901760, %v5228_v54  ;;  %2136 = vmatpush.msra.mxu0 %v5214_v44 }
 0x128   : > { %v1460_v35 = vpop.f32.mrf.mxu1  ;;  %2138 = vmatpush.msra.mxu0 %v5254_v15 }
 0x129   : > { %v1461_v22 = vadd.f32 %v1460_v35, %v1355_v21  ;;  %v2176_v21 = vand.u32 4294901760, %v5204_v16  ;;  %v2183_v35 = vsub.f32 %v5207_v29, %v2182_v14 }
 0x12b   : > { %v1519_v18 = vpop.f32.mrf.mxu2  ;;  %v2177_v10 = vsub.f32 %v5204_v16, %v2176_v21 }
 0x12c   : > { %v1520_v36 = vadd.f32 %v1519_v18, %v1461_v22  ;;  %v2116_v22 = vld [vmem:[%s6489_s8 + $0x38] sm:$0xff]  ;;  %v2115_v18 = vld [vmem:[%s6489_s8 + $0x30] sm:$0xff] }
 0x12d   : > { %v1564_v47 = vpop.f32.mrf.mxu3  ;;  %v2178_v49 = vand.u32 4294901760, %v2177_v10  ;;  %v5287_v6 = vand.u32 4294901760, %v2115_v18 }
 0x12e   : > { %v1565_v30 = vadd.f32 %v1564_v47, %v1520_v36  ;;  %v2201_v36 = vsub.f32 %v5220_v62, %v2200_v50  ;;  %v2113_v47 = vld [vmem:[%s6489_s8 + $0x20] sm:$0xff] }
 0x12f   : > { %2179 = vmatpush.msra.mxu1 %v2178_v49 }
 0x130   : > { %v2202_v31 = vand.u32 4294901760, %v2201_v36  ;;  %v2111_v36 = vld [vmem:[%s6489_s8 + $0x10] sm:$0xff] }
 0x131   : > { %v1633_v27 = vpop.f32.mrf.mxu0 }
 0x132   : > { %v1634_v52 = vadd.f32 %v1633_v27, %v1559_v24  ;;  %v2117_v24 = vld [vmem:[%s6489_s8 + $0x40] sm:$0xff] }
 0x139   : > { %v1637_v45 = vpop.f32.mrf.mxu0 }
 0x13a   : > { %v1674_v7 = vpop.f32.mrf.mxu1  ;;  %v1638_v51 = vadd.f32 %v1637_v45, %v1565_v30  ;;  %v5285_v45 = vand.u32 4294901760, %v2116_v22  ;;  %v2112_v30 = vld [vmem:[%s6489_s8 + $0x18] sm:$0xff] }
 0x13b   : > { %v1675_v41 = vadd.f32 %v1674_v7, %v1634_v52  ;;  %v2184_v52 = vand.u32 4294901760, %v2183_v35  ;;  %v2114_v7 = vld [vmem:[%s6489_s8 + $0x28] sm:$0xff]  ;;  %v5310_v2 = vand.u32 4294901760, %v2112_v30 }
 0x13d   : > { %v1681_v34 = vadd.f32 %v1675_v41, %v1287_v4  ;;  %v5274_v41 = vsub.f32 %v2118_v13, %v5254_v15  ;;  %2185 = vmatpush.msra.mxu1 %v2184_v52  ;;  %v5338_v35 = vsub.f32 %v2112_v30, %v5310_v2 }
 0x13f   : > { %v1685_v61 = vadd.f32 %v1683_v57, %v1681_v34  ;;  %v2207_v57 = vsub.f32 %v5228_v54, %v2206_v28  ;;  %v5283_v34 = vand.u32 4294901760, %v2117_v24  ;;  %2191 = vmatpush.msra.mxu1 %v2190_v38 }
 0x141   : > { %v1687_v0 = vmax.f32 %v1685_v61, 0.0  ;;  %2140 = vmatpush.msra.mxu0 %v5283_v34 }
 0x142   : > { %v1678_v43 = vpop.f32.mrf.mxu1 }
 0x143   : > { %v5168_v19 = vand.u32 4294901760, %v1687_v0  ;;  %v1679_v42 = vadd.f32 %v1678_v43, %v1638_v51  ;;  %v2196_v51 = vand.u32 4294901760, %v2195_v39  ;;  %v5294_v43 = vand.u32 4294901760, %v2114_v7  ;;  %2142 = vmatpush.msra.mxu0 %v5285_v45 }
 0x145   : > { %v1740_v40 = vsub.f32 %v1687_v0, %v5168_v19  ;;  %v1682_v60 = vadd.f32 %v1679_v42, %v1291_v48  ;;  %1853 = vmatmul.f32.vlgmr.msra.gmra.mxu3 %v5168_v19  ;;  %v2212_v0 = vand.u32 4294901760, %v5274_v41  ;;  %v5298_v48 = vsub.f32 %v2117_v24, %v5283_v34  ;;  %2197 = vmatpush.msra.mxu1 %v2196_v51 }
 0x146   : > { %2339 = vmatpush.msra.mxu3 %v5184_v37  ;;  %v5301_v42 = vsub.f32 %v2116_v22, %v5285_v45  ;;  %v5319_v58 = vsub.f32 %v2114_v7, %v5294_v43  ;;  %2144 = vmatpush.msra.mxu0 %v5287_v6 }
 0x147   : > { %v1686_v12 = vadd.f32 %v1684_v59, %v1682_v60  ;;  %1911 = vmatmul.f32.vlgmr.msrb.gmra.mxu0 %v1740_v40  ;;  %v1741_v63 = vand.u32 4294901760, %v1740_v40  ;;  %v5304_v59 = vsub.f32 %v2115_v18, %v5287_v6  ;;  %v2213_v1 = vsub.f32 %v5274_v41, %v2212_v0  ;;  %2203 = vmatpush.msra.mxu1 %v2202_v31 }
 0x148   : > { %2341 = vmatpush.msra.mxu3 %v5186_v17  ;;  %v2218_v32 = vand.u32 4294901760, %v5298_v48  ;;  %v2224_v11 = vand.u32 4294901760, %v5301_v42  ;;  %v2236_v10 = vand.u32 4294901760, %v5319_v58  ;;  %v2248_v18 = vand.u32 4294901760, %v5338_v35  ;;  %2146 = vmatpush.msra.mxu0 %v5294_v43 }
 0x149   : > { %v1688_v8 = vmax.f32 %v1686_v12, 0.0  ;;  %1955 = vmatmul.f32.vlgmr.msrb.gmra.mxu1 %v1741_v63  ;;  %v1742_v33 = vsub.f32 %v1740_v40, %v1741_v63  ;;  %v5306_v40 = vand.u32 4294901760, %v2113_v47  ;;  %v2208_v12 = vand.u32 4294901760, %v2207_v57 }
 0x14a   : > { %2343 = vmatpush.msra.mxu3 %v5188_v5  ;;  %v2219_v63 = vsub.f32 %v5298_v48, %v2218_v32  ;;  %v2214_v13 = vand.u32 4294901760, %v2213_v1  ;;  %v2237_v22 = vsub.f32 %v5319_v58, %v2236_v10 }
 0x14b   : > { %v5233_v26 = vand.u32 4294901760, %v1688_v8  ;;  %v1743_v56 = vand.u32 4294901760, %v1742_v33  ;;  %v5328_v33 = vsub.f32 %v2113_v47, %v5306_v40  ;;  %2209 = vmatpush.msra.mxu1 %v2208_v12  ;;  %2148 = vmatpush.msra.mxu0 %v5306_v40  ;;  %v5381_v47 = vand.u32 4294901760, %v2111_v36 }
 0x14c   : > { %2345 = vmatpush.msra.mxu3 %v5199_v53  ;;  %v2220_v9 = vand.u32 4294901760, %v2219_v63  ;;  %v2238_v7 = vand.u32 4294901760, %v2237_v22 }
 0x14d   : > { %1744 = vmatmul.f32.vlgmr.msra.gmra.mxu2 %v1743_v56  ;;  %1857 = vmatmul.f32.gmra.mxu3 %v5233_v26  ;;  %v1748_v27 = vsub.f32 %v1688_v8, %v5233_v26  ;;  %v2230_v8 = vand.u32 4294901760, %v5304_v59  ;;  %v2225_v56 = vsub.f32 %v5301_v42, %v2224_v11  ;;  %v2242_v39 = vand.u32 4294901760, %v5328_v33 }
 0x14e   : > { %2281 = vmatpush.msra.mxu2 %v5204_v16  ;;  %2347 = vmatpush.msra.mxu3 %v5201_v25  ;;  %v5387_v57 = vsub.f32 %v2111_v36, %v5381_v47 }
 0x14f   : > { %1916 = vmatmul.f32.gmra.mxu0 %v1748_v27  ;;  %v1749_v4 = vand.u32 4294901760, %v1748_v27  ;;  %2215 = vmatpush.msra.mxu1 %v2214_v13  ;;  %v2226_v24 = vand.u32 4294901760, %v2225_v56  ;;  %v2243_v52 = vsub.f32 %v5328_v33, %v2242_v39 }
 0x150   : > { %2284 = vmatpush.msra.mxu2 %v5207_v29  ;;  %2349 = vmatpush.msra.mxu3 %v5214_v44  ;;  %v2254_v51 = vand.u32 4294901760, %v5387_v57 }
 0x151   : > { %1961 = vmatmul.f32.gmra.mxu1 %v1749_v4  ;;  %v1750_v61 = vsub.f32 %v1748_v27, %v1749_v4  ;;  %v2231_v27 = vsub.f32 %v5304_v59, %v2230_v8  ;;  %v2244_v4 = vand.u32 4294901760, %v2243_v52  ;;  %2150 = vmatpush.msra.mxu0 %v5310_v2  ;;  %v2107_v52 = vld [vmem:[%s6488_s7 + $0x70] sm:$0xff] }
 0x152   : > { %2287 = vmatpush.msra.mxu2 %v5210_v46  ;;  %2351 = vmatpush.msra.mxu3 %v5254_v15  ;;  %v2255_v1 = vsub.f32 %v5387_v57, %v2254_v51 }
 0x153   : > { %v1751_v60 = vand.u32 4294901760, %v1750_v61  ;;  %2221 = vmatpush.msra.mxu1 %v2220_v9  ;;  %v2232_v49 = vand.u32 4294901760, %v2231_v27  ;;  %2152 = vmatpush.msra.mxu0 %v5381_v47  ;;  %v2109_v61 = vld [vmem:[%s6489_s8] sm:$0xff]  ;;  %v2108_v27 = vld [vmem:[%s6488_s7 + $0x78] sm:$0xff] }
 0x154   : > { %2290 = vmatpush.msra.mxu2 %v5217_v3  ;;  %2353 = vmatpush.msra.mxu3 %v5283_v34  ;;  %v5401_v31 = vand.u32 4294901760, %v2109_v61  ;;  %v2256_v13 = vand.u32 4294901760, %v2255_v1  ;;  %v2104_v3 = vld [vmem:[%s6488_s7 + $0x58] sm:$0xff] }
 0x155   : > { %1752 = vmatmul.f32.gmra.mxu2 %v1751_v60  ;;  %2071 = vmatmul.f32.vlgmr.msrb.gmra.mxu3 %v5168_v19  ;;  %v5480_v1 = vand.u32 4294901760, %v2104_v3 }
 0x156   : > { %2293 = vmatpush.msra.mxu2 %v5220_v62  ;;  %2355 = vmatpush.msra.mxu3 %v5285_v45  ;;  %v5410_v63 = vsub.f32 %v2109_v61, %v5401_v31  ;;  %v2103_v62 = vld [vmem:[%s6488_s7 + $0x50] sm:$0xff] }
 0x157   : > { %2227 = vmatpush.msra.mxu1 %v2226_v24  ;;  %v5425_v24 = vand.u32 4294901760, %v2108_v27 }
 0x158   : > { %2296 = vmatpush.msra.mxu2 %v5228_v54  ;;  %2357 = vmatpush.msra.mxu3 %v5287_v6  ;;  %v2266_v9 = vand.u32 4294901760, %v5410_v63  ;;  %v2102_v54 = vld [vmem:[%s6488_s7 + $0x48] sm:$0xff] }
 0x159   : > { %2233 = vmatpush.msra.mxu1 %v2232_v49  ;;  %v5437_v16 = vsub.f32 %v2108_v27, %v5425_v24  ;;  %v5497_v27 = vsub.f32 %v2104_v3, %v5480_v1 }
 0x15a   : > { %2299 = vmatpush.msra.mxu2 %v5274_v41  ;;  %2359 = vmatpush.msra.mxu3 %v5294_v43  ;;  %v2267_v49 = vsub.f32 %v5410_v63, %v2266_v9  ;;  %v2101_v41 = vld [vmem:[%s6488_s7 + $0x40] sm:$0xff] }
 0x15b   : > { %2239 = vmatpush.msra.mxu1 %v2238_v7  ;;  %v2548_v29 = vand.u32 4294901760, %v5437_v16 }
 0x15c   : > { %2302 = vmatpush.msra.mxu2 %v5298_v48  ;;  %2361 = vmatpush.msra.mxu3 %v5306_v40  ;;  %v2268_v7 = vand.u32 4294901760, %v2267_v49  ;;  %v5508_v49 = vand.u32 4294901760, %v2102_v54  ;;  %v2100_v48 = vld [vmem:[%s6488_s7 + $0x38] sm:$0xff] }
 0x15d   : > { %2030 = vmatmul.f32.vlgmr.msrb.gmra.mxu2 %v5168_v19  ;;  %2075 = vmatmul.f32.gmra.mxu3 %v5233_v26  ;;  %v2249_v19 = vsub.f32 %v5338_v35, %v2248_v18  ;;  %v2549_v46 = vsub.f32 %v5437_v16, %v2548_v29 }
 0x15e   : > { %2305 = vmatpush.msra.mxu2 %v5301_v42  ;;  %2245 = vmatpush.msra.mxu1 %v2244_v4  ;;  %v2099_v42 = vld [vmem:[%s6488_s7 + $0x30] sm:$0xff] }
 0x15f   : > { %v2250_v38 = vand.u32 4294901760, %v2249_v19  ;;  %2363 = vmatpush.msra.mxu3 %v5310_v2  ;;  %v2106_v19 = vld [vmem:[%s6488_s7 + $0x68] sm:$0xff] }
 0x160   : > { %2308 = vmatpush.msra.mxu2 %v5304_v59 }
 0x161   : > { %2251 = vmatpush.msra.mxu1 %v2250_v38  ;;  %2365 = vmatpush.msra.mxu3 %v5381_v47  ;;  %v2105_v38 = vld [vmem:[%s6488_s7 + $0x60] sm:$0xff] }
 0x162   : > { %2311 = vmatpush.msra.mxu2 %v5319_v58  ;;  %v5464_v36 = vand.u32 4294901760, %v2105_v38 }
 0x163   : > { %2257 = vmatpush.msra.mxu1 %v2256_v13 }
 0x164   : > { %2314 = vmatpush.msra.mxu2 %v5328_v33  ;;  %v5483_v13 = vsub.f32 %v2105_v38, %v5464_v36  ;;  %v5530_v38 = vsub.f32 %v2102_v54, %v5508_v49 }
 0x165   : > { %2034 = vmatmul.f32.gmra.mxu2 %v5233_v26  ;;  %v2110_v26 = vld [vmem:[%s6489_s8 + $0x8] sm:$0xff] }
 0x166   : > { %2317 = vmatpush.msra.mxu2 %v5338_v35  ;;  %v5389_v30 = vand.u32 4294901760, %v2110_v26  ;;  %v2584_v3 = vand.u32 4294901760, %v5530_v38 }
 0x168   : > { %v5398_v60 = vsub.f32 %v2110_v26, %v5389_v30  ;;  %2320 = vmatpush.msra.mxu2 %v5387_v57  ;;  %2367 = vmatpush.msra.mxu3 %v5389_v30 }
 0x169   : > { %2154 = vmatpush.msra.mxu0 %v5389_v30 }
 0x16a   : > { %v2260_v12 = vand.u32 4294901760, %v5398_v60  ;;  %2323 = vmatpush.msra.mxu2 %v5398_v60  ;;  %2369 = vmatpush.msra.mxu3 %v5401_v31 }
 0x16b   : > { %2156 = vmatpush.msra.mxu0 %v5401_v31 }
 0x16c   : > { %v2261_v56 = vsub.f32 %v5398_v60, %v2260_v12  ;;  %2326 = vmatpush.msra.mxu2 %v5410_v63  ;;  %v2093_v60 = vld [vmem:[%s6488_s7] sm:$0xff] }
 0x16d   : > { %2386 = vmatpush.msrb.mxu0 %v2176_v21  ;;  %v5439_v21 = vand.u32 4294901760, %v2107_v52 }
 0x16e   : > { %v2262_v22 = vand.u32 4294901760, %v2261_v56  ;;  %2498 = vmatpush.msrb.mxu2 %v5425_v24  ;;  %v5494_v56 = vand.u32 4294901760, %v2103_v62 }
 0x16f   : > { %2390 = vmatpush.msrb.mxu0 %v2182_v14  ;;  %v5448_v14 = vand.u32 4294901760, %v2106_v19  ;;  %v5451_v4 = vsub.f32 %v2107_v52, %v5439_v21 }
 0x170   : > { %2263 = vmatpush.msra.mxu1 %v2262_v22  ;;  %2500 = vmatpush.msrb.mxu2 %v5439_v21  ;;  %v2566_v22 = vand.u32 4294901760, %v5483_v13  ;;  %v5511_v52 = vsub.f32 %v2103_v62, %v5494_v56  ;;  %v5556_v62 = vand.u32 4294901760, %v2099_v42 }
 0x171   : > { %2394 = vmatpush.msrb.mxu0 %v2188_v20  ;;  %v2554_v20 = vand.u32 4294901760, %v5451_v4  ;;  %v5467_v26 = vsub.f32 %v2106_v19, %v5448_v14  ;;  %v5527_v19 = vand.u32 4294901760, %v2101_v41 }
 0x172   : > { %2269 = vmatpush.msra.mxu1 %v2268_v7  ;;  %2502 = vmatpush.msrb.mxu2 %v5448_v14  ;;  %v2567_v7 = vsub.f32 %v5483_v13, %v2566_v22 }
 0x173   : > { %2398 = vmatpush.msrb.mxu0 %v2194_v23  ;;  %v2555_v23 = vsub.f32 %v5451_v4, %v2554_v20  ;;  %v2560_v61 = vand.u32 4294901760, %v5467_v26 }
 0x174   : > { %2457 = vmatpush.msrb.mxu1 %v5184_v37  ;;  %v2550_v37 = vand.u32 4294901760, %v2549_v46  ;;  %2504 = vmatpush.msrb.mxu2 %v5464_v36  ;;  %v2568_v46 = vand.u32 4294901760, %v2567_v7 }
 0x175   : > { %2402 = vmatpush.msrb.mxu0 %v2200_v50  ;;  %v2561_v50 = vsub.f32 %v5467_v26, %v2560_v61 }
 0x176   : > { %2459 = vmatpush.msrb.mxu1 %v5186_v17  ;;  %2551 = vmatpush.msrb.mxu3 %v2550_v37  ;;  %v2556_v17 = vand.u32 4294901760, %v2555_v23  ;;  %v5543_v37 = vand.u32 4294901760, %v2100_v48  ;;  %v5547_v23 = vsub.f32 %v2101_v41, %v5527_v19  ;;  %v5573_v41 = vsub.f32 %v2099_v42, %v5556_v62 }
 0x177   : > { %2406 = vmatpush.msrb.mxu0 %v2206_v28  ;;  %2506 = vmatpush.msrb.mxu2 %v5480_v1  ;;  %v2572_v28 = vand.u32 4294901760, %v5497_v27 }
 0x178   : > { %2461 = vmatpush.msrb.mxu1 %v5188_v5  ;;  %2557 = vmatpush.msrb.mxu3 %v2556_v17  ;;  %v2562_v5 = vand.u32 4294901760, %v2561_v50  ;;  %v5559_v17 = vsub.f32 %v2100_v48, %v5543_v37  ;;  %v2590_v50 = vand.u32 4294901760, %v5547_v23  ;;  %v6537_v58 = vand.u32 4294901760, %v5573_v41 }
 0x179   : > { %2410 = vmatpush.msrb.mxu0 %v2212_v0  ;;  %2508 = vmatpush.msrb.mxu2 %v5494_v56  ;;  %v2578_v0 = vand.u32 4294901760, %v5511_v52 }
 0x17a   : > { %2463 = vmatpush.msrb.mxu1 %v5199_v53  ;;  %2563 = vmatpush.msrb.mxu3 %v2562_v5  ;;  %v2573_v53 = vsub.f32 %v5497_v27, %v2572_v28  ;;  %v2596_v5 = vand.u32 4294901760, %v5559_v17  ;;  %v2591_v59 = vsub.f32 %v5547_v23, %v2590_v50 }
 0x17b   : > { %2414 = vmatpush.msrb.mxu0 %v2218_v32  ;;  %2510 = vmatpush.msrb.mxu2 %v5508_v49  ;;  %v2579_v32 = vsub.f32 %v5511_v52, %v2578_v0 }
 0x17c   : > { %2465 = vmatpush.msrb.mxu1 %v5201_v25  ;;  %v2574_v25 = vand.u32 4294901760, %v2573_v53  ;;  %2569 = vmatpush.msrb.mxu3 %v2568_v46  ;;  %v2592_v46 = vand.u32 4294901760, %v2591_v59 }
 0x17d   : > { %2418 = vmatpush.msrb.mxu0 %v2224_v11  ;;  %2512 = vmatpush.msrb.mxu2 %v5527_v19  ;;  %v2585_v11 = vsub.f32 %v5530_v38, %v2584_v3 }
 0x17e   : > { %2467 = vmatpush.msrb.mxu1 %v5214_v44  ;;  %v2580_v44 = vand.u32 4294901760, %v2579_v32  ;;  %2575 = vmatpush.msrb.mxu3 %v2574_v25  ;;  %v2603_v25 = vsub.f32 %v5573_v41, %v6537_v58 }
 0x17f   : > { %2422 = vmatpush.msrb.mxu0 %v2230_v8  ;;  %2514 = vmatpush.msrb.mxu2 %v5543_v37  ;;  %v2586_v54 = vand.u32 4294901760, %v2585_v11  ;;  %v2597_v8 = vsub.f32 %v5559_v17, %v2596_v5 }
 0x180   : > { %2469 = vmatpush.msrb.mxu1 %v5254_v15  ;;  %v2098_v15 = vld [vmem:[%s6488_s7 + $0x28] sm:$0xff]  ;;  %2581 = vmatpush.msrb.mxu3 %v2580_v44 }
 0x181   : > { %v5570_v7 = vand.u32 4294901760, %v2098_v15  ;;  %2426 = vmatpush.msrb.mxu0 %v2236_v10  ;;  %2516 = vmatpush.msrb.mxu2 %v5556_v62  ;;  %v2598_v48 = vand.u32 4294901760, %v2597_v8  ;;  %v5656_v8 = vand.u32 4294901760, %v2093_v60 }
 0x182   : > { %2471 = vmatpush.msrb.mxu1 %v5283_v34  ;;  %v2097_v34 = vld [vmem:[%s6488_s7 + $0x20] sm:$0xff]  ;;  %2587 = vmatpush.msrb.mxu3 %v2586_v54 }
 0x183   : > { %v5589_v10 = vand.u32 4294901760, %v2097_v34  ;;  %v5592_v53 = vsub.f32 %v2098_v15, %v5570_v7  ;;  %2430 = vmatpush.msrb.mxu0 %v2242_v39  ;;  %2518 = vmatpush.msrb.mxu2 %v5570_v7  ;;  %v2604_v39 = vand.u32 4294901760, %v2603_v25 }
 0x184   : > { %2473 = vmatpush.msrb.mxu1 %v5285_v45  ;;  %v2096_v45 = vld [vmem:[%s6488_s7 + $0x18] sm:$0xff]  ;;  %2593 = vmatpush.msrb.mxu3 %v2592_v46 }
 0x185   : > { %v6536_v32 = vand.u32 4294901760, %v5592_v53  ;;  %v5605_v42 = vand.u32 4294901760, %v2096_v45  ;;  %2434 = vmatpush.msrb.mxu0 %v2248_v18  ;;  %2520 = vmatpush.msrb.mxu2 %v5589_v10  ;;  %v5611_v33 = vsub.f32 %v2097_v34, %v5589_v10 }
 0x186   : > { %2475 = vmatpush.msrb.mxu1 %v5287_v6  ;;  %v2095_v6 = vld [vmem:[%s6488_s7 + $0x10] sm:$0xff]  ;;  %2599 = vmatpush.msrb.mxu3 %v2598_v48 }
 0x187   : > { %v2609_v44 = vsub.f32 %v5592_v53, %v6536_v32  ;;  %v5620_v11 = vand.u32 4294901760, %v2095_v6  ;;  %v5623_v35 = vsub.f32 %v2096_v45, %v5605_v42  ;;  %2438 = vmatpush.msrb.mxu0 %v2254_v51  ;;  %2522 = vmatpush.msrb.mxu2 %v5605_v42  ;;  %v6535_v18 = vand.u32 4294901760, %v5611_v33 }
 0x188   : > { %2477 = vmatpush.msrb.mxu1 %v5294_v43  ;;  %v2094_v43 = vld [vmem:[%s6488_s7 + $0x8] sm:$0xff]  ;;  %2605 = vmatpush.msrb.mxu3 %v2604_v39 }
 0x189   : > { %v2610_v15 = vand.u32 4294901760, %v2609_v44  ;;  %v6534_v54 = vand.u32 4294901760, %v5623_v35  ;;  %v5634_v59 = vand.u32 4294901760, %v2094_v43  ;;  %v5637_v34 = vsub.f32 %v2095_v6, %v5620_v11  ;;  %2442 = vmatpush.msrb.mxu0 %v2260_v12  ;;  %2524 = vmatpush.msrb.mxu2 %v5620_v11 }
 0x18a   : > { %2479 = vmatpush.msrb.mxu1 %v5306_v40  ;;  %v2615_v57 = vsub.f32 %v5611_v33, %v6535_v18 }
 0x18b   : > { %v2621_v40 = vsub.f32 %v5623_v35, %v6534_v54  ;;  %v6533_v51 = vand.u32 4294901760, %v5637_v34  ;;  %2446 = vmatpush.msrb.mxu0 %v2266_v9  ;;  %2611 = vmatpush.msrb.mxu3 %v2610_v15  ;;  %v5668_v9 = vsub.f32 %v2093_v60, %v5656_v8 }
 0x18c   : > { %2481 = vmatpush.msrb.mxu1 %v5310_v2  ;;  %v2616_v12 = vand.u32 4294901760, %v2615_v57  ;;  %2526 = vmatpush.msrb.mxu2 %v5634_v59  ;;  %v5659_v2 = vsub.f32 %v2094_v43, %v5634_v59 }
 0x18d   : > { %v2622_v46 = vand.u32 4294901760, %v2621_v40  ;;  %v2627_v45 = vsub.f32 %v5637_v34, %v6533_v51  ;;  %v6531_v25 = vand.u32 4294901760, %v5668_v9 }
 0x18e   : > { %2483 = vmatpush.msrb.mxu1 %v5381_v47  ;;  %2617 = vmatpush.msrb.mxu3 %v2616_v12  ;;  %v6532_v63 = vand.u32 4294901760, %v5659_v2 }
 0x18f   : > { %2528 = vmatpush.msrb.mxu2 %v5656_v8  ;;  %v2628_v48 = vand.u32 4294901760, %v2627_v45  ;;  %v2639_v39 = vsub.f32 %v5668_v9, %v6531_v25 }
 0x190   : > { %2485 = vmatpush.msrb.mxu1 %v5389_v30  ;;  %2623 = vmatpush.msrb.mxu3 %v2622_v46  ;;  %v2633_v47 = vsub.f32 %v5659_v2, %v6532_v63  ;;  %v1705_v30 = vld [vmem:[%s6487_s6] sm:$0xff] }
 0x191   : > { %v2640_v44 = vand.u32 4294901760, %v2639_v39 }
 0x192   : > { %2487 = vmatpush.msrb.mxu1 %v5401_v31  ;;  %2629 = vmatpush.msrb.mxu3 %v2628_v48  ;;  %v2634_v6 = vand.u32 4294901760, %v2633_v47  ;;  %v1706_v31 = vld [vmem:[%s6487_s6 + $0x8] sm:$0xff] }
 0x194   : > { %2635 = vmatpush.msrb.mxu3 %v2634_v6 }
 0x196   : > { %2641 = vmatpush.msrb.mxu3 %v2640_v44 }
 0x1c4   : > { %v1912_v12 = vpop.f32.mrf.mxu0 }
 0x1c6   : > { %v1956_v47 = vpop.f32.mrf.mxu1 }
 0x1c8   : > { %v1854_v43 = vpop.f32.mrf.mxu3 }
 0x1cc   : > { %v1917_v51 = vpop.f32.mrf.mxu0 }
 0x1d0   : > { %v1745_v15 = vpop.f32.mrf.mxu2  ;;  %v1858_v40 = vpop.f32.mrf.mxu3 }
 0x1d1   : > { %v1746_v57 = vadd.f32 %v1745_v15, %v1705_v30 }
 0x1d3   : > { %v1855_v60 = vadd.f32 %v1854_v43, %v1746_v57  ;;  %v1962_v43 = vpop.f32.mrf.mxu1 }
 0x1d5   : > { %v1913_v48 = vadd.f32 %v1912_v12, %v1855_v60 }
 0x1d7   : > { %v1957_v39 = vadd.f32 %v1956_v47, %v1913_v48 }
 0x1d8   : > { %v1753_v46 = vpop.f32.mrf.mxu2  ;;  %v2072_v44 = vpop.f32.mrf.mxu3 }
 0x1d9   : > { %v1754_v45 = vadd.f32 %v1753_v46, %v1706_v31 }
 0x1db   : > { %v1859_v6 = vadd.f32 %v1858_v40, %v1754_v45  ;;  %v3738_v45 = vld [vmem:[%s6494_s13 + $0x8] sm:$0xff] }
 0x1dd   : > { %v1918_v18 = vadd.f32 %v1917_v51, %v1859_v6 }
 0x1df   : > { %v1963_v15 = vadd.f32 %v1962_v43, %v1918_v18 }
 0x1e0   : > { %v2031_v25 = vpop.f32.mrf.mxu2  ;;  %v2076_v60 = vpop.f32.mrf.mxu3 }
 0x1e1   : > { %v2032_v63 = vadd.f32 %v2031_v25, %v1957_v39 }
 0x1e3   : > { %v2073_v54 = vadd.f32 %v2072_v44, %v2032_v63 }
 0x1e5   : > { %v5685_v30 = vmax.f32 %v2073_v54, 0.0 }
 0x1e7   : > { %v5688_v57 = vand.u32 4294901760, %v5685_v30  ;;  %v2081_v54 = vrot.slane %v5685_v30, 7 }
 0x1e8   : > { %v2035_v32 = vpop.f32.mrf.mxu2 }
 0x1e9   : > { %v2036_v58 = vadd.f32 %v2035_v32, %v1963_v15  ;;  %2271 = vmatmul.f32.vlgmr.msra.gmra.mxu1 %v5688_v57  ;;  %v2158_v40 = vsub.f32 %v5685_v30, %v5688_v57  ;;  %v2879_v15 = vld [vmem:[%s6490_s9 + $0x50] sm:$0xff] }
 0x1ea   : > { %2711 = vmatpush.msra.mxu1 %v5425_v24 }
 0x1eb   : > { %v2077_v25 = vadd.f32 %v2076_v60, %v2036_v58  ;;  %2329 = vmatmul.f32.vlgmr.msra.gmra.mxu2 %v2158_v40  ;;  %v2159_v51 = vand.u32 4294901760, %v2158_v40 }
 0x1ec   : > { %2713 = vmatpush.msra.mxu1 %v5439_v21  ;;  %2758 = vmatpush.msra.mxu2 %v2548_v29 }
 0x1ed   : > { %v5697_v18 = vmax.f32 %v2077_v25, 0.0  ;;  %2373 = vmatmul.f32.vlgmr.msra.gmra.mxu3 %v2159_v51  ;;  %v2160_v32 = vsub.f32 %v2158_v40, %v2159_v51  ;;  %v6592_v40 = vand.u32 4294901760, %v5611_v33  ;;  %v2878_v25 = vld [vmem:[%s6490_s9 + $0x48] sm:$0xff]  ;;  %v6593_v51 = vand.u32 4294901760, %v5623_v35 }
 0x1ee   : > { %2715 = vmatpush.msra.mxu1 %v5448_v14  ;;  %2762 = vmatpush.msra.mxu2 %v2554_v20 }
 0x1ef   : > { %v2082_v58 = vrot.slane %v5697_v18, 7  ;;  %2829 = vmatpush.msra.mxu3 %v5425_v24  ;;  %v2161_v63 = vand.u32 4294901760, %v2160_v32  ;;  %v5706_v12 = vand.u32 4294901760, %v5697_v18  ;;  %v3737_v24 = vld [vmem:[%s6494_s13] sm:$0xff] }
 0x1f0   : > { %2717 = vmatpush.msra.mxu1 %v5464_v36  ;;  %2766 = vmatpush.msra.mxu2 %v2560_v61 }
 0x1f1   : > { %2831 = vmatpush.msra.mxu3 %v5439_v21  ;;  %2162 = vmatmul.f32.vlgmr.msra.gmra.mxu0 %v2161_v63  ;;  %v2166_v29 = vsub.f32 %v5697_v18, %v5706_v12  ;;  %v2084_v20 = vsel %vm501_vm0, %v2082_v58, %v2081_v54  ;;  %v2083_v46 = vsel %vm501_vm0, %v2081_v54, %v2082_v58  ;;  %v5848_v54 = vand.u32 4294901760, %v2879_v15 }
 0x1f2   : > { %2275 = vmatmul.f32.gmra.mxu1 %v5706_v12  ;;  %2653 = vmatpush.msra.mxu0 %v5437_v16  ;;  %v2085_v31 = vmul.f32 %v3737_v24, %v2084_v20  ;;  %v5861_v20 = vand.u32 4294901760, %v2878_v25 }
 0x1f3   : > { %2719 = vmatpush.msra.mxu1 %v5480_v1  ;;  %2770 = vmatpush.msra.mxu2 %v2566_v22  ;;  %v2167_v21 = vand.u32 4294901760, %v2166_v29 }
 0x1f4   : > { %2833 = vmatpush.msra.mxu3 %v5448_v14  ;;  %2334 = vmatmul.f32.gmra.mxu2 %v2166_v29  ;;  %v5725_v61 = vand.u32 4294901760, %v2085_v31 }
 0x1f5   : > { %2656 = vmatpush.msra.mxu0 %v5451_v4  ;;  %2721 = vmatpush.msra.mxu1 %v5494_v56  ;;  %v2168_v16 = vsub.f32 %v2166_v29, %v2167_v21  ;;  %v2086_v4 = vmul.f32 %v3738_v45, %v2083_v46  ;;  %v2876_v46 = vld [vmem:[%s6490_s9 + $0x38] sm:$0xff]  ;;  %v2875_v45 = vld [vmem:[%s6490_s9 + $0x30] sm:$0xff] }
 0x1f6   : > { %2774 = vmatpush.msra.mxu2 %v2572_v28  ;;  %2835 = vmatpush.msra.mxu3 %v5464_v36  ;;  %v5735_v22 = vsub.f32 %v2085_v31, %v5725_v61  ;;  %v2884_v36 = vld [vmem:[%s6490_s9 + $0x78] sm:$0xff]  ;;  %v5872_v31 = vsub.f32 %v2879_v15, %v5848_v54 }
 0x1f7   : > { %2379 = vmatmul.f32.gmra.mxu3 %v2167_v21  ;;  %2659 = vmatpush.msra.mxu0 %v5467_v26  ;;  %v2169_v14 = vand.u32 4294901760, %v2168_v16  ;;  %v5759_v48 = vand.u32 4294901760, %v2884_v36 }
 0x1f8   : > { %2723 = vmatpush.msra.mxu1 %v5508_v49  ;;  %2778 = vmatpush.msra.mxu2 %v2578_v0  ;;  %v2531_v28 = vand.u32 4294901760, %v5735_v22  ;;  %v5757_v0 = vand.u32 4294901760, %v2086_v4 }
 0x1f9   : > { %2837 = vmatpush.msra.mxu3 %v5480_v1  ;;  %2662 = vmatpush.msra.mxu0 %v5483_v13  ;;  %v2883_v1 = vld [vmem:[%s6490_s9 + $0x70] sm:$0xff]  ;;  %v2882_v13 = vld [vmem:[%s6490_s9 + $0x68] sm:$0xff] }
 0x1fa   : > { %2725 = vmatpush.msra.mxu1 %v5527_v19  ;;  %2782 = vmatpush.msra.mxu2 %v2584_v3  ;;  %v2532_v26 = vsub.f32 %v5735_v22, %v2531_v28  ;;  %v5780_v3 = vsub.f32 %v2086_v4, %v5757_v0 }
 0x1fb   : > { %2839 = vmatpush.msra.mxu3 %v5494_v56  ;;  %2170 = vmatmul.f32.gmra.mxu0 %v2169_v14  ;;  %v5774_v56 = vand.u32 4294901760, %v2883_v1  ;;  %v5887_v14 = vsub.f32 %v2878_v25, %v5861_v20 }
 0x1fc   : > { %2489 = vmatmul.f32.vlgmr.msrb.gmra.mxu1 %v5688_v57  ;;  %2665 = vmatpush.msra.mxu0 %v5497_v27  ;;  %v2533_v27 = vand.u32 4294901760, %v2532_v26 }
 0x1fd   : > { %2727 = vmatpush.msra.mxu1 %v5543_v37  ;;  %2786 = vmatpush.msra.mxu2 %v2590_v50  ;;  %v5783_v50 = vsub.f32 %v2884_v36, %v5759_v48  ;;  %v5798_v47 = vsub.f32 %v2883_v1, %v5774_v56  ;;  %v5895_v36 = vand.u32 4294901760, %v2876_v46  ;;  %v2966_v1 = vand.u32 4294901760, %v5872_v31 }
 0x1fe   : > { %2841 = vmatpush.msra.mxu3 %v5508_v49  ;;  %2668 = vmatpush.msra.mxu0 %v5511_v52  ;;  %v5787_v49 = vand.u32 4294901760, %v2882_v13  ;;  %v2881_v52 = vld [vmem:[%s6490_s9 + $0x60] sm:$0xff] }
 0x1ff   : > { %2729 = vmatpush.msra.mxu1 %v5556_v62  ;;  %2790 = vmatpush.msra.mxu2 %v2596_v5  ;;  %v6590_v5 = vand.u32 4294901760, %v5573_v41  ;;  %v2936_v6 = vand.u32 4294901760, %v5783_v50  ;;  %v5806_v39 = vand.u32 4294901760, %v2881_v52 }
 0x200   : > { %2843 = vmatpush.msra.mxu3 %v5527_v19  ;;  %2671 = vmatpush.msra.mxu0 %v5530_v38  ;;  %v2880_v19 = vld [vmem:[%s6490_s9 + $0x58] sm:$0xff]  ;;  %v2539_v38 = vand.u32 4294901760, %v5780_v3  ;;  %v5812_v44 = vsub.f32 %v2882_v13, %v5787_v49 }
 0x201   : > { %2643 = vmatmul.f32.vlgmr.msrb.gmra.mxu3 %v5725_v61  ;;  %2731 = vmatpush.msra.mxu1 %v5570_v7  ;;  %v5816_v43 = vand.u32 4294901760, %v2880_v19 }
 0x202   : > { %2794 = vmatpush.msra.mxu2 %v6590_v5  ;;  %2845 = vmatpush.msra.mxu3 %v5543_v37  ;;  %v6591_v37 = vand.u32 4294901760, %v5592_v53  ;;  %v2948_v60 = vand.u32 4294901760, %v5812_v44  ;;  %v5921_v5 = vsub.f32 %v2876_v46, %v5895_v36 }
 0x203   : > { %2534 = vmatmul.f32.vlgmr.msrb.gmra.mxu2 %v2533_v27  ;;  %2674 = vmatpush.msra.mxu0 %v5547_v23  ;;  %v2942_v23 = vand.u32 4294901760, %v5798_v47  ;;  %v5846_v32 = vsub.f32 %v2880_v19, %v5816_v43  ;;  %v2972_v27 = vand.u32 4294901760, %v5887_v14  ;;  %v2967_v19 = vsub.f32 %v5872_v31, %v2966_v1 }
 0x204   : > { %2733 = vmatpush.msra.mxu1 %v5589_v10  ;;  %2798 = vmatpush.msra.mxu2 %v6591_v37 }
 0x205   : > { %2847 = vmatpush.msra.mxu3 %v5556_v62  ;;  %2448 = vmatmul.f32.vlgmr.msrb.gmra.mxu0 %v5688_v57  ;;  %v2540_v62 = vsub.f32 %v5780_v3, %v2539_v38  ;;  %v2937_v57 = vsub.f32 %v5783_v50, %v2936_v6  ;;  %v2960_v24 = vand.u32 4294901760, %v5846_v32 }
 0x206   : > { %2493 = vmatmul.f32.gmra.mxu1 %v5706_v12  ;;  %2677 = vmatpush.msra.mxu0 %v5559_v17  ;;  %v5834_v17 = vsub.f32 %v2881_v52, %v5806_v39  ;;  %v2873_v52 = vld [vmem:[%s6490_s9 + $0x20] sm:$0xff] }
 0x207   : > { %2735 = vmatpush.msra.mxu1 %v5605_v42  ;;  %2802 = vmatpush.msra.mxu2 %v6592_v40  ;;  %v2541_v58 = vand.u32 4294901760, %v2540_v62  ;;  %v2938_v63 = vand.u32 4294901760, %v2937_v57  ;;  %v2961_v26 = vsub.f32 %v5846_v32, %v2960_v24  ;;  %v5939_v40 = vand.u32 4294901760, %v2873_v52  ;;  %v2871_v57 = vld [vmem:[%s6490_s9 + $0x10] sm:$0xff] }
 0x208   : > { %2849 = vmatpush.msra.mxu3 %v5570_v7  ;;  %2680 = vmatpush.msra.mxu0 %v5573_v41  ;;  %v2943_v7 = vsub.f32 %v5798_v47, %v2942_v23  ;;  %v2877_v41 = vld [vmem:[%s6490_s9 + $0x40] sm:$0xff]  ;;  %v2954_v29 = vand.u32 4294901760, %v5834_v17  ;;  %v2973_v62 = vsub.f32 %v5887_v14, %v2972_v27 }
 0x209   : > { %2737 = vmatpush.msra.mxu1 %v5620_v11  ;;  %2806 = vmatpush.msra.mxu2 %v6593_v51  ;;  %v5874_v21 = vand.u32 4294901760, %v2877_v41 }
 0x20a   : > { %2851 = vmatpush.msra.mxu3 %v5589_v10  ;;  %2683 = vmatpush.msra.mxu0 %v5592_v53  ;;  %v6594_v10 = vand.u32 4294901760, %v5637_v34  ;;  %v2949_v53 = vsub.f32 %v5812_v44, %v2948_v60  ;;  %v2944_v16 = vand.u32 4294901760, %v2943_v7 }
 0x20b   : > { %2647 = vmatmul.f32.gmra.mxu3 %v5757_v0  ;;  %2739 = vmatpush.msra.mxu1 %v5634_v59  ;;  %v5905_v13 = vsub.f32 %v2877_v41, %v5874_v21  ;;  %v2870_v41 = vld [vmem:[%s6490_s9 + $0x8] sm:$0xff] }
 0x20c   : > { %2810 = vmatpush.msra.mxu2 %v6594_v10  ;;  %2853 = vmatpush.msra.mxu3 %v5605_v42  ;;  %v6595_v42 = vand.u32 4294901760, %v5659_v2  ;;  %v2950_v4 = vand.u32 4294901760, %v2949_v53  ;;  %v2974_v10 = vand.u32 4294901760, %v2973_v62  ;;  %v2869_v53 = vld [vmem:[%s6490_s9] sm:$0xff] }
 0x20d   : > { %2542 = vmatmul.f32.gmra.mxu2 %v2541_v58  ;;  %2686 = vmatpush.msra.mxu0 %v5611_v33  ;;  %v2955_v33 = vsub.f32 %v5834_v17, %v2954_v29  ;;  %v2978_v37 = vand.u32 4294901760, %v5905_v13 }
 0x20e   : > { %2741 = vmatpush.msra.mxu1 %v5656_v8  ;;  %2814 = vmatpush.msra.mxu2 %v6595_v42 }
 0x20f   : > { %2855 = vmatpush.msra.mxu3 %v5620_v11  ;;  %2452 = vmatmul.f32.gmra.mxu0 %v5706_v12  ;;  %v6596_v11 = vand.u32 4294901760, %v5668_v9  ;;  %v2874_v12 = vld [vmem:[%s6490_s9 + $0x28] sm:$0xff]  ;;  %v2979_v7 = vsub.f32 %v5905_v13, %v2978_v37 }
 0x210   : > { %2939 = vmatpush.msrb.mxu1 %v2938_v63  ;;  %2689 = vmatpush.msra.mxu0 %v5623_v35  ;;  %v5911_v35 = vand.u32 4294901760, %v2875_v45  ;;  %v5967_v63 = vsub.f32 %v2873_v52, %v5939_v40 }
 0x211   : > { %2745 = vmatmul.f32.vlgmr.msra.gmra.mxu1 %v2531_v28  ;;  %2818 = vmatpush.msra.mxu2 %v6596_v11  ;;  %v2956_v28 = vand.u32 4294901760, %v2955_v33  ;;  %v2980_v33 = vand.u32 4294901760, %v2979_v7  ;;  %v5998_v11 = vand.u32 4294901760, %v2869_v53 }
 0x212   : > { %2857 = vmatpush.msra.mxu3 %v5634_v59  ;;  %2945 = vmatpush.msrb.mxu1 %v2944_v16  ;;  %v5923_v59 = vand.u32 4294901760, %v2874_v12  ;;  %v5937_v15 = vsub.f32 %v2875_v45, %v5911_v35  ;;  %v3002_v45 = vand.u32 4294901760, %v5967_v63 }
 0x213   : > { %3041 = vmatpush.msrb.mxu2 %v5783_v50  ;;  %2692 = vmatpush.msra.mxu0 %v5637_v34  ;;  %v2962_v34 = vand.u32 4294901760, %v2961_v26  ;;  %v2088_v26 = vrot.slane %v5697_v18, 1 }
 0x214   : > { %2859 = vmatpush.msra.mxu3 %v5656_v8  ;;  %2951 = vmatpush.msrb.mxu1 %v2950_v4  ;;  %v2872_v8 = vld [vmem:[%s6490_s9 + $0x18] sm:$0xff]  ;;  %v5952_v25 = vsub.f32 %v2874_v12, %v5923_v59  ;;  %v2990_v58 = vand.u32 4294901760, %v5937_v15 }
 0x215   : > { %3044 = vmatpush.msrb.mxu2 %v5798_v47  ;;  %2695 = vmatpush.msra.mxu0 %v5659_v2  ;;  %v2984_v2 = vand.u32 4294901760, %v5921_v5  ;;  %v5954_v51 = vand.u32 4294901760, %v2872_v8 }
 0x216   : > { %3099 = vmatpush.msrb.mxu3 %v5759_v48  ;;  %2820 = vmatmul.f32.vlgmr.msra.gmra.mxu2 %v5725_v61  ;;  %v2996_v42 = vand.u32 4294901760, %v5952_v25 }
 0x217   : > { %2861 = vmatmul.f32.vlgmr.msra.gmra.mxu3 %v5725_v61  ;;  %2957 = vmatpush.msrb.mxu1 %v2956_v28  ;;  %v2968_v61 = vand.u32 4294901760, %v2967_v19  ;;  %v2985_v46 = vsub.f32 %v5921_v5, %v2984_v2  ;;  %v5984_v16 = vsub.f32 %v2872_v8, %v5954_v51  ;;  %v2087_v19 = vrot.slane %v5685_v30, 1 }
 0x218   : > { %3047 = vmatpush.msrb.mxu2 %v5812_v44  ;;  %3101 = vmatpush.msrb.mxu3 %v5774_v56  ;;  %v2997_v28 = vsub.f32 %v5952_v25, %v2996_v42  ;;  %v3003_v8 = vsub.f32 %v5967_v63, %v3002_v45  ;;  %v3279_v44 = vld [vmem:[%s6492_s11 + $0x70] sm:$0xff] }
 0x219   : > { %2698 = vmatpush.msra.mxu0 %v5668_v9  ;;  %2963 = vmatpush.msrb.mxu1 %v2962_v34  ;;  %v5969_v9 = vand.u32 4294901760, %v2871_v57  ;;  %v2986_v12 = vand.u32 4294901760, %v2985_v46  ;;  %v3008_v52 = vand.u32 4294901760, %v5984_v16  ;;  %v2089_v7 = vsel %vm510_vm1, %v2087_v19, %v2088_v26  ;;  %v3739_v46 = vld [vmem:[%s6495_s14] sm:$0xff] }
 0x21a   : > { %3050 = vmatpush.msrb.mxu2 %v5834_v17  ;;  %3103 = vmatpush.msrb.mxu3 %v5787_v49  ;;  %v2998_v30 = vand.u32 4294901760, %v2997_v28  ;;  %v3278_v17 = vld [vmem:[%s6492_s11 + $0x68] sm:$0xff] }
 0x21b   : > { %2886 = vmatpush.msrb.mxu0 %v5759_v48  ;;  %2751 = vmatmul.f32.gmra.mxu1 %v2539_v38  ;;  %v2991_v38 = vsub.f32 %v5937_v15, %v2990_v58  ;;  %v5996_v4 = vsub.f32 %v2871_v57, %v5969_v9  ;;  %v6020_v57 = vsub.f32 %v2869_v53, %v5998_v11 }
 0x21c   : > { %2701 = vmatmul.f32.vlgmr.msra.gmra.mxu0 %v5735_v22  ;;  %v5986_v22 = vand.u32 4294901760, %v2870_v41  ;;  %2969 = vmatpush.msrb.mxu1 %v2968_v61 }
 0x21d   : > { %2888 = vmatpush.msrb.mxu0 %v5774_v56  ;;  %3053 = vmatpush.msrb.mxu2 %v5846_v32  ;;  %v2992_v18 = vand.u32 4294901760, %v2991_v38  ;;  %v3014_v62 = vand.u32 4294901760, %v5996_v4  ;;  %v3026_v53 = vand.u32 4294901760, %v6020_v57 }
 0x21e   : > { %3105 = vmatpush.msrb.mxu3 %v5806_v39  ;;  %2975 = vmatpush.msrb.mxu1 %v2974_v10  ;;  %v6009_v34 = vsub.f32 %v2870_v41, %v5986_v22  ;;  %v3004_v41 = vand.u32 4294901760, %v3003_v8 }
 0x21f   : > { %2890 = vmatpush.msrb.mxu0 %v5787_v49  ;;  %3056 = vmatpush.msrb.mxu2 %v5872_v31  ;;  %v3015_v10 = vsub.f32 %v5996_v4, %v3014_v62  ;;  %v3027_v28 = vsub.f32 %v6020_v57, %v3026_v53 }
 0x220   : > { %3107 = vmatpush.msrb.mxu3 %v5816_v43  ;;  %2824 = vmatmul.f32.gmra.mxu2 %v5757_v0  ;;  %v3020_v61 = vand.u32 4294901760, %v6009_v34 }
 0x221   : > { %2865 = vmatmul.f32.gmra.mxu3 %v5757_v0  ;;  %2892 = vmatpush.msrb.mxu0 %v5806_v39  ;;  %v3009_v0 = vsub.f32 %v5984_v16, %v3008_v52 }
 0x222   : > { %2981 = vmatpush.msrb.mxu1 %v2980_v33  ;;  %3059 = vmatpush.msrb.mxu2 %v5887_v14  ;;  %v2091_v33 = vmul.f32 %v3739_v46, %v2089_v7  ;;  %v3021_v38 = vsub.f32 %v6009_v34, %v3020_v61  ;;  %v3276_v14 = vld [vmem:[%s6492_s11 + $0x58] sm:$0xff] }
 0x223   : > { %3109 = vmatpush.msrb.mxu3 %v5848_v54  ;;  %2894 = vmatpush.msrb.mxu0 %v5816_v43 }
 0x224   : > { %2987 = vmatpush.msrb.mxu1 %v2986_v12  ;;  %3062 = vmatpush.msrb.mxu2 %v5905_v13  ;;  %v3016_v12 = vand.u32 4294901760, %v3015_v10  ;;  %v3022_v8 = vand.u32 4294901760, %v3021_v38 }
 0x225   : > { %3111 = vmatpush.msrb.mxu3 %v5861_v20  ;;  %2706 = vmatmul.f32.gmra.mxu0 %v5780_v3  ;;  %v3010_v3 = vand.u32 4294901760, %v3009_v0  ;;  %v3028_v0 = vand.u32 4294901760, %v3027_v28 }
 0x226   : > { %2896 = vmatpush.msrb.mxu0 %v5848_v54  ;;  %2993 = vmatpush.msrb.mxu1 %v2992_v18  ;;  %v6055_v18 = vand.u32 4294901760, %v2091_v33 }
 0x227   : > { %3065 = vmatpush.msrb.mxu2 %v5921_v5  ;;  %3113 = vmatpush.msrb.mxu3 %v5874_v21 }
 0x228   : > { %2898 = vmatpush.msrb.mxu0 %v5861_v20  ;;  %2999 = vmatpush.msrb.mxu1 %v2998_v30  ;;  %v2090_v30 = vsel %vm510_vm1, %v2088_v26, %v2087_v19  ;;  %v2918_v7 = vsub.f32 %v2091_v33, %v6055_v18 }
 0x229   : > { %3068 = vmatpush.msrb.mxu2 %v5937_v15  ;;  %3115 = vmatpush.msrb.mxu3 %v5895_v36 }
 0x22a   : > { %2900 = vmatpush.msrb.mxu0 %v5874_v21  ;;  %3005 = vmatpush.msrb.mxu1 %v3004_v41  ;;  %v3740_v41 = vld [vmem:[%s6495_s14 + $0x8] sm:$0xff]  ;;  %v2919_v26 = vand.u32 4294901760, %v2918_v7 }
 0x22b   : > { %3071 = vmatpush.msrb.mxu2 %v5952_v25  ;;  %3117 = vmatpush.msrb.mxu3 %v5911_v35  ;;  %v2092_v55 = vmul.f32 %v3740_v41, %v2090_v30 }
 0x22c   : > { %2902 = vmatpush.msrb.mxu0 %v5895_v36  ;;  %3011 = vmatpush.msrb.mxu1 %v3010_v3  ;;  %v2920_v10 = vsub.f32 %v2918_v7, %v2919_v26 }
 0x22d   : > { %3074 = vmatpush.msrb.mxu2 %v5967_v63  ;;  %3119 = vmatpush.msrb.mxu3 %v5923_v59  ;;  %v2925_v19 = vand.u32 4294901760, %v2092_v55  ;;  %v3274_v63 = vld [vmem:[%s6492_s11 + $0x48] sm:$0xff] }
 0x22e   : > { %2904 = vmatpush.msrb.mxu0 %v5911_v35  ;;  %3017 = vmatpush.msrb.mxu1 %v3016_v12 }
 0x22f   : > { %3077 = vmatpush.msrb.mxu2 %v5984_v16  ;;  %3121 = vmatpush.msrb.mxu3 %v5939_v40  ;;  %v2926_v46 = vsub.f32 %v2092_v55, %v2925_v19  ;;  %v6221_v16 = vand.u32 4294901760, %v3274_v63 }
 0x230   : > { %2906 = vmatpush.msrb.mxu0 %v5923_v59  ;;  %3023 = vmatpush.msrb.mxu1 %v3022_v8  ;;  %v3271_v8 = vld [vmem:[%s6492_s11 + $0x30] sm:$0xff] }
 0x231   : > { %3080 = vmatpush.msrb.mxu2 %v5996_v4  ;;  %3123 = vmatpush.msrb.mxu3 %v5954_v51  ;;  %v2927_v33 = vand.u32 4294901760, %v2926_v46  ;;  %v6273_v55 = vand.u32 4294901760, %v3271_v8 }
 0x232   : > { %2908 = vmatpush.msrb.mxu0 %v5939_v40  ;;  %3029 = vmatpush.msrb.mxu1 %v3028_v0 }
 0x233   : > { %3083 = vmatpush.msrb.mxu2 %v6009_v34  ;;  %3125 = vmatpush.msrb.mxu3 %v5969_v9  ;;  %v6235_v34 = vsub.f32 %v3274_v63, %v6221_v16 }
 0x234   : > { %3031 = vmatmul.f32.vlgmr.msrb.gmra.mxu1 %v6055_v18  ;;  %2910 = vmatpush.msrb.mxu0 %v5954_v51 }
 0x235   : > { %3217 = vmatpush.msra.mxu1 %v5759_v48  ;;  %3086 = vmatpush.msrb.mxu2 %v6020_v57  ;;  %v2921_v48 = vand.u32 4294901760, %v2920_v10  ;;  %v3370_v3 = vand.u32 4294901760, %v6235_v34  ;;  %v3270_v10 = vld [vmem:[%s6492_s11 + $0x28] sm:$0xff] }
 0x236   : > { %3127 = vmatpush.msrb.mxu3 %v5986_v22  ;;  %3089 = vmatmul.f32.vlgmr.msrb.gmra.mxu2 %v2918_v7 }
 0x237   : > { %3219 = vmatpush.msra.mxu1 %v5774_v56  ;;  %2912 = vmatpush.msrb.mxu0 %v5969_v9  ;;  %v2928_v56 = vsub.f32 %v2926_v46, %v2927_v33  ;;  %v3371_v0 = vsub.f32 %v6235_v34, %v3370_v3 }
 0x238   : > { %3129 = vmatpush.msrb.mxu3 %v5998_v11 }
 0x239   : > { %3133 = vmatmul.f32.vlgmr.msrb.gmra.mxu3 %v2919_v26  ;;  %3221 = vmatpush.msra.mxu1 %v5787_v49  ;;  %v2929_v49 = vand.u32 4294901760, %v2928_v56 }
 0x23a   : > { %2914 = vmatpush.msrb.mxu0 %v5986_v22 }
 0x23b   : > { %3223 = vmatpush.msra.mxu1 %v5806_v39 }
 0x23c   : > { %2916 = vmatpush.msrb.mxu0 %v5998_v11  ;;  %3035 = vmatmul.f32.gmra.mxu1 %v2925_v19 }
 0x23d   : > { %2922 = vmatmul.f32.vlgmr.msrb.gmra.mxu0 %v2921_v48  ;;  %3225 = vmatpush.msra.mxu1 %v5816_v43 }
 0x23e   : > { %3146 = vmatpush.msra.mxu0 %v2936_v6  ;;  %3094 = vmatmul.f32.gmra.mxu2 %v2926_v46  ;;  %v3280_v6 = vld [vmem:[%s6492_s11 + $0x78] sm:$0xff]  ;;  %v3372_v46 = vand.u32 4294901760, %v3371_v0 }
 0x23f   : > { %3227 = vmatpush.msra.mxu1 %v5848_v54  ;;  %v6140_v39 = vand.u32 4294901760, %v3280_v6  ;;  %v6159_v54 = vand.u32 4294901760, %v3278_v17 }
 0x240   : > { %3150 = vmatpush.msra.mxu0 %v2942_v23  ;;  %v6148_v23 = vand.u32 4294901760, %v3279_v44 }
 0x241   : > { %3139 = vmatmul.f32.gmra.mxu3 %v2927_v33  ;;  %3229 = vmatpush.msra.mxu1 %v5861_v20  ;;  %v6146_v43 = vsub.f32 %v3280_v6, %v6140_v39  ;;  %v6172_v31 = vsub.f32 %v3278_v17, %v6159_v54  ;;  %v6293_v6 = vand.u32 4294901760, %v3270_v10 }
 0x242   : > { %3154 = vmatpush.msra.mxu0 %v2948_v60  ;;  %3284 = vmatpush.msra.mxu2 %v6140_v39  ;;  %v6157_v32 = vsub.f32 %v3279_v44, %v6148_v23  ;;  %v3269_v44 = vld [vmem:[%s6492_s11 + $0x20] sm:$0xff] }
 0x243   : > { %3231 = vmatpush.msra.mxu1 %v5874_v21  ;;  %v3334_v60 = vand.u32 4294901760, %v6146_v43 }
 0x244   : > { %3158 = vmatpush.msra.mxu0 %v2954_v29  ;;  %3286 = vmatpush.msra.mxu2 %v6148_v23  ;;  %v3277_v29 = vld [vmem:[%s6492_s11 + $0x60] sm:$0xff] }
 0x245   : > { %2930 = vmatmul.f32.gmra.mxu0 %v2929_v49  ;;  %3233 = vmatpush.msra.mxu1 %v5895_v36  ;;  %v3335_v20 = vsub.f32 %v6146_v43, %v3334_v60  ;;  %v6174_v21 = vand.u32 4294901760, %v3277_v29  ;;  %v6291_v49 = vsub.f32 %v3271_v8, %v6273_v55  ;;  %v3266_v8 = vld [vmem:[%s6492_s11 + $0x8] sm:$0xff] }
 0x246   : > { %3162 = vmatpush.msra.mxu0 %v2960_v24  ;;  %v3340_v24 = vand.u32 4294901760, %v6157_v32  ;;  %3288 = vmatpush.msra.mxu2 %v6159_v54 }
 0x247   : > { %3235 = vmatpush.msra.mxu1 %v5911_v35  ;;  %v3346_v35 = vand.u32 4294901760, %v6172_v31 }
 0x248   : > { %3166 = vmatpush.msra.mxu0 %v2966_v1  ;;  %v3336_v1 = vand.u32 4294901760, %v3335_v20  ;;  %v3341_v13 = vsub.f32 %v6157_v32, %v3340_v24  ;;  %3290 = vmatpush.msra.mxu2 %v6174_v21  ;;  %v6302_v20 = vand.u32 4294901760, %v3269_v44 }
 0x249   : > { %3237 = vmatpush.msra.mxu1 %v5923_v59  ;;  %v6195_v59 = vand.u32 4294901760, %v3276_v14 }
 0x24a   : > { %3170 = vmatpush.msra.mxu0 %v2972_v27  ;;  %v6189_v27 = vsub.f32 %v3277_v29, %v6174_v21  ;;  %3337 = vmatpush.msra.mxu3 %v3336_v1  ;;  %v3342_v15 = vand.u32 4294901760, %v3341_v13  ;;  %v3388_v1 = vand.u32 4294901760, %v6291_v49  ;;  %v6310_v13 = vsub.f32 %v3270_v10, %v6293_v6 }
 0x24b   : > { %3239 = vmatpush.msra.mxu1 %v5939_v40  ;;  %v3347_v40 = vsub.f32 %v6172_v31, %v3346_v35  ;;  %3292 = vmatpush.msra.mxu2 %v6195_v59 }
 0x24c   : > { %3174 = vmatpush.msra.mxu0 %v2978_v37  ;;  %v3275_v37 = vld [vmem:[%s6492_s11 + $0x50] sm:$0xff]  ;;  %3343 = vmatpush.msra.mxu3 %v3342_v15 }
 0x24d   : > { %3241 = vmatpush.msra.mxu1 %v5954_v51  ;;  %v6209_v51 = vsub.f32 %v3276_v14, %v6195_v59 }
 0x24e   : > { %3178 = vmatpush.msra.mxu0 %v2984_v2  ;;  %v3352_v2 = vand.u32 4294901760, %v6189_v27 }
 0x24f   : > { %3243 = vmatpush.msra.mxu1 %v5969_v9  ;;  %v3348_v9 = vand.u32 4294901760, %v3347_v40  ;;  %v6317_v40 = vsub.f32 %v3269_v44, %v6302_v20 }
 0x250   : > { %3182 = vmatpush.msra.mxu0 %v2990_v58  ;;  %v6211_v58 = vand.u32 4294901760, %v3275_v37 }
 0x251   : > { %3245 = vmatpush.msra.mxu1 %v5986_v22  ;;  %3349 = vmatpush.msra.mxu3 %v3348_v9  ;;  %v3389_v9 = vsub.f32 %v6291_v49, %v3388_v1 }
 0x252   : > { %3186 = vmatpush.msra.mxu0 %v2996_v42  ;;  %v3353_v42 = vsub.f32 %v6189_v27, %v3352_v2  ;;  %v6227_v4 = vsub.f32 %v3275_v37, %v6211_v58  ;;  %3294 = vmatpush.msra.mxu2 %v6211_v58  ;;  %v3268_v37 = vld [vmem:[%s6492_s11 + $0x18] sm:$0xff] }
 0x253   : > { %3247 = vmatpush.msra.mxu1 %v5998_v11  ;;  %v3273_v11 = vld [vmem:[%s6492_s11 + $0x40] sm:$0xff]  ;;  %v6319_v63 = vand.u32 4294901760, %v3268_v37 }
 0x254   : > { %3190 = vmatpush.msra.mxu0 %v3002_v45  ;;  %3249 = vmatmul.f32.vlgmr.msra.gmra.mxu1 %v6055_v18  ;;  %v3358_v45 = vand.u32 4294901760, %v6209_v51 }
 0x255   : > { %3497 = vmatpush.msrb.mxu1 %v6140_v39  ;;  %3296 = vmatpush.msra.mxu2 %v6221_v16 }
 0x256   : > { %3194 = vmatpush.msra.mxu0 %v3008_v52  ;;  %v3354_v52 = vand.u32 4294901760, %v3353_v42  ;;  %v3359_v57 = vsub.f32 %v6209_v51, %v3358_v45  ;;  %v6540_v42 = vand.u32 4294901760, %v6310_v13 }
 0x257   : > { %3499 = vmatpush.msrb.mxu1 %v6148_v23 }
 0x258   : > { %3198 = vmatpush.msra.mxu0 %v3014_v62  ;;  %v6237_v62 = vand.u32 4294901760, %v3273_v11  ;;  %3355 = vmatpush.msra.mxu3 %v3354_v52  ;;  %v3360_v28 = vand.u32 4294901760, %v3359_v57  ;;  %v6538_v52 = vand.u32 4294901760, %v6317_v40  ;;  %v6333_v57 = vsub.f32 %v3268_v37, %v6319_v63  ;;  %v3265_v37 = vld [vmem:[%s6492_s11] sm:$0xff] }
 0x259   : > { %3501 = vmatpush.msrb.mxu1 %v6159_v54 }
 0x25a   : > { %3202 = vmatpush.msra.mxu0 %v3020_v61  ;;  %v3364_v61 = vand.u32 4294901760, %v6227_v4  ;;  %v6251_v38 = vsub.f32 %v3273_v11, %v6237_v62  ;;  %3298 = vmatpush.msra.mxu2 %v6237_v62  ;;  %v3267_v11 = vld [vmem:[%s6492_s11 + $0x10] sm:$0xff]  ;;  %v6539_v10 = vand.u32 4294901760, %v6333_v57 }
 0x25b   : > { %3503 = vmatpush.msrb.mxu1 %v6174_v21  ;;  %3361 = vmatpush.msra.mxu3 %v3360_v28  ;;  %v3390_v28 = vand.u32 4294901760, %v3389_v9 }
 0x25c   : > { %3206 = vmatpush.msra.mxu0 %v3026_v53  ;;  %3253 = vmatmul.f32.gmra.mxu1 %v2925_v19  ;;  %v3272_v53 = vld [vmem:[%s6492_s11 + $0x38] sm:$0xff]  ;;  %v3376_v7 = vand.u32 4294901760, %v6251_v38  ;;  %v3407_v9 = vsub.f32 %v6333_v57, %v6539_v10 }
 0x25d   : > { %3208 = vmatmul.f32.vlgmr.msra.gmra.mxu0 %v6055_v18  ;;  %3505 = vmatpush.msrb.mxu1 %v6195_v59  ;;  %v6253_v12 = vand.u32 4294901760, %v3272_v53  ;;  %v3365_v18 = vsub.f32 %v6227_v4, %v3364_v61 }
 0x25e   : > { %3439 = vmatpush.msrb.mxu0 %v6146_v43  ;;  %v3377_v48 = vsub.f32 %v6251_v38, %v3376_v7 }
 0x25f   : > { %3507 = vmatpush.msrb.mxu1 %v6211_v58  ;;  %v6271_v41 = vsub.f32 %v3272_v53, %v6253_v12  ;;  %3300 = vmatpush.msra.mxu2 %v6253_v12  ;;  %v6335_v53 = vand.u32 4294901760, %v3267_v11 }
 0x260   : > { %3442 = vmatpush.msrb.mxu0 %v6157_v32  ;;  %v3378_v17 = vand.u32 4294901760, %v3377_v48  ;;  %v6355_v48 = vand.u32 4294901760, %v3266_v8 }
 0x261   : > { %3509 = vmatpush.msrb.mxu1 %v6221_v16  ;;  %v3382_v33 = vand.u32 4294901760, %v6271_v41  ;;  %3302 = vmatpush.msra.mxu2 %v6273_v55 }
 0x262   : > { %3445 = vmatpush.msrb.mxu0 %v6172_v31 }
 0x263   : > { %3511 = vmatpush.msrb.mxu1 %v6237_v62  ;;  %v3383_v29 = vsub.f32 %v6271_v41, %v3382_v33  ;;  %3304 = vmatpush.msra.mxu2 %v6293_v6 }
 0x264   : > { %3448 = vmatpush.msrb.mxu0 %v6189_v27 }
 0x265   : > { %3212 = vmatmul.f32.gmra.mxu0 %v2925_v19  ;;  %v3366_v19 = vand.u32 4294901760, %v3365_v18  ;;  %3513 = vmatpush.msrb.mxu1 %v6253_v12  ;;  %v3384_v15 = vand.u32 4294901760, %v3383_v29  ;;  %v3395_v18 = vsub.f32 %v6310_v13, %v6540_v42 }
 0x266   : > { %v6133_v50 = vpop.f32.mrf.mxu1  ;;  %3451 = vmatpush.msrb.mxu0 %v6209_v51  ;;  %3306 = vmatpush.msra.mxu2 %v6302_v20 }
 0x267   : > { %3367 = vmatpush.msra.mxu3 %v3366_v19  ;;  %3515 = vmatpush.msrb.mxu1 %v6273_v55  ;;  %v3401_v19 = vsub.f32 %v6317_v40, %v6538_v52  ;;  %v3396_v29 = vand.u32 4294901760, %v3395_v18  ;;  %v6372_v52 = vsub.f32 %v3266_v8, %v6355_v48  ;;  %v3408_v18 = vand.u32 4294901760, %v3407_v9 }
 0x268   : > { %3454 = vmatpush.msrb.mxu0 %v6227_v4  ;;  %3308 = vmatpush.msra.mxu2 %v6319_v63 }
 0x269   : > { %3373 = vmatpush.msra.mxu3 %v3372_v46  ;;  %3517 = vmatpush.msrb.mxu1 %v6293_v6  ;;  %v6353_v46 = vsub.f32 %v3267_v11, %v6335_v53  ;;  %v3418_v10 = vand.u32 4294901760, %v6372_v52 }
 0x26a   : > { %3457 = vmatpush.msrb.mxu0 %v6235_v34  ;;  %3310 = vmatpush.msra.mxu2 %v6335_v53 }
 0x26b   : > { %3379 = vmatpush.msra.mxu3 %v3378_v17  ;;  %3519 = vmatpush.msrb.mxu1 %v6302_v20  ;;  %v6541_v11 = vand.u32 4294901760, %v6353_v46  ;;  %v3419_v9 = vsub.f32 %v6372_v52, %v3418_v10  ;;  %v6600_v4 = vand.u32 4294901760, %v6353_v46 }
 0x26c   : > { %3460 = vmatpush.msrb.mxu0 %v6251_v38  ;;  %3312 = vmatpush.msra.mxu2 %v6355_v48 }
 0x26d   : > { %3385 = vmatpush.msra.mxu3 %v3384_v15  ;;  %3521 = vmatpush.msrb.mxu1 %v6319_v63  ;;  %v3402_v15 = vand.u32 4294901760, %v3401_v19  ;;  %v3413_v19 = vsub.f32 %v6353_v46, %v6541_v11 }
 0x26e   : > { %v6135_v47 = vpop.f32.mrf.mxu0  ;;  %v6206_v25 = vpop.f32.mrf.mxu2  ;;  %3463 = vmatpush.msrb.mxu0 %v6271_v41 }
 0x26f   : > { %v6182_v36 = vpop.f32.mrf.mxu1  ;;  %3391 = vmatpush.msra.mxu3 %v3390_v28  ;;  %3523 = vmatpush.msrb.mxu1 %v6335_v53  ;;  %v6376_v28 = vand.u32 4294901760, %v3265_v37  ;;  %v3414_v42 = vand.u32 4294901760, %v3413_v19  ;;  %v2273_v32 = vadd.f32 %v6133_v50, %v6135_v47 }
 0x270   : > { %v6223_v22 = vpop.f32.mrf.mxu3  ;;  %3466 = vmatpush.msrb.mxu0 %v6291_v49 }
 0x271   : > { %3397 = vmatpush.msra.mxu3 %v3396_v29  ;;  %3525 = vmatpush.msrb.mxu1 %v6355_v48  ;;  %v6388_v29 = vsub.f32 %v3265_v37, %v6376_v28  ;;  %v2331_v31 = vadd.f32 %v6206_v25, %v2273_v32 }
 0x272   : > { %3469 = vmatpush.msrb.mxu0 %v6310_v13  ;;  %3314 = vmatpush.msra.mxu2 %v6376_v28 }
 0x273   : > { %3403 = vmatpush.msra.mxu3 %v3402_v15  ;;  %v3424_v11 = vand.u32 4294901760, %v6388_v29  ;;  %3527 = vmatpush.msrb.mxu1 %v6376_v28  ;;  %v3420_v15 = vand.u32 4294901760, %v3419_v9 }
 0x274   : > { %3472 = vmatpush.msrb.mxu0 %v6317_v40  ;;  %3544 = vmatpush.msrb.mxu2 %v3334_v60 }
 0x275   : > { %3409 = vmatpush.msra.mxu3 %v3408_v18  ;;  %v3425_v37 = vsub.f32 %v6388_v29, %v3424_v11 }
 0x276   : > { %3475 = vmatpush.msrb.mxu0 %v6333_v57  ;;  %3548 = vmatpush.msrb.mxu2 %v3340_v24 }
 0x277   : > { %v6288_v56 = vpop.f32.mrf.mxu2  ;;  %3415 = vmatpush.msra.mxu3 %v3414_v42  ;;  %v3426_v18 = vand.u32 4294901760, %v3425_v37 }
 0x278   : > { %v6193_v5 = vpop.f32.mrf.mxu0  ;;  %3478 = vmatpush.msrb.mxu0 %v6353_v46  ;;  %3552 = vmatpush.msrb.mxu2 %v3346_v35 }
 0x279   : > { %v6264_v30 = vpop.f32.mrf.mxu1  ;;  %3421 = vmatpush.msra.mxu3 %v3420_v15 }
 0x27a   : > { %v6306_v14 = vpop.f32.mrf.mxu3  ;;  %3481 = vmatpush.msrb.mxu0 %v6372_v52  ;;  %3556 = vmatpush.msrb.mxu2 %v3352_v2  ;;  %v6597_v2 = vand.u32 4294901760, %v6310_v13 }
 0x27b   : > { %3427 = vmatpush.msra.mxu3 %v3426_v18 }
 0x27c   : > { %3484 = vmatpush.msrb.mxu0 %v6388_v29  ;;  %3560 = vmatpush.msrb.mxu2 %v3358_v45 }
 0x27d   : > { %3615 = vmatpush.msrb.mxu3 %v6140_v39  ;;  %v2375_v39 = vadd.f32 %v6223_v22, %v2331_v31 }
 0x27e   : > { %3564 = vmatpush.msrb.mxu2 %v3364_v61 }
 0x27f   : > { %3617 = vmatpush.msrb.mxu3 %v6148_v23  ;;  %v2277_v23 = vadd.f32 %v6182_v36, %v6193_v5 }
 0x280   : > { %3568 = vmatpush.msrb.mxu2 %v3370_v3 }
 0x281   : > { %3619 = vmatpush.msrb.mxu3 %v6159_v54  ;;  %v2336_v27 = vadd.f32 %v6288_v56, %v2277_v23 }
 0x282   : > { %v6276_v26 = vpop.f32.mrf.mxu0  ;;  %3572 = vmatpush.msrb.mxu2 %v3376_v7 }
 0x283   : > { %v6346_v0 = vpop.f32.mrf.mxu1  ;;  %3621 = vmatpush.msrb.mxu3 %v6174_v21  ;;  %v2450_v54 = vadd.f32 %v6276_v26, %v2375_v39  ;;  %v2381_v51 = vadd.f32 %v6306_v14, %v2336_v27  ;;  %v3281_v27 = vld [vmem:[%s6493_s12] sm:$0xff] }
 0x284   : > { %v6385_v8 = vpop.f32.mrf.mxu3  ;;  %3576 = vmatpush.msrb.mxu2 %v3382_v33 }
 0x285   : > { %3623 = vmatpush.msrb.mxu3 %v6195_v59  ;;  %v2491_v36 = vadd.f32 %v6264_v30, %v2450_v54  ;;  %v6598_v59 = vand.u32 4294901760, %v6317_v40 }
 0x286   : > { %v6359_v44 = vpop.f32.mrf.mxu2  ;;  %3580 = vmatpush.msrb.mxu2 %v3388_v1 }
 0x287   : > { %3625 = vmatpush.msrb.mxu3 %v6211_v58  ;;  %v6599_v58 = vand.u32 4294901760, %v6333_v57  ;;  %v2536_v22 = vadd.f32 %v6359_v44, %v2491_v36 }
 0x288   : > { %3584 = vmatpush.msrb.mxu2 %v6597_v2 }
 0x289   : > { %3627 = vmatpush.msrb.mxu3 %v6221_v16  ;;  %v2645_v61 = vadd.f32 %v6385_v8, %v2536_v22 }
 0x28a   : > { %3588 = vmatpush.msrb.mxu2 %v6598_v59 }
 0x28b   : > { %3629 = vmatpush.msrb.mxu3 %v6237_v62 }
 0x28c   : > { %v6361_v17 = vpop.f32.mrf.mxu0  ;;  %3592 = vmatpush.msrb.mxu2 %v6599_v58 }
 0x28d   : > { %3631 = vmatpush.msrb.mxu3 %v6253_v12  ;;  %v2454_v45 = vadd.f32 %v6361_v17, %v2381_v51  ;;  %v3282_v51 = vld [vmem:[%s6493_s12 + $0x8] sm:$0xff] }
 0x28e   : > { %v2746_v19 = vpop.f32.mrf.mxu1  ;;  %v2648_v24 = vpop.f32.mrf.mxu3  ;;  %3596 = vmatpush.msrb.mxu2 %v6600_v4 }
 0x28f   : > { %3633 = vmatpush.msrb.mxu3 %v6273_v55  ;;  %v2495_v62 = vadd.f32 %v6346_v0, %v2454_v45  ;;  %v3259_v0 = vld [vmem:[%s6491_s10] sm:$0xff] }
 0x290   : > { %v2543_v43 = vpop.f32.mrf.mxu2  ;;  %3600 = vmatpush.msrb.mxu2 %v3418_v10 }
 0x291   : > { %3635 = vmatpush.msrb.mxu3 %v6293_v6  ;;  %v2544_v41 = vadd.f32 %v2543_v43, %v2495_v62 }
 0x292   : > { %3604 = vmatpush.msrb.mxu2 %v3424_v11 }
 0x293   : > { %3637 = vmatpush.msrb.mxu3 %v6302_v20  ;;  %v2649_v56 = vadd.f32 %v2648_v24, %v2544_v41 }
 0x295   : > { %3639 = vmatpush.msrb.mxu3 %v6319_v63 }
 0x297   : > { %3641 = vmatpush.msrb.mxu3 %v6335_v53 }
 0x298   : > { %v2752_v35 = vpop.f32.mrf.mxu1 }
 0x299   : > { %v2702_v60 = vpop.f32.mrf.mxu0  ;;  %v2821_v50 = vpop.f32.mrf.mxu2  ;;  %3643 = vmatpush.msrb.mxu3 %v6355_v48 }
 0x29a   : > { %v2862_v21 = vpop.f32.mrf.mxu3  ;;  %v2703_v3 = vadd.f32 %v2702_v60, %v2645_v61 }
 0x29b   : > { %3645 = vmatpush.msrb.mxu3 %v6376_v28 }
 0x29c   : > { %v2747_v55 = vadd.f32 %v2746_v19, %v2703_v3  ;;  %v3260_v19 = vld [vmem:[%s6491_s10 + $0x8] sm:$0xff] }
 0x29e   : > { %v2822_v49 = vadd.f32 %v2821_v50, %v2747_v55 }
 0x2a0   : > { %v2863_v42 = vadd.f32 %v2862_v21, %v2822_v49 }
 0x2a2   : > { %v2707_v47 = vpop.f32.mrf.mxu0 }
 0x2a3   : > { %v2825_v16 = vpop.f32.mrf.mxu2  ;;  %v2708_v6 = vadd.f32 %v2707_v47, %v2649_v56 }
 0x2a4   : > { %v2866_v34 = vpop.f32.mrf.mxu3 }
 0x2a5   : > { %v2753_v52 = vadd.f32 %v2752_v35, %v2708_v6 }
 0x2a7   : > { %v2826_v48 = vadd.f32 %v2825_v16, %v2753_v52 }
 0x2a9   : > { %v2867_v9 = vadd.f32 %v2866_v34, %v2826_v48 }
 0x2b1   : > { %v3032_v5 = vpop.f32.mrf.mxu1 }
 0x2b9   : > { %v3036_v12 = vpop.f32.mrf.mxu1  ;;  %v3090_v30 = vpop.f32.mrf.mxu2 }
 0x2ba   : > { %v2923_v25 = vpop.f32.mrf.mxu0 }
 0x2bb   : > { %v3033_v38 = vadd.f32 %v3032_v5, %v2923_v25 }
 0x2bc   : > { %v3134_v33 = vpop.f32.mrf.mxu3 }
 0x2bd   : > { %v3091_v26 = vadd.f32 %v3090_v30, %v3033_v38 }
 0x2bf   : > { %v3135_v20 = vadd.f32 %v3134_v33, %v3091_v26 }
 0x2c1   : > { %v3095_v63 = vpop.f32.mrf.mxu2 }
 0x2c2   : > { %v2931_v7 = vpop.f32.mrf.mxu0 }
 0x2c3   : > { %v3037_v14 = vadd.f32 %v3036_v12, %v2931_v7  ;;  %v3741_v7 = vld [vmem:[%s4181_s24] sm:$0xff] }
 0x2c4   : > { %v3140_v46 = vpop.f32.mrf.mxu3 }
 0x2c5   : > { %v3096_v57 = vadd.f32 %v3095_v63, %v3037_v14  ;;  %v3742_v14 = vld [vmem:[%s4181_s24 + $0x8] sm:$0xff] }
 0x2c7   : > { %v3141_v44 = vadd.f32 %v3140_v46, %v3096_v57 }
 0x2d1   : > { %v3250_v1 = vpop.f32.mrf.mxu1 }
 0x2d9   : > { %v3254_v29 = vpop.f32.mrf.mxu1 }
 0x2da   : > { %v3209_v13 = vpop.f32.mrf.mxu0 }
 0x2db   : > { %v3210_v40 = vadd.f32 %v3209_v13, %v3135_v20 }
 0x2dd   : > { %v3251_v53 = vadd.f32 %v3250_v1, %v3210_v40 }
 0x2df   : > { %v3257_v10 = vadd.f32 %v3251_v53, %v2863_v42 }
 0x2e1   : > { %v3261_v17 = vadd.f32 %v3259_v0, %v3257_v10 }
 0x2e2   : > { %v3213_v11 = vpop.f32.mrf.mxu0 }
 0x2e3   : > { %v3263_v28 = vmax.f32 %v3261_v17, 0.0  ;;  %v3214_v8 = vadd.f32 %v3213_v11, %v3141_v44 }
 0x2e5   : > { %v3255_v15 = vadd.f32 %v3254_v29, %v3214_v8  ;;  %v3315_v37 = vand.u32 4294901760, %v3263_v28 }
 0x2e7   : > { %v3258_v43 = vadd.f32 %v3255_v15, %v2867_v9  ;;  %3429 = vmatmul.f32.vlgmr.msra.gmra.mxu3 %v3315_v37  ;;  %v3316_v60 = vsub.f32 %v3263_v28, %v3315_v37 }
 0x2e9   : > { %v3262_v18 = vadd.f32 %v3260_v19, %v3258_v43  ;;  %3487 = vmatmul.f32.vlgmr.msrb.gmra.mxu0 %v3316_v60  ;;  %v3317_v32 = vand.u32 4294901760, %v3316_v60 }
 0x2eb   : > { %v3264_v24 = vmax.f32 %v3262_v18, 0.0  ;;  %3531 = vmatmul.f32.vlgmr.msrb.gmra.mxu1 %v3317_v32  ;;  %v3318_v31 = vsub.f32 %v3316_v60, %v3317_v32 }
 0x2ed   : > { %v3319_v35 = vand.u32 4294901760, %v3318_v31  ;;  %v3323_v50 = vand.u32 4294901760, %v3264_v24 }
 0x2ef   : > { %3320 = vmatmul.f32.vlgmr.msra.gmra.mxu2 %v3319_v35  ;;  %3433 = vmatmul.f32.gmra.mxu3 %v3323_v50  ;;  %v3324_v47 = vsub.f32 %v3264_v24, %v3323_v50 }
 0x2f1   : > { %3492 = vmatmul.f32.gmra.mxu0 %v3324_v47  ;;  %v3325_v39 = vand.u32 4294901760, %v3324_v47 }
 0x2f3   : > { %3537 = vmatmul.f32.gmra.mxu1 %v3325_v39  ;;  %v3326_v23 = vsub.f32 %v3324_v47, %v3325_v39 }
 0x2f5   : > { %v3327_v54 = vand.u32 4294901760, %v3326_v23 }
 0x2f7   : > { %3328 = vmatmul.f32.gmra.mxu2 %v3327_v54  ;;  %3647 = vmatmul.f32.vlgmr.msrb.gmra.mxu3 %v3315_v37 }
 0x2ff   : > { %3606 = vmatmul.f32.vlgmr.msrb.gmra.mxu2 %v3315_v37  ;;  %3651 = vmatmul.f32.gmra.mxu3 %v3323_v50 }
 0x307   : > { %3610 = vmatmul.f32.gmra.mxu2 %v3323_v50 }
 0x366   : > { %v3488_v25 = vpop.f32.mrf.mxu0 }
 0x368   : > { %v3532_v45 = vpop.f32.mrf.mxu1 }
 0x36a   : > { %v3430_v21 = vpop.f32.mrf.mxu3 }
 0x36e   : > { %v3493_v38 = vpop.f32.mrf.mxu0 }
 0x370   : > { %v3538_v55 = vpop.f32.mrf.mxu1 }
 0x372   : > { %v3321_v2 = vpop.f32.mrf.mxu2  ;;  %v3434_v5 = vpop.f32.mrf.mxu3 }
 0x373   : > { %v3322_v36 = vadd.f32 %v3321_v2, %v3281_v27 }
 0x375   : > { %v3431_v59 = vadd.f32 %v3430_v21, %v3322_v36 }
 0x377   : > { %v3489_v22 = vadd.f32 %v3488_v25, %v3431_v59 }
 0x379   : > { %v3533_v34 = vadd.f32 %v3532_v45, %v3489_v22 }
 0x37a   : > { %v3329_v58 = vpop.f32.mrf.mxu2  ;;  %v3648_v62 = vpop.f32.mrf.mxu3 }
 0x37b   : > { %v3330_v16 = vadd.f32 %v3329_v58, %v3282_v51 }
 0x37d   : > { %v3435_v4 = vadd.f32 %v3434_v5, %v3330_v16 }
 0x37f   : > { %v3494_v30 = vadd.f32 %v3493_v38, %v3435_v4 }
 0x381   : > { %v3539_v33 = vadd.f32 %v3538_v55, %v3494_v30 }
 0x382   : > { %v3607_v61 = vpop.f32.mrf.mxu2  ;;  %v3652_v6 = vpop.f32.mrf.mxu3 }
 0x383   : > { %v3608_v3 = vadd.f32 %v3607_v61, %v3533_v34 }
 0x385   : > { %v3649_v12 = vadd.f32 %v3648_v62, %v3608_v3 }
 0x387   : > { %v3655_v41 = vadd.f32 %v3741_v7, %v3649_v12 }
 0x389   : > { %v3657_v26 = vmax.f32 %v3655_v41, 0.0 }
 0x38a   : > { %v3611_v56 = vpop.f32.mrf.mxu2 }
 0x38b   : > { %3659 = vst [vmem:[%s494_s20] sm:$0xff] %v3657_v26  ;;  %v3612_v49 = vadd.f32 %v3611_v56, %v3539_v33 }
 0x38d   : > { %v3653_v20 = vadd.f32 %v3652_v6, %v3612_v49 }
 0x38f   : > { %v3656_v1 = vadd.f32 %v3742_v14, %v3653_v20 }
 0x391   : > { %v3658_v13 = vmax.f32 %v3656_v1, 0.0 }
 0x393   : > { %3660 = vst [vmem:[%s494_s20 + $0x8] sm:$0xff] %v3658_v13 }
 0x394 PF: > { %s25_s18 = sadd.s32 1, %s3749_s18  }
 0x395   : > { %p22_p4 = scmp.ge.s32.totalorder %s25_s18, 4  }
 0x397   :  { %24 = sbr.rel (!%p22_p4) target bundleno = 1 (0x1), region = 110 }

</bundles_post_ra>
